<compile_context>
chip_gen: v6e
topology: v6e:2x2x1
jax: 0.10.0
libtpu: 0.0.40
codegen_flags: <defaults>
</compile_context>

<pallas_src>
import functools

import jax
import jax.numpy as jnp
import numpy as np
from jax import lax
from jax.experimental import pallas as pl
from jax.experimental.pallas import tpu as pltpu

F32 = jnp.float32
BF16 = jnp.bfloat16

_VMEM = pl.BlockSpec(memory_space=pltpu.MemorySpace.VMEM)


def _mm(a, b):
    """MXU matmul: bf16 operands, f32 accumulation."""
    return jnp.dot(a.astype(BF16), b.astype(BF16), preferred_element_type=jnp.float32)


# ---------------------------------------------------------------------------
# Kernel 1: lin0 + edge network + 3 x (NNConv(mean) + ReLU + GRU), fully fused.
# ---------------------------------------------------------------------------
def _mpnn_kernel(x_ref, eattr_ref, src_ref, tgt_ref, expand_ref, reduce_ref,
                 lin0_w_ref, lin0_b_ref, nn1_w_ref, nn1_b_ref,
                 nn2_w_ref, nn2_b_ref, root_w_ref, conv_b_ref,
                 gru_wih_ref, gru_whh_ref, gru_bih_ref, gru_bhh_ref,
                 out_ref, *, dim, num_iters):
    n = x_ref.shape[0]
    e = eattr_ref.shape[0]

    # lin0 + ReLU (node embedding). GRU hidden h == out throughout the loop.
    out = jnp.maximum(_mm(x_ref[...], lin0_w_ref[...]) + lin0_b_ref[...], 0.0)
    h = out

    # Edge network (loop-invariant): Linear(5,128)+ReLU -> Linear(128, dim*dim).
    e_h = jnp.maximum(_mm(eattr_ref[...], nn1_w_ref[...]) + nn1_b_ref[...], 0.0)
    e_w = _mm(e_h, nn2_w_ref[...]) + nn2_b_ref[...]             # [E, dim*dim], i-major

    # Loop-invariant gather/scatter operators as exact 0/1 bf16 matrices.
    gather = (lax.broadcasted_iota(jnp.int32, (e, n), 1)
              == src_ref[...]).astype(BF16)                     # [E, N]  out[src] gather
    scat_mask = lax.broadcasted_iota(jnp.int32, (n, e), 0) == tgt_ref[...]
    scatter = scat_mask.astype(BF16)                            # [N, E]  segment-sum
    counts = jnp.sum(scat_mask.astype(jnp.float32), axis=1, keepdims=True)
    inv_counts = 1.0 / jnp.maximum(counts, 1.0)                 # aggr='mean'

    expand_m = expand_ref[...]                                  # [dim, dim*dim] 0/1
    reduce_m = reduce_ref[...]                                  # [dim*dim, dim] 0/1

    for _ in range(num_iters):
        # Gather out[src] on the MXU (keeps `out` VMEM-resident, no XLA gather).
        x_src = _mm(gather, out)                                # [E, dim]
        # msg[e,o] = sum_i x_src[e,i] * W_e[i,o]  ==  ((x_src @ R) * e_w) @ S
        x_rep = _mm(x_src, expand_m)                            # [E, dim*dim]
        msg = _mm(x_rep * e_w, reduce_m)                        # [E, dim]
        # Mean scatter + root transform + bias, fused ReLU (F.relu(conv(...))).
        mean = _mm(scatter, msg) * inv_counts                   # [N, dim]
        root = _mm(out, root_w_ref[...])
        m = jnp.maximum(mean + root + conv_b_ref[...], 0.0)

        # GRU cell with per-gate weights (no 32-lane gate slicing). Order: r,z,n.
        gi_r = _mm(m, gru_wih_ref[0]) + gru_bih_ref[0]
        gi_z = _mm(m, gru_wih_ref[1]) + gru_bih_ref[1]
        gi_n = _mm(m, gru_wih_ref[2]) + gru_bih_ref[2]
        gh_r = _mm(h, gru_whh_ref[0]) + gru_bhh_ref[0]
        gh_z = _mm(h, gru_whh_ref[1]) + gru_bhh_ref[1]
        gh_n = _mm(h, gru_whh_ref[2]) + gru_bhh_ref[2]
        r = jax.nn.sigmoid(gi_r + gh_r)
        z = jax.nn.sigmoid(gi_z + gh_z)
        cand = jnp.tanh(gi_n + r * gh_n)
        h = (1.0 - z) * cand + z * h
        out = h                                                 # seq_len=1 GRU: out == h

    out_ref[...] = out


# ---------------------------------------------------------------------------
# Kernel 2: Set2Set(dim, 3 steps) + lin1 + ReLU + lin2, fully fused.
# ---------------------------------------------------------------------------
def _set2set_head_kernel(x_ref, batch_ref,
                         wih_q_ref, wih_r_ref, whh_ref, bih_ref, bhh_ref,
                         lin1_wq_ref, lin1_wr_ref, lin1_b_ref,
                         lin2_w_ref, lin2_b_ref, y_ref,
                         *, dim, num_graphs, steps):
    xn = x_ref[...]                                             # [N, dim]
    n = xn.shape[0]
    b = num_graphs
    member = lax.broadcasted_iota(jnp.int32, (b, n), 0) == batch_ref[...]   # [B, N]

    hh = jnp.zeros((b, dim), jnp.float32)
    cc = jnp.zeros((b, dim), jnp.float32)
    q_prev = jnp.zeros((b, dim), jnp.float32)   # first half of q_star (q)
    r_prev = jnp.zeros((b, dim), jnp.float32)   # second half of q_star (r)

    for _ in range(steps):
        # LSTM gate pre-activation; q_star is never materialized (split weights).
        def gate(g):
            return (_mm(q_prev, wih_q_ref[g]) + _mm(r_prev, wih_r_ref[g])
                    + bih_ref[g] + _mm(hh, whh_ref[g]) + bhh_ref[g])
        ig = jax.nn.sigmoid(gate(0))
        fg = jax.nn.sigmoid(gate(1))
        gg = jnp.tanh(gate(2))
        og = jax.nn.sigmoid(gate(3))
        cc = fg * cc + ig * gg
        hh = og * jnp.tanh(cc)

        # Segment softmax attention + weighted readout on the MXU.
        scores = lax.dot_general(hh.astype(BF16), xn.astype(BF16),
                                 (((1,), (1,)), ((), ())),
                                 preferred_element_type=jnp.float32)        # [B, N]
        masked = jnp.where(member, scores, jnp.float32(-1e30))
        mmax = jnp.max(masked, axis=1, keepdims=True)
        exps = jnp.where(member, jnp.exp(masked - mmax), 0.0)
        denom = jnp.sum(exps, axis=1, keepdims=True) + 1e-16
        attn = exps / denom                                                 # [B, N]
        r_new = _mm(attn, xn)                                               # [B, dim]
        q_prev, r_prev = hh, r_new

    # lin1(ReLU) on q_star = [q | r] via split weights, then lin2.
    y = jnp.maximum(_mm(q_prev, lin1_wq_ref[...]) + _mm(r_prev, lin1_wr_ref[...])
                    + lin1_b_ref[...], 0.0)
    y_ref[...] = _mm(y, lin2_w_ref[...]) + lin2_b_ref[...]


# ------------------------------------------------------------------- parameters
def init_params(key, num_features, dim):
    ks = jax.random.split(key, 20)

    def w(k, shape, scale=0.1):
        return (scale * jax.random.normal(k, shape)).astype(F32)

    return {
        'dim': dim,
        'lin0_w': w(ks[0], (num_features, dim)), 'lin0_b': w(ks[1], (dim,)),
        'nn1_w': w(ks[2], (5, 128)), 'nn1_b': w(ks[3], (128,)),
        'nn2_w': w(ks[4], (128, dim * dim), 0.05), 'nn2_b': w(ks[5], (dim * dim,), 0.05),
        'root_w': w(ks[6], (dim, dim)), 'conv_b': w(ks[7], (dim,)),
        'gru_wih': w(ks[8], (dim, 3 * dim)), 'gru_whh': w(ks[9], (dim, 3 * dim)),
        'gru_bih': w(ks[10], (3 * dim,)), 'gru_bhh': w(ks[11], (3 * dim,)),
        'lstm_wih': w(ks[12], (2 * dim, 4 * dim)), 'lstm_whh': w(ks[13], (dim, 4 * dim)),
        'lstm_bih': w(ks[14], (4 * dim,)), 'lstm_bhh': w(ks[15], (4 * dim,)),
        'lin1_w': w(ks[16], (2 * dim, dim)), 'lin1_b': w(ks[17], (dim,)),
        'lin2_w': w(ks[18], (dim, 1)), 'lin2_b': w(ks[19], (1,)),
    }


# --------------------------------------------------------------- forward (Pallas)
def net_forward(params, x, edge_index, edge_attr, batch, num_graphs):
    p = params
    dim = p['dim']
    n = x.shape[0]

    src_col = edge_index[0].reshape(-1, 1).astype(jnp.int32)        # [E, 1]
    tgt_row = edge_index[1].reshape(1, -1).astype(jnp.int32)        # [1, E]
    batch_row = batch.reshape(1, -1).astype(jnp.int32)              # [1, N]

    # Exact 0/1 expand / reduce matrices for the MXU edge-message contraction.
    ii = jnp.arange(dim, dtype=jnp.int32)
    jj = jnp.arange(dim * dim, dtype=jnp.int32)
    expand_mat = (jj[None, :] // dim == ii[:, None]).astype(BF16)   # [dim, dim*dim]
    reduce_mat = (jj[:, None] % dim == ii[None, :]).astype(BF16)    # [dim*dim, dim]

    def gate_split(w, g):          # [in, g*dim] -> [g, in, dim]
        return jnp.stack([w[:, k * dim:(k + 1) * dim] for k in range(g)], axis=0)

    def bias_split(bvec, g):       # [g*dim] -> [g, 1, dim]
        return bvec.reshape(g, 1, dim)

    gru_wih = gate_split(p['gru_wih'], 3)
    gru_whh = gate_split(p['gru_whh'], 3)
    gru_bih = bias_split(p['gru_bih'], 3)
    gru_bhh = bias_split(p['gru_bhh'], 3)

    lstm_wih = gate_split(p['lstm_wih'], 4)                         # [4, 2*dim, dim]
    lstm_whh = gate_split(p['lstm_whh'], 4)
    lstm_bih = bias_split(p['lstm_bih'], 4)
    lstm_bhh = bias_split(p['lstm_bhh'], 4)

    cp = pltpu.CompilerParams(vmem_limit_bytes=32 * 1024 * 1024)

    out_nodes = pl.pallas_call(
        functools.partial(_mpnn_kernel, dim=dim, num_iters=3),
        out_shape=jax.ShapeDtypeStruct((n, dim), F32),
        in_specs=[_VMEM] * 18,
        out_specs=_VMEM,
        compiler_params=cp,
    )(x, edge_attr, src_col, tgt_row, expand_mat, reduce_mat,
      p['lin0_w'], p['lin0_b'].reshape(1, dim),
      p['nn1_w'], p['nn1_b'].reshape(1, -1),
      p['nn2_w'], p['nn2_b'].reshape(1, -1),
      p['root_w'], p['conv_b'].reshape(1, dim),
      gru_wih, gru_whh, gru_bih, gru_bhh)

    y = pl.pallas_call(
        functools.partial(_set2set_head_kernel, dim=dim,
                          num_graphs=num_graphs, steps=3),
        out_shape=jax.ShapeDtypeStruct((num_graphs, 1), F32),
        in_specs=[_VMEM] * 12,
        out_specs=_VMEM,
        compiler_params=cp,
    )(out_nodes, batch_row,
      lstm_wih[:, :dim, :], lstm_wih[:, dim:, :], lstm_whh, lstm_bih, lstm_bhh,
      p['lin1_w'][:dim, :], p['lin1_w'][dim:, :], p['lin1_b'].reshape(1, dim),
      p['lin2_w'], p['lin2_b'].reshape(1, 1))

    return y.reshape(-1)


# --------------------------------------------------------- pure-JAX reference
def reference_forward(params, x, edge_index, edge_attr, batch, num_graphs):
    p = params
    dim = p['dim']

    def lin(v, w, b):
        return jnp.dot(v, w, precision='highest') + b

    out = jax.nn.relu(lin(x, p['lin0_w'], p['lin0_b']))
    h = out
    src, tgt = edge_index[0], edge_index[1]
    e_h = jax.nn.relu(lin(edge_attr, p['nn1_w'], p['nn1_b']))
    e_w = lin(e_h, p['nn2_w'], p['nn2_b']).reshape(-1, dim, dim)
    n = x.shape[0]
    for _ in range(3):
        x_src = out[src]
        msg = jnp.einsum('ei,eio->eo', x_src, e_w, precision='highest')
        summed = jax.ops.segment_sum(msg, tgt, num_segments=n)
        counts = jax.ops.segment_sum(jnp.ones((msg.shape[0],), F32), tgt, num_segments=n)
        mean = summed / jnp.maximum(counts, 1.0)[:, None]
        m = jax.nn.relu(mean + jnp.dot(out, p['root_w'], precision='highest') + p['conv_b'])
        gi = jnp.dot(m, p['gru_wih'], precision='highest') + p['gru_bih']
        gh = jnp.dot(h, p['gru_whh'], precision='highest') + p['gru_bhh']
        r = jax.nn.sigmoid(gi[:, :dim] + gh[:, :dim])
        z = jax.nn.sigmoid(gi[:, dim:2 * dim] + gh[:, dim:2 * dim])
        nn_ = jnp.tanh(gi[:, 2 * dim:] + r * gh[:, 2 * dim:])
        h = (1.0 - z) * nn_ + z * h
        out = h
    b = num_graphs
    q_star = jnp.zeros((b, 2 * dim), F32)
    hh = jnp.zeros((b, dim), F32)
    cc = jnp.zeros((b, dim), F32)
    for _ in range(3):
        gates = (jnp.dot(q_star, p['lstm_wih'], precision='highest') + p['lstm_bih']
                 + jnp.dot(hh, p['lstm_whh'], precision='highest') + p['lstm_bhh'])
        i = jax.nn.sigmoid(gates[:, :dim])
        f = jax.nn.sigmoid(gates[:, dim:2 * dim])
        g = jnp.tanh(gates[:, 2 * dim:3 * dim])
        o = jax.nn.sigmoid(gates[:, 3 * dim:])
        cc = f * cc + i * g
        hh = o * jnp.tanh(cc)
        q = hh
        e = jnp.sum(out * q[batch], axis=-1)
        e_max = jax.ops.segment_max(e, batch, num_segments=b)
        a = jnp.exp(e - e_max[batch])
        denom = jax.ops.segment_sum(a, batch, num_segments=b) + 1e-16
        a = a / denom[batch]
        r = jax.ops.segment_sum(a[:, None] * out, batch, num_segments=b)
        q_star = jnp.concatenate([q, r], axis=-1)
    y = jax.nn.relu(lin(q_star, p['lin1_w'], p['lin1_b']))
    y = lin(y, p['lin2_w'], p['lin2_b'])
    return y.reshape(-1)


if __name__ == "__main__":
    key = jax.random.PRNGKey(0)
    num_features, dim = 8, 32
    n_per_graph, num_graphs = 8, 2
    n_nodes = n_per_graph * num_graphs
    e_per_graph = 16
    n_edges = e_per_graph * num_graphs

    k_param, k_x, k_src, k_tgt, k_attr = jax.random.split(key, 5)
    params = init_params(k_param, num_features, dim)

    x = jax.random.normal(k_x, (n_nodes, num_features), dtype=F32)
    src_l, tgt_l = [], []
    for g in range(num_graphs):  # keep edges inside each graph
        s = jax.random.randint(jax.random.fold_in(k_src, g), (e_per_graph,), 0, n_per_graph)
        t = jax.random.randint(jax.random.fold_in(k_tgt, g), (e_per_graph,), 0, n_per_graph)
        src_l.append(s + g * n_per_graph)
        tgt_l.append(t + g * n_per_graph)
    edge_index = jnp.stack([jnp.concatenate(src_l), jnp.concatenate(tgt_l)], 0).astype(jnp.int32)
    edge_attr = jax.random.normal(k_attr, (n_edges, 5), dtype=F32)
    batch = jnp.repeat(jnp.arange(num_graphs, dtype=jnp.int32), n_per_graph)

    y = net_forward(params, x, edge_index, edge_attr, batch, num_graphs)
    y = jax.block_until_ready(y)

    y_ref = reference_forward(params, x, edge_index, edge_attr, batch, num_graphs)
    # Slightly relaxed atol vs pure-f32: kernel uses bf16 MXU operands with f32
    # accumulation (per perf review); elementwise math stays f32.
    np.testing.assert_allclose(np.asarray(y), np.asarray(y_ref), rtol=2e-2, atol=5e-3)

    print("KERNEL_OK")
</pallas_src>

<mosaic_0001>
module attributes {stable_mosaic.version = 11 : i64} {
  func.func @_mpnn_kernel(%arg0: memref<16x8xf32, #tpu.memory_space<vmem>>, %arg1: memref<32x5xf32, #tpu.memory_space<vmem>>, %arg2: memref<32x1xi32, #tpu.memory_space<vmem>>, %arg3: memref<1x32xi32, #tpu.memory_space<vmem>>, %arg4: memref<32x1024xbf16, #tpu.memory_space<vmem>>, %arg5: memref<1024x32xbf16, #tpu.memory_space<vmem>>, %arg6: memref<8x32xf32, #tpu.memory_space<vmem>>, %arg7: memref<1x32xf32, #tpu.memory_space<vmem>>, %arg8: memref<5x128xf32, #tpu.memory_space<vmem>>, %arg9: memref<1x128xf32, #tpu.memory_space<vmem>>, %arg10: memref<128x1024xf32, #tpu.memory_space<vmem>>, %arg11: memref<1x1024xf32, #tpu.memory_space<vmem>>, %arg12: memref<32x32xf32, #tpu.memory_space<vmem>>, %arg13: memref<1x32xf32, #tpu.memory_space<vmem>>, %arg14: memref<3x32x32xf32, #tpu.memory_space<vmem>>, %arg15: memref<3x32x32xf32, #tpu.memory_space<vmem>>, %arg16: memref<3x1x32xf32, #tpu.memory_space<vmem>>, %arg17: memref<3x1x32xf32, #tpu.memory_space<vmem>>, %arg18: memref<16x32xf32, #tpu.memory_space<vmem>>) attributes {dimension_semantics = [], scalar_prefetch = 0 : i64, scratch_operands = 0 : i64, tpu.core_type = #tpu.core_type<tc>} {
    %c0 = arith.constant 0 : index
    %c0_0 = arith.constant 0 : index
    %0 = vector.load %arg0[%c0, %c0_0] : memref<16x8xf32, #tpu.memory_space<vmem>>, vector<16x8xf32>
    %c0_1 = arith.constant 0 : index
    %c0_2 = arith.constant 0 : index
    %1 = vector.load %arg6[%c0_1, %c0_2] : memref<8x32xf32, #tpu.memory_space<vmem>>, vector<8x32xf32>
    %2 = arith.truncf %0 : vector<16x8xf32> to vector<16x8xbf16>
    %3 = arith.truncf %1 : vector<8x32xf32> to vector<8x32xbf16>
    %cst = arith.constant dense<0.000000e+00> : vector<16x32xf32>
    %4 = tpu.matmul %2, %3, %cst {dimension_numbers = #tpu.dot_dimension_numbers<[1], [0], [0], [1], [0, 0, 1, 1], [], []>} : vector<16x8xbf16>, vector<8x32xbf16>, vector<16x32xf32> -> vector<16x32xf32>
    %c0_3 = arith.constant 0 : index
    %c0_4 = arith.constant 0 : index
    %5 = vector.load %arg7[%c0_3, %c0_4] : memref<1x32xf32, #tpu.memory_space<vmem>>, vector<1x32xf32>
    %6 = vector.broadcast %5 : vector<1x32xf32> to vector<16x32xf32>
    %7 = arith.addf %4, %6 : vector<16x32xf32>
    %cst_5 = arith.constant 0.000000e+00 : f32
    %8 = vector.broadcast %cst_5 : f32 to vector<16x32xf32>
    %9 = arith.maximumf %7, %8 : vector<16x32xf32>
    %c0_6 = arith.constant 0 : index
    %c0_7 = arith.constant 0 : index
    %10 = vector.load %arg1[%c0_6, %c0_7] : memref<32x5xf32, #tpu.memory_space<vmem>>, vector<32x5xf32>
    %c0_8 = arith.constant 0 : index
    %c0_9 = arith.constant 0 : index
    %11 = vector.load %arg8[%c0_8, %c0_9] : memref<5x128xf32, #tpu.memory_space<vmem>>, vector<5x128xf32>
    %12 = arith.truncf %10 : vector<32x5xf32> to vector<32x5xbf16>
    %13 = arith.truncf %11 : vector<5x128xf32> to vector<5x128xbf16>
    %cst_10 = arith.constant dense<0.000000e+00> : vector<32x128xf32>
    %14 = tpu.matmul %12, %13, %cst_10 {dimension_numbers = #tpu.dot_dimension_numbers<[1], [0], [0], [1], [0, 0, 1, 1], [], []>} : vector<32x5xbf16>, vector<5x128xbf16>, vector<32x128xf32> -> vector<32x128xf32>
    %c0_11 = arith.constant 0 : index
    %c0_12 = arith.constant 0 : index
    %15 = vector.load %arg9[%c0_11, %c0_12] : memref<1x128xf32, #tpu.memory_space<vmem>>, vector<1x128xf32>
    %16 = vector.broadcast %15 : vector<1x128xf32> to vector<32x128xf32>
    %17 = arith.addf %14, %16 : vector<32x128xf32>
    %cst_13 = arith.constant 0.000000e+00 : f32
    %18 = vector.broadcast %cst_13 : f32 to vector<32x128xf32>
    %19 = arith.maximumf %17, %18 : vector<32x128xf32>
    %c0_14 = arith.constant 0 : index
    %c0_15 = arith.constant 0 : index
    %20 = vector.load %arg10[%c0_14, %c0_15] : memref<128x1024xf32, #tpu.memory_space<vmem>>, vector<128x1024xf32>
    %21 = arith.truncf %19 : vector<32x128xf32> to vector<32x128xbf16>
    %22 = arith.truncf %20 : vector<128x1024xf32> to vector<128x1024xbf16>
    %cst_16 = arith.constant dense<0.000000e+00> : vector<32x1024xf32>
    %23 = tpu.matmul %21, %22, %cst_16 {dimension_numbers = #tpu.dot_dimension_numbers<[1], [0], [0], [1], [0, 0, 1, 1], [], []>} : vector<32x128xbf16>, vector<128x1024xbf16>, vector<32x1024xf32> -> vector<32x1024xf32>
    %c0_17 = arith.constant 0 : index
    %c0_18 = arith.constant 0 : index
    %24 = vector.load %arg11[%c0_17, %c0_18] : memref<1x1024xf32, #tpu.memory_space<vmem>>, vector<1x1024xf32>
    %25 = vector.broadcast %24 : vector<1x1024xf32> to vector<32x1024xf32>
    %26 = arith.addf %23, %25 : vector<32x1024xf32>
    %27 = tpu.iota {dimensions = array<i32: 1>} : vector<32x16xi32>
    %c0_19 = arith.constant 0 : index
    %c0_20 = arith.constant 0 : index
    %28 = vector.load %arg2[%c0_19, %c0_20] : memref<32x1xi32, #tpu.memory_space<vmem>>, vector<32x1xi32>
    %29 = vector.broadcast %28 : vector<32x1xi32> to vector<32x16xi32>
    %30 = arith.cmpi eq, %27, %29 : vector<32x16xi32>
    %31 = arith.extui %30 : vector<32x16xi1> to vector<32x16xi32>
    %32 = arith.sitofp %31 : vector<32x16xi32> to vector<32x16xf32>
    %33 = arith.truncf %32 : vector<32x16xf32> to vector<32x16xbf16>
    %34 = tpu.iota {dimensions = array<i32: 0>} : vector<16x32xi32>
    %c0_21 = arith.constant 0 : index
    %c0_22 = arith.constant 0 : index
    %35 = vector.load %arg3[%c0_21, %c0_22] : memref<1x32xi32, #tpu.memory_space<vmem>>, vector<1x32xi32>
    %36 = vector.broadcast %35 : vector<1x32xi32> to vector<16x32xi32>
    %37 = arith.cmpi eq, %34, %36 : vector<16x32xi32>
    %38 = arith.extui %37 : vector<16x32xi1> to vector<16x32xi32>
    %39 = arith.sitofp %38 : vector<16x32xi32> to vector<16x32xf32>
    %40 = arith.truncf %39 : vector<16x32xf32> to vector<16x32xbf16>
    %41 = arith.extui %37 : vector<16x32xi1> to vector<16x32xi32>
    %42 = arith.sitofp %41 : vector<16x32xi32> to vector<16x32xf32>
    %cst_23 = arith.constant dense<0.000000e+00> : vector<16xf32>
    %43 = vector.multi_reduction <add>, %42, %cst_23 [1] : vector<16x32xf32> to vector<16xf32>
    %44 = vector.shape_cast %43 : vector<16xf32> to vector<16x1xf32>
    %cst_24 = arith.constant 1.000000e+00 : f32
    %45 = vector.broadcast %cst_24 : f32 to vector<16x1xf32>
    %46 = arith.maximumf %44, %45 : vector<16x1xf32>
    %cst_25 = arith.constant 1.000000e+00 : f32
    %47 = vector.broadcast %cst_25 : f32 to vector<16x1xf32>
    %48 = arith.divf %47, %46 : vector<16x1xf32>
    %c0_26 = arith.constant 0 : index
    %c0_27 = arith.constant 0 : index
    %49 = vector.load %arg4[%c0_26, %c0_27] : memref<32x1024xbf16, #tpu.memory_space<vmem>>, vector<32x1024xbf16>
    %c0_28 = arith.constant 0 : index
    %c0_29 = arith.constant 0 : index
    %50 = vector.load %arg5[%c0_28, %c0_29] : memref<1024x32xbf16, #tpu.memory_space<vmem>>, vector<1024x32xbf16>
    %51 = arith.truncf %9 : vector<16x32xf32> to vector<16x32xbf16>
    %cst_30 = arith.constant dense<0.000000e+00> : vector<32x32xf32>
    %52 = tpu.matmul %33, %51, %cst_30 {dimension_numbers = #tpu.dot_dimension_numbers<[1], [0], [0], [1], [0, 0, 1, 1], [], []>} : vector<32x16xbf16>, vector<16x32xbf16>, vector<32x32xf32> -> vector<32x32xf32>
    %53 = arith.truncf %52 : vector<32x32xf32> to vector<32x32xbf16>
    %cst_31 = arith.constant dense<0.000000e+00> : vector<32x1024xf32>
    %54 = tpu.matmul %53, %49, %cst_31 {dimension_numbers = #tpu.dot_dimension_numbers<[1], [0], [0], [1], [0, 0, 1, 1], [], []>} : vector<32x32xbf16>, vector<32x1024xbf16>, vector<32x1024xf32> -> vector<32x1024xf32>
    %55 = arith.mulf %54, %26 : vector<32x1024xf32>
    %56 = arith.truncf %55 : vector<32x1024xf32> to vector<32x1024xbf16>
    %cst_32 = arith.constant dense<0.000000e+00> : vector<32x32xf32>
    %57 = tpu.matmul %56, %50, %cst_32 {dimension_numbers = #tpu.dot_dimension_numbers<[1], [0], [0], [1], [0, 0, 1, 1], [], []>} : vector<32x1024xbf16>, vector<1024x32xbf16>, vector<32x32xf32> -> vector<32x32xf32>
    %58 = arith.truncf %57 : vector<32x32xf32> to vector<32x32xbf16>
    %cst_33 = arith.constant dense<0.000000e+00> : vector<16x32xf32>
    %59 = tpu.matmul %40, %58, %cst_33 {dimension_numbers = #tpu.dot_dimension_numbers<[1], [0], [0], [1], [0, 0, 1, 1], [], []>} : vector<16x32xbf16>, vector<32x32xbf16>, vector<16x32xf32> -> vector<16x32xf32>
    %60 = vector.broadcast %48 : vector<16x1xf32> to vector<16x32xf32>
    %61 = arith.mulf %59, %60 : vector<16x32xf32>
    %c0_34 = arith.constant 0 : index
    %c0_35 = arith.constant 0 : index
    %62 = vector.load %arg12[%c0_34, %c0_35] : memref<32x32xf32, #tpu.memory_space<vmem>>, vector<32x32xf32>
    %63 = arith.truncf %9 : vector<16x32xf32> to vector<16x32xbf16>
    %64 = arith.truncf %62 : vector<32x32xf32> to vector<32x32xbf16>
    %cst_36 = arith.constant dense<0.000000e+00> : vector<16x32xf32>
    %65 = tpu.matmul %63, %64, %cst_36 {dimension_numbers = #tpu.dot_dimension_numbers<[1], [0], [0], [1], [0, 0, 1, 1], [], []>} : vector<16x32xbf16>, vector<32x32xbf16>, vector<16x32xf32> -> vector<16x32xf32>
    %66 = arith.addf %61, %65 : vector<16x32xf32>
    %c0_37 = arith.constant 0 : index
    %c0_38 = arith.constant 0 : index
    %67 = vector.load %arg13[%c0_37, %c0_38] : memref<1x32xf32, #tpu.memory_space<vmem>>, vector<1x32xf32>
    %68 = vector.broadcast %67 : vector<1x32xf32> to vector<16x32xf32>
    %69 = arith.addf %66, %68 : vector<16x32xf32>
    %cst_39 = arith.constant 0.000000e+00 : f32
    %70 = vector.broadcast %cst_39 : f32 to vector<16x32xf32>
    %71 = arith.maximumf %69, %70 : vector<16x32xf32>
    %c0_40 = arith.constant 0 : index
    %c0_41 = arith.constant 0 : index
    %c0_42 = arith.constant 0 : index
    %72 = vector.load %arg14[%c0_40, %c0_41, %c0_42] : memref<3x32x32xf32, #tpu.memory_space<vmem>>, vector<1x32x32xf32>
    %73 = vector.shape_cast %72 : vector<1x32x32xf32> to vector<32x32xf32>
    %74 = arith.truncf %71 : vector<16x32xf32> to vector<16x32xbf16>
    %75 = arith.truncf %73 : vector<32x32xf32> to vector<32x32xbf16>
    %cst_43 = arith.constant dense<0.000000e+00> : vector<16x32xf32>
    %76 = tpu.matmul %74, %75, %cst_43 {dimension_numbers = #tpu.dot_dimension_numbers<[1], [0], [0], [1], [0, 0, 1, 1], [], []>} : vector<16x32xbf16>, vector<32x32xbf16>, vector<16x32xf32> -> vector<16x32xf32>
    %c0_44 = arith.constant 0 : index
    %c0_45 = arith.constant 0 : index
    %c0_46 = arith.constant 0 : index
    %77 = vector.load %arg16[%c0_44, %c0_45, %c0_46] : memref<3x1x32xf32, #tpu.memory_space<vmem>>, vector<1x1x32xf32>
    %78 = vector.shape_cast %77 : vector<1x1x32xf32> to vector<1x32xf32>
    %79 = vector.broadcast %78 : vector<1x32xf32> to vector<16x32xf32>
    %80 = arith.addf %76, %79 : vector<16x32xf32>
    %c1 = arith.constant 1 : index
    %c0_47 = arith.constant 0 : index
    %c0_48 = arith.constant 0 : index
    %81 = vector.load %arg14[%c1, %c0_47, %c0_48] : memref<3x32x32xf32, #tpu.memory_space<vmem>>, vector<1x32x32xf32>
    %82 = vector.shape_cast %81 : vector<1x32x32xf32> to vector<32x32xf32>
    %83 = arith.truncf %71 : vector<16x32xf32> to vector<16x32xbf16>
    %84 = arith.truncf %82 : vector<32x32xf32> to vector<32x32xbf16>
    %cst_49 = arith.constant dense<0.000000e+00> : vector<16x32xf32>
    %85 = tpu.matmul %83, %84, %cst_49 {dimension_numbers = #tpu.dot_dimension_numbers<[1], [0], [0], [1], [0, 0, 1, 1], [], []>} : vector<16x32xbf16>, vector<32x32xbf16>, vector<16x32xf32> -> vector<16x32xf32>
    %c1_50 = arith.constant 1 : index
    %c0_51 = arith.constant 0 : index
    %c0_52 = arith.constant 0 : index
    %86 = vector.load %arg16[%c1_50, %c0_51, %c0_52] : memref<3x1x32xf32, #tpu.memory_space<vmem>>, vector<1x1x32xf32>
    %87 = vector.shape_cast %86 : vector<1x1x32xf32> to vector<1x32xf32>
    %88 = vector.broadcast %87 : vector<1x32xf32> to vector<16x32xf32>
    %89 = arith.addf %85, %88 : vector<16x32xf32>
    %c2 = arith.constant 2 : index
    %c0_53 = arith.constant 0 : index
    %c0_54 = arith.constant 0 : index
    %90 = vector.load %arg14[%c2, %c0_53, %c0_54] : memref<3x32x32xf32, #tpu.memory_space<vmem>>, vector<1x32x32xf32>
    %91 = vector.shape_cast %90 : vector<1x32x32xf32> to vector<32x32xf32>
    %92 = arith.truncf %71 : vector<16x32xf32> to vector<16x32xbf16>
    %93 = arith.truncf %91 : vector<32x32xf32> to vector<32x32xbf16>
    %cst_55 = arith.constant dense<0.000000e+00> : vector<16x32xf32>
    %94 = tpu.matmul %92, %93, %cst_55 {dimension_numbers = #tpu.dot_dimension_numbers<[1], [0], [0], [1], [0, 0, 1, 1], [], []>} : vector<16x32xbf16>, vector<32x32xbf16>, vector<16x32xf32> -> vector<16x32xf32>
    %c2_56 = arith.constant 2 : index
    %c0_57 = arith.constant 0 : index
    %c0_58 = arith.constant 0 : index
    %95 = vector.load %arg16[%c2_56, %c0_57, %c0_58] : memref<3x1x32xf32, #tpu.memory_space<vmem>>, vector<1x1x32xf32>
    %96 = vector.shape_cast %95 : vector<1x1x32xf32> to vector<1x32xf32>
    %97 = vector.broadcast %96 : vector<1x32xf32> to vector<16x32xf32>
    %98 = arith.addf %94, %97 : vector<16x32xf32>
    %c0_59 = arith.constant 0 : index
    %c0_60 = arith.constant 0 : index
    %c0_61 = arith.constant 0 : index
    %99 = vector.load %arg15[%c0_59, %c0_60, %c0_61] : memref<3x32x32xf32, #tpu.memory_space<vmem>>, vector<1x32x32xf32>
    %100 = vector.shape_cast %99 : vector<1x32x32xf32> to vector<32x32xf32>
    %101 = arith.truncf %9 : vector<16x32xf32> to vector<16x32xbf16>
    %102 = arith.truncf %100 : vector<32x32xf32> to vector<32x32xbf16>
    %cst_62 = arith.constant dense<0.000000e+00> : vector<16x32xf32>
    %103 = tpu.matmul %101, %102, %cst_62 {dimension_numbers = #tpu.dot_dimension_numbers<[1], [0], [0], [1], [0, 0, 1, 1], [], []>} : vector<16x32xbf16>, vector<32x32xbf16>, vector<16x32xf32> -> vector<16x32xf32>
    %c0_63 = arith.constant 0 : index
    %c0_64 = arith.constant 0 : index
    %c0_65 = arith.constant 0 : index
    %104 = vector.load %arg17[%c0_63, %c0_64, %c0_65] : memref<3x1x32xf32, #tpu.memory_space<vmem>>, vector<1x1x32xf32>
    %105 = vector.shape_cast %104 : vector<1x1x32xf32> to vector<1x32xf32>
    %106 = vector.broadcast %105 : vector<1x32xf32> to vector<16x32xf32>
    %107 = arith.addf %103, %106 : vector<16x32xf32>
    %c1_66 = arith.constant 1 : index
    %c0_67 = arith.constant 0 : index
    %c0_68 = arith.constant 0 : index
    %108 = vector.load %arg15[%c1_66, %c0_67, %c0_68] : memref<3x32x32xf32, #tpu.memory_space<vmem>>, vector<1x32x32xf32>
    %109 = vector.shape_cast %108 : vector<1x32x32xf32> to vector<32x32xf32>
    %110 = arith.truncf %9 : vector<16x32xf32> to vector<16x32xbf16>
    %111 = arith.truncf %109 : vector<32x32xf32> to vector<32x32xbf16>
    %cst_69 = arith.constant dense<0.000000e+00> : vector<16x32xf32>
    %112 = tpu.matmul %110, %111, %cst_69 {dimension_numbers = #tpu.dot_dimension_numbers<[1], [0], [0], [1], [0, 0, 1, 1], [], []>} : vector<16x32xbf16>, vector<32x32xbf16>, vector<16x32xf32> -> vector<16x32xf32>
    %c1_70 = arith.constant 1 : index
    %c0_71 = arith.constant 0 : index
    %c0_72 = arith.constant 0 : index
    %113 = vector.load %arg17[%c1_70, %c0_71, %c0_72] : memref<3x1x32xf32, #tpu.memory_space<vmem>>, vector<1x1x32xf32>
    %114 = vector.shape_cast %113 : vector<1x1x32xf32> to vector<1x32xf32>
    %115 = vector.broadcast %114 : vector<1x32xf32> to vector<16x32xf32>
    %116 = arith.addf %112, %115 : vector<16x32xf32>
    %c2_73 = arith.constant 2 : index
    %c0_74 = arith.constant 0 : index
    %c0_75 = arith.constant 0 : index
    %117 = vector.load %arg15[%c2_73, %c0_74, %c0_75] : memref<3x32x32xf32, #tpu.memory_space<vmem>>, vector<1x32x32xf32>
    %118 = vector.shape_cast %117 : vector<1x32x32xf32> to vector<32x32xf32>
    %119 = arith.truncf %9 : vector<16x32xf32> to vector<16x32xbf16>
    %120 = arith.truncf %118 : vector<32x32xf32> to vector<32x32xbf16>
    %cst_76 = arith.constant dense<0.000000e+00> : vector<16x32xf32>
    %121 = tpu.matmul %119, %120, %cst_76 {dimension_numbers = #tpu.dot_dimension_numbers<[1], [0], [0], [1], [0, 0, 1, 1], [], []>} : vector<16x32xbf16>, vector<32x32xbf16>, vector<16x32xf32> -> vector<16x32xf32>
    %c2_77 = arith.constant 2 : index
    %c0_78 = arith.constant 0 : index
    %c0_79 = arith.constant 0 : index
    %122 = vector.load %arg17[%c2_77, %c0_78, %c0_79] : memref<3x1x32xf32, #tpu.memory_space<vmem>>, vector<1x1x32xf32>
    %123 = vector.shape_cast %122 : vector<1x1x32xf32> to vector<1x32xf32>
    %124 = vector.broadcast %123 : vector<1x32xf32> to vector<16x32xf32>
    %125 = arith.addf %121, %124 : vector<16x32xf32>
    %126 = arith.addf %80, %107 : vector<16x32xf32>
    %127 = arith.negf %126 : vector<16x32xf32>
    %128 = math.exp %127 : vector<16x32xf32>
    %cst_80 = arith.constant 1.000000e+00 : f32
    %129 = vector.broadcast %cst_80 : f32 to vector<16x32xf32>
    %130 = arith.addf %129, %128 : vector<16x32xf32>
    %131 = arith.divf %129, %130 : vector<16x32xf32>
    %132 = arith.addf %89, %116 : vector<16x32xf32>
    %133 = arith.negf %132 : vector<16x32xf32>
    %134 = math.exp %133 : vector<16x32xf32>
    %cst_81 = arith.constant 1.000000e+00 : f32
    %135 = vector.broadcast %cst_81 : f32 to vector<16x32xf32>
    %136 = arith.addf %135, %134 : vector<16x32xf32>
    %137 = arith.divf %135, %136 : vector<16x32xf32>
    %138 = arith.mulf %131, %125 : vector<16x32xf32>
    %139 = arith.addf %98, %138 : vector<16x32xf32>
    %140 = math.tanh %139 : vector<16x32xf32>
    %cst_82 = arith.constant 1.000000e+00 : f32
    %141 = vector.broadcast %cst_82 : f32 to vector<16x32xf32>
    %142 = arith.subf %141, %137 : vector<16x32xf32>
    %143 = arith.mulf %142, %140 : vector<16x32xf32>
    %144 = arith.mulf %137, %9 : vector<16x32xf32>
    %145 = arith.addf %143, %144 : vector<16x32xf32>
    %146 = arith.truncf %145 : vector<16x32xf32> to vector<16x32xbf16>
    %cst_83 = arith.constant dense<0.000000e+00> : vector<32x32xf32>
    %147 = tpu.matmul %33, %146, %cst_83 {dimension_numbers = #tpu.dot_dimension_numbers<[1], [0], [0], [1], [0, 0, 1, 1], [], []>} : vector<32x16xbf16>, vector<16x32xbf16>, vector<32x32xf32> -> vector<32x32xf32>
    %148 = arith.truncf %147 : vector<32x32xf32> to vector<32x32xbf16>
    %cst_84 = arith.constant dense<0.000000e+00> : vector<32x1024xf32>
    %149 = tpu.matmul %148, %49, %cst_84 {dimension_numbers = #tpu.dot_dimension_numbers<[1], [0], [0], [1], [0, 0, 1, 1], [], []>} : vector<32x32xbf16>, vector<32x1024xbf16>, vector<32x1024xf32> -> vector<32x1024xf32>
    %150 = arith.mulf %149, %26 : vector<32x1024xf32>
    %151 = arith.truncf %150 : vector<32x1024xf32> to vector<32x1024xbf16>
    %cst_85 = arith.constant dense<0.000000e+00> : vector<32x32xf32>
    %152 = tpu.matmul %151, %50, %cst_85 {dimension_numbers = #tpu.dot_dimension_numbers<[1], [0], [0], [1], [0, 0, 1, 1], [], []>} : vector<32x1024xbf16>, vector<1024x32xbf16>, vector<32x32xf32> -> vector<32x32xf32>
    %153 = arith.truncf %152 : vector<32x32xf32> to vector<32x32xbf16>
    %cst_86 = arith.constant dense<0.000000e+00> : vector<16x32xf32>
    %154 = tpu.matmul %40, %153, %cst_86 {dimension_numbers = #tpu.dot_dimension_numbers<[1], [0], [0], [1], [0, 0, 1, 1], [], []>} : vector<16x32xbf16>, vector<32x32xbf16>, vector<16x32xf32> -> vector<16x32xf32>
    %155 = vector.broadcast %48 : vector<16x1xf32> to vector<16x32xf32>
    %156 = arith.mulf %154, %155 : vector<16x32xf32>
    %c0_87 = arith.constant 0 : index
    %c0_88 = arith.constant 0 : index
    %157 = vector.load %arg12[%c0_87, %c0_88] : memref<32x32xf32, #tpu.memory_space<vmem>>, vector<32x32xf32>
    %158 = arith.truncf %145 : vector<16x32xf32> to vector<16x32xbf16>
    %159 = arith.truncf %157 : vector<32x32xf32> to vector<32x32xbf16>
    %cst_89 = arith.constant dense<0.000000e+00> : vector<16x32xf32>
    %160 = tpu.matmul %158, %159, %cst_89 {dimension_numbers = #tpu.dot_dimension_numbers<[1], [0], [0], [1], [0, 0, 1, 1], [], []>} : vector<16x32xbf16>, vector<32x32xbf16>, vector<16x32xf32> -> vector<16x32xf32>
    %161 = arith.addf %156, %160 : vector<16x32xf32>
    %c0_90 = arith.constant 0 : index
    %c0_91 = arith.constant 0 : index
    %162 = vector.load %arg13[%c0_90, %c0_91] : memref<1x32xf32, #tpu.memory_space<vmem>>, vector<1x32xf32>
    %163 = vector.broadcast %162 : vector<1x32xf32> to vector<16x32xf32>
    %164 = arith.addf %161, %163 : vector<16x32xf32>
    %cst_92 = arith.constant 0.000000e+00 : f32
    %165 = vector.broadcast %cst_92 : f32 to vector<16x32xf32>
    %166 = arith.maximumf %164, %165 : vector<16x32xf32>
    %c0_93 = arith.constant 0 : index
    %c0_94 = arith.constant 0 : index
    %c0_95 = arith.constant 0 : index
    %167 = vector.load %arg14[%c0_93, %c0_94, %c0_95] : memref<3x32x32xf32, #tpu.memory_space<vmem>>, vector<1x32x32xf32>
    %168 = vector.shape_cast %167 : vector<1x32x32xf32> to vector<32x32xf32>
    %169 = arith.truncf %166 : vector<16x32xf32> to vector<16x32xbf16>
    %170 = arith.truncf %168 : vector<32x32xf32> to vector<32x32xbf16>
    %cst_96 = arith.constant dense<0.000000e+00> : vector<16x32xf32>
    %171 = tpu.matmul %169, %170, %cst_96 {dimension_numbers = #tpu.dot_dimension_numbers<[1], [0], [0], [1], [0, 0, 1, 1], [], []>} : vector<16x32xbf16>, vector<32x32xbf16>, vector<16x32xf32> -> vector<16x32xf32>
    %c0_97 = arith.constant 0 : index
    %c0_98 = arith.constant 0 : index
    %c0_99 = arith.constant 0 : index
    %172 = vector.load %arg16[%c0_97, %c0_98, %c0_99] : memref<3x1x32xf32, #tpu.memory_space<vmem>>, vector<1x1x32xf32>
    %173 = vector.shape_cast %172 : vector<1x1x32xf32> to vector<1x32xf32>
    %174 = vector.broadcast %173 : vector<1x32xf32> to vector<16x32xf32>
    %175 = arith.addf %171, %174 : vector<16x32xf32>
    %c1_100 = arith.constant 1 : index
    %c0_101 = arith.constant 0 : index
    %c0_102 = arith.constant 0 : index
    %176 = vector.load %arg14[%c1_100, %c0_101, %c0_102] : memref<3x32x32xf32, #tpu.memory_space<vmem>>, vector<1x32x32xf32>
    %177 = vector.shape_cast %176 : vector<1x32x32xf32> to vector<32x32xf32>
    %178 = arith.truncf %166 : vector<16x32xf32> to vector<16x32xbf16>
    %179 = arith.truncf %177 : vector<32x32xf32> to vector<32x32xbf16>
    %cst_103 = arith.constant dense<0.000000e+00> : vector<16x32xf32>
    %180 = tpu.matmul %178, %179, %cst_103 {dimension_numbers = #tpu.dot_dimension_numbers<[1], [0], [0], [1], [0, 0, 1, 1], [], []>} : vector<16x32xbf16>, vector<32x32xbf16>, vector<16x32xf32> -> vector<16x32xf32>
    %c1_104 = arith.constant 1 : index
    %c0_105 = arith.constant 0 : index
    %c0_106 = arith.constant 0 : index
    %181 = vector.load %arg16[%c1_104, %c0_105, %c0_106] : memref<3x1x32xf32, #tpu.memory_space<vmem>>, vector<1x1x32xf32>
    %182 = vector.shape_cast %181 : vector<1x1x32xf32> to vector<1x32xf32>
    %183 = vector.broadcast %182 : vector<1x32xf32> to vector<16x32xf32>
    %184 = arith.addf %180, %183 : vector<16x32xf32>
    %c2_107 = arith.constant 2 : index
    %c0_108 = arith.constant 0 : index
    %c0_109 = arith.constant 0 : index
    %185 = vector.load %arg14[%c2_107, %c0_108, %c0_109] : memref<3x32x32xf32, #tpu.memory_space<vmem>>, vector<1x32x32xf32>
    %186 = vector.shape_cast %185 : vector<1x32x32xf32> to vector<32x32xf32>
    %187 = arith.truncf %166 : vector<16x32xf32> to vector<16x32xbf16>
    %188 = arith.truncf %186 : vector<32x32xf32> to vector<32x32xbf16>
    %cst_110 = arith.constant dense<0.000000e+00> : vector<16x32xf32>
    %189 = tpu.matmul %187, %188, %cst_110 {dimension_numbers = #tpu.dot_dimension_numbers<[1], [0], [0], [1], [0, 0, 1, 1], [], []>} : vector<16x32xbf16>, vector<32x32xbf16>, vector<16x32xf32> -> vector<16x32xf32>
    %c2_111 = arith.constant 2 : index
    %c0_112 = arith.constant 0 : index
    %c0_113 = arith.constant 0 : index
    %190 = vector.load %arg16[%c2_111, %c0_112, %c0_113] : memref<3x1x32xf32, #tpu.memory_space<vmem>>, vector<1x1x32xf32>
    %191 = vector.shape_cast %190 : vector<1x1x32xf32> to vector<1x32xf32>
    %192 = vector.broadcast %191 : vector<1x32xf32> to vector<16x32xf32>
    %193 = arith.addf %189, %192 : vector<16x32xf32>
    %c0_114 = arith.constant 0 : index
    %c0_115 = arith.constant 0 : index
    %c0_116 = arith.constant 0 : index
    %194 = vector.load %arg15[%c0_114, %c0_115, %c0_116] : memref<3x32x32xf32, #tpu.memory_space<vmem>>, vector<1x32x32xf32>
    %195 = vector.shape_cast %194 : vector<1x32x32xf32> to vector<32x32xf32>
    %196 = arith.truncf %145 : vector<16x32xf32> to vector<16x32xbf16>
    %197 = arith.truncf %195 : vector<32x32xf32> to vector<32x32xbf16>
    %cst_117 = arith.constant dense<0.000000e+00> : vector<16x32xf32>
    %198 = tpu.matmul %196, %197, %cst_117 {dimension_numbers = #tpu.dot_dimension_numbers<[1], [0], [0], [1], [0, 0, 1, 1], [], []>} : vector<16x32xbf16>, vector<32x32xbf16>, vector<16x32xf32> -> vector<16x32xf32>
    %c0_118 = arith.constant 0 : index
    %c0_119 = arith.constant 0 : index
    %c0_120 = arith.constant 0 : index
    %199 = vector.load %arg17[%c0_118, %c0_119, %c0_120] : memref<3x1x32xf32, #tpu.memory_space<vmem>>, vector<1x1x32xf32>
    %200 = vector.shape_cast %199 : vector<1x1x32xf32> to vector<1x32xf32>
    %201 = vector.broadcast %200 : vector<1x32xf32> to vector<16x32xf32>
    %202 = arith.addf %198, %201 : vector<16x32xf32>
    %c1_121 = arith.constant 1 : index
    %c0_122 = arith.constant 0 : index
    %c0_123 = arith.constant 0 : index
    %203 = vector.load %arg15[%c1_121, %c0_122, %c0_123] : memref<3x32x32xf32, #tpu.memory_space<vmem>>, vector<1x32x32xf32>
    %204 = vector.shape_cast %203 : vector<1x32x32xf32> to vector<32x32xf32>
    %205 = arith.truncf %145 : vector<16x32xf32> to vector<16x32xbf16>
    %206 = arith.truncf %204 : vector<32x32xf32> to vector<32x32xbf16>
    %cst_124 = arith.constant dense<0.000000e+00> : vector<16x32xf32>
    %207 = tpu.matmul %205, %206, %cst_124 {dimension_numbers = #tpu.dot_dimension_numbers<[1], [0], [0], [1], [0, 0, 1, 1], [], []>} : vector<16x32xbf16>, vector<32x32xbf16>, vector<16x32xf32> -> vector<16x32xf32>
    %c1_125 = arith.constant 1 : index
    %c0_126 = arith.constant 0 : index
    %c0_127 = arith.constant 0 : index
    %208 = vector.load %arg17[%c1_125, %c0_126, %c0_127] : memref<3x1x32xf32, #tpu.memory_space<vmem>>, vector<1x1x32xf32>
    %209 = vector.shape_cast %208 : vector<1x1x32xf32> to vector<1x32xf32>
    %210 = vector.broadcast %209 : vector<1x32xf32> to vector<16x32xf32>
    %211 = arith.addf %207, %210 : vector<16x32xf32>
    %c2_128 = arith.constant 2 : index
    %c0_129 = arith.constant 0 : index
    %c0_130 = arith.constant 0 : index
    %212 = vector.load %arg15[%c2_128, %c0_129, %c0_130] : memref<3x32x32xf32, #tpu.memory_space<vmem>>, vector<1x32x32xf32>
    %213 = vector.shape_cast %212 : vector<1x32x32xf32> to vector<32x32xf32>
    %214 = arith.truncf %145 : vector<16x32xf32> to vector<16x32xbf16>
    %215 = arith.truncf %213 : vector<32x32xf32> to vector<32x32xbf16>
    %cst_131 = arith.constant dense<0.000000e+00> : vector<16x32xf32>
    %216 = tpu.matmul %214, %215, %cst_131 {dimension_numbers = #tpu.dot_dimension_numbers<[1], [0], [0], [1], [0, 0, 1, 1], [], []>} : vector<16x32xbf16>, vector<32x32xbf16>, vector<16x32xf32> -> vector<16x32xf32>
    %c2_132 = arith.constant 2 : index
    %c0_133 = arith.constant 0 : index
    %c0_134 = arith.constant 0 : index
    %217 = vector.load %arg17[%c2_132, %c0_133, %c0_134] : memref<3x1x32xf32, #tpu.memory_space<vmem>>, vector<1x1x32xf32>
    %218 = vector.shape_cast %217 : vector<1x1x32xf32> to vector<1x32xf32>
    %219 = vector.broadcast %218 : vector<1x32xf32> to vector<16x32xf32>
    %220 = arith.addf %216, %219 : vector<16x32xf32>
    %221 = arith.addf %175, %202 : vector<16x32xf32>
    %222 = arith.negf %221 : vector<16x32xf32>
    %223 = math.exp %222 : vector<16x32xf32>
    %cst_135 = arith.constant 1.000000e+00 : f32
    %224 = vector.broadcast %cst_135 : f32 to vector<16x32xf32>
    %225 = arith.addf %224, %223 : vector<16x32xf32>
    %226 = arith.divf %224, %225 : vector<16x32xf32>
    %227 = arith.addf %184, %211 : vector<16x32xf32>
    %228 = arith.negf %227 : vector<16x32xf32>
    %229 = math.exp %228 : vector<16x32xf32>
    %cst_136 = arith.constant 1.000000e+00 : f32
    %230 = vector.broadcast %cst_136 : f32 to vector<16x32xf32>
    %231 = arith.addf %230, %229 : vector<16x32xf32>
    %232 = arith.divf %230, %231 : vector<16x32xf32>
    %233 = arith.mulf %226, %220 : vector<16x32xf32>
    %234 = arith.addf %193, %233 : vector<16x32xf32>
    %235 = math.tanh %234 : vector<16x32xf32>
    %cst_137 = arith.constant 1.000000e+00 : f32
    %236 = vector.broadcast %cst_137 : f32 to vector<16x32xf32>
    %237 = arith.subf %236, %232 : vector<16x32xf32>
    %238 = arith.mulf %237, %235 : vector<16x32xf32>
    %239 = arith.mulf %232, %145 : vector<16x32xf32>
    %240 = arith.addf %238, %239 : vector<16x32xf32>
    %241 = arith.truncf %240 : vector<16x32xf32> to vector<16x32xbf16>
    %cst_138 = arith.constant dense<0.000000e+00> : vector<32x32xf32>
    %242 = tpu.matmul %33, %241, %cst_138 {dimension_numbers = #tpu.dot_dimension_numbers<[1], [0], [0], [1], [0, 0, 1, 1], [], []>} : vector<32x16xbf16>, vector<16x32xbf16>, vector<32x32xf32> -> vector<32x32xf32>
    %243 = arith.truncf %242 : vector<32x32xf32> to vector<32x32xbf16>
    %cst_139 = arith.constant dense<0.000000e+00> : vector<32x1024xf32>
    %244 = tpu.matmul %243, %49, %cst_139 {dimension_numbers = #tpu.dot_dimension_numbers<[1], [0], [0], [1], [0, 0, 1, 1], [], []>} : vector<32x32xbf16>, vector<32x1024xbf16>, vector<32x1024xf32> -> vector<32x1024xf32>
    %245 = arith.mulf %244, %26 : vector<32x1024xf32>
    %246 = arith.truncf %245 : vector<32x1024xf32> to vector<32x1024xbf16>
    %cst_140 = arith.constant dense<0.000000e+00> : vector<32x32xf32>
    %247 = tpu.matmul %246, %50, %cst_140 {dimension_numbers = #tpu.dot_dimension_numbers<[1], [0], [0], [1], [0, 0, 1, 1], [], []>} : vector<32x1024xbf16>, vector<1024x32xbf16>, vector<32x32xf32> -> vector<32x32xf32>
    %248 = arith.truncf %247 : vector<32x32xf32> to vector<32x32xbf16>
    %cst_141 = arith.constant dense<0.000000e+00> : vector<16x32xf32>
    %249 = tpu.matmul %40, %248, %cst_141 {dimension_numbers = #tpu.dot_dimension_numbers<[1], [0], [0], [1], [0, 0, 1, 1], [], []>} : vector<16x32xbf16>, vector<32x32xbf16>, vector<16x32xf32> -> vector<16x32xf32>
    %250 = vector.broadcast %48 : vector<16x1xf32> to vector<16x32xf32>
    %251 = arith.mulf %249, %250 : vector<16x32xf32>
    %c0_142 = arith.constant 0 : index
    %c0_143 = arith.constant 0 : index
    %252 = vector.load %arg12[%c0_142, %c0_143] : memref<32x32xf32, #tpu.memory_space<vmem>>, vector<32x32xf32>
    %253 = arith.truncf %240 : vector<16x32xf32> to vector<16x32xbf16>
    %254 = arith.truncf %252 : vector<32x32xf32> to vector<32x32xbf16>
    %cst_144 = arith.constant dense<0.000000e+00> : vector<16x32xf32>
    %255 = tpu.matmul %253, %254, %cst_144 {dimension_numbers = #tpu.dot_dimension_numbers<[1], [0], [0], [1], [0, 0, 1, 1], [], []>} : vector<16x32xbf16>, vector<32x32xbf16>, vector<16x32xf32> -> vector<16x32xf32>
    %256 = arith.addf %251, %255 : vector<16x32xf32>
    %c0_145 = arith.constant 0 : index
    %c0_146 = arith.constant 0 : index
    %257 = vector.load %arg13[%c0_145, %c0_146] : memref<1x32xf32, #tpu.memory_space<vmem>>, vector<1x32xf32>
    %258 = vector.broadcast %257 : vector<1x32xf32> to vector<16x32xf32>
    %259 = arith.addf %256, %258 : vector<16x32xf32>
    %cst_147 = arith.constant 0.000000e+00 : f32
    %260 = vector.broadcast %cst_147 : f32 to vector<16x32xf32>
    %261 = arith.maximumf %259, %260 : vector<16x32xf32>
    %c0_148 = arith.constant 0 : index
    %c0_149 = arith.constant 0 : index
    %c0_150 = arith.constant 0 : index
    %262 = vector.load %arg14[%c0_148, %c0_149, %c0_150] : memref<3x32x32xf32, #tpu.memory_space<vmem>>, vector<1x32x32xf32>
    %263 = vector.shape_cast %262 : vector<1x32x32xf32> to vector<32x32xf32>
    %264 = arith.truncf %261 : vector<16x32xf32> to vector<16x32xbf16>
    %265 = arith.truncf %263 : vector<32x32xf32> to vector<32x32xbf16>
    %cst_151 = arith.constant dense<0.000000e+00> : vector<16x32xf32>
    %266 = tpu.matmul %264, %265, %cst_151 {dimension_numbers = #tpu.dot_dimension_numbers<[1], [0], [0], [1], [0, 0, 1, 1], [], []>} : vector<16x32xbf16>, vector<32x32xbf16>, vector<16x32xf32> -> vector<16x32xf32>
    %c0_152 = arith.constant 0 : index
    %c0_153 = arith.constant 0 : index
    %c0_154 = arith.constant 0 : index
    %267 = vector.load %arg16[%c0_152, %c0_153, %c0_154] : memref<3x1x32xf32, #tpu.memory_space<vmem>>, vector<1x1x32xf32>
    %268 = vector.shape_cast %267 : vector<1x1x32xf32> to vector<1x32xf32>
    %269 = vector.broadcast %268 : vector<1x32xf32> to vector<16x32xf32>
    %270 = arith.addf %266, %269 : vector<16x32xf32>
    %c1_155 = arith.constant 1 : index
    %c0_156 = arith.constant 0 : index
    %c0_157 = arith.constant 0 : index
    %271 = vector.load %arg14[%c1_155, %c0_156, %c0_157] : memref<3x32x32xf32, #tpu.memory_space<vmem>>, vector<1x32x32xf32>
    %272 = vector.shape_cast %271 : vector<1x32x32xf32> to vector<32x32xf32>
    %273 = arith.truncf %261 : vector<16x32xf32> to vector<16x32xbf16>
    %274 = arith.truncf %272 : vector<32x32xf32> to vector<32x32xbf16>
    %cst_158 = arith.constant dense<0.000000e+00> : vector<16x32xf32>
    %275 = tpu.matmul %273, %274, %cst_158 {dimension_numbers = #tpu.dot_dimension_numbers<[1], [0], [0], [1], [0, 0, 1, 1], [], []>} : vector<16x32xbf16>, vector<32x32xbf16>, vector<16x32xf32> -> vector<16x32xf32>
    %c1_159 = arith.constant 1 : index
    %c0_160 = arith.constant 0 : index
    %c0_161 = arith.constant 0 : index
    %276 = vector.load %arg16[%c1_159, %c0_160, %c0_161] : memref<3x1x32xf32, #tpu.memory_space<vmem>>, vector<1x1x32xf32>
    %277 = vector.shape_cast %276 : vector<1x1x32xf32> to vector<1x32xf32>
    %278 = vector.broadcast %277 : vector<1x32xf32> to vector<16x32xf32>
    %279 = arith.addf %275, %278 : vector<16x32xf32>
    %c2_162 = arith.constant 2 : index
    %c0_163 = arith.constant 0 : index
    %c0_164 = arith.constant 0 : index
    %280 = vector.load %arg14[%c2_162, %c0_163, %c0_164] : memref<3x32x32xf32, #tpu.memory_space<vmem>>, vector<1x32x32xf32>
    %281 = vector.shape_cast %280 : vector<1x32x32xf32> to vector<32x32xf32>
    %282 = arith.truncf %261 : vector<16x32xf32> to vector<16x32xbf16>
    %283 = arith.truncf %281 : vector<32x32xf32> to vector<32x32xbf16>
    %cst_165 = arith.constant dense<0.000000e+00> : vector<16x32xf32>
    %284 = tpu.matmul %282, %283, %cst_165 {dimension_numbers = #tpu.dot_dimension_numbers<[1], [0], [0], [1], [0, 0, 1, 1], [], []>} : vector<16x32xbf16>, vector<32x32xbf16>, vector<16x32xf32> -> vector<16x32xf32>
    %c2_166 = arith.constant 2 : index
    %c0_167 = arith.constant 0 : index
    %c0_168 = arith.constant 0 : index
    %285 = vector.load %arg16[%c2_166, %c0_167, %c0_168] : memref<3x1x32xf32, #tpu.memory_space<vmem>>, vector<1x1x32xf32>
    %286 = vector.shape_cast %285 : vector<1x1x32xf32> to vector<1x32xf32>
    %287 = vector.broadcast %286 : vector<1x32xf32> to vector<16x32xf32>
    %288 = arith.addf %284, %287 : vector<16x32xf32>
    %c0_169 = arith.constant 0 : index
    %c0_170 = arith.constant 0 : index
    %c0_171 = arith.constant 0 : index
    %289 = vector.load %arg15[%c0_169, %c0_170, %c0_171] : memref<3x32x32xf32, #tpu.memory_space<vmem>>, vector<1x32x32xf32>
    %290 = vector.shape_cast %289 : vector<1x32x32xf32> to vector<32x32xf32>
    %291 = arith.truncf %240 : vector<16x32xf32> to vector<16x32xbf16>
    %292 = arith.truncf %290 : vector<32x32xf32> to vector<32x32xbf16>
    %cst_172 = arith.constant dense<0.000000e+00> : vector<16x32xf32>
    %293 = tpu.matmul %291, %292, %cst_172 {dimension_numbers = #tpu.dot_dimension_numbers<[1], [0], [0], [1], [0, 0, 1, 1], [], []>} : vector<16x32xbf16>, vector<32x32xbf16>, vector<16x32xf32> -> vector<16x32xf32>
    %c0_173 = arith.constant 0 : index
    %c0_174 = arith.constant 0 : index
    %c0_175 = arith.constant 0 : index
    %294 = vector.load %arg17[%c0_173, %c0_174, %c0_175] : memref<3x1x32xf32, #tpu.memory_space<vmem>>, vector<1x1x32xf32>
    %295 = vector.shape_cast %294 : vector<1x1x32xf32> to vector<1x32xf32>
    %296 = vector.broadcast %295 : vector<1x32xf32> to vector<16x32xf32>
    %297 = arith.addf %293, %296 : vector<16x32xf32>
    %c1_176 = arith.constant 1 : index
    %c0_177 = arith.constant 0 : index
    %c0_178 = arith.constant 0 : index
    %298 = vector.load %arg15[%c1_176, %c0_177, %c0_178] : memref<3x32x32xf32, #tpu.memory_space<vmem>>, vector<1x32x32xf32>
    %299 = vector.shape_cast %298 : vector<1x32x32xf32> to vector<32x32xf32>
    %300 = arith.truncf %240 : vector<16x32xf32> to vector<16x32xbf16>
    %301 = arith.truncf %299 : vector<32x32xf32> to vector<32x32xbf16>
    %cst_179 = arith.constant dense<0.000000e+00> : vector<16x32xf32>
    %302 = tpu.matmul %300, %301, %cst_179 {dimension_numbers = #tpu.dot_dimension_numbers<[1], [0], [0], [1], [0, 0, 1, 1], [], []>} : vector<16x32xbf16>, vector<32x32xbf16>, vector<16x32xf32> -> vector<16x32xf32>
    %c1_180 = arith.constant 1 : index
    %c0_181 = arith.constant 0 : index
    %c0_182 = arith.constant 0 : index
    %303 = vector.load %arg17[%c1_180, %c0_181, %c0_182] : memref<3x1x32xf32, #tpu.memory_space<vmem>>, vector<1x1x32xf32>
    %304 = vector.shape_cast %303 : vector<1x1x32xf32> to vector<1x32xf32>
    %305 = vector.broadcast %304 : vector<1x32xf32> to vector<16x32xf32>
    %306 = arith.addf %302, %305 : vector<16x32xf32>
    %c2_183 = arith.constant 2 : index
    %c0_184 = arith.constant 0 : index
    %c0_185 = arith.constant 0 : index
    %307 = vector.load %arg15[%c2_183, %c0_184, %c0_185] : memref<3x32x32xf32, #tpu.memory_space<vmem>>, vector<1x32x32xf32>
    %308 = vector.shape_cast %307 : vector<1x32x32xf32> to vector<32x32xf32>
    %309 = arith.truncf %240 : vector<16x32xf32> to vector<16x32xbf16>
    %310 = arith.truncf %308 : vector<32x32xf32> to vector<32x32xbf16>
    %cst_186 = arith.constant dense<0.000000e+00> : vector<16x32xf32>
    %311 = tpu.matmul %309, %310, %cst_186 {dimension_numbers = #tpu.dot_dimension_numbers<[1], [0], [0], [1], [0, 0, 1, 1], [], []>} : vector<16x32xbf16>, vector<32x32xbf16>, vector<16x32xf32> -> vector<16x32xf32>
    %c2_187 = arith.constant 2 : index
    %c0_188 = arith.constant 0 : index
    %c0_189 = arith.constant 0 : index
    %312 = vector.load %arg17[%c2_187, %c0_188, %c0_189] : memref<3x1x32xf32, #tpu.memory_space<vmem>>, vector<1x1x32xf32>
    %313 = vector.shape_cast %312 : vector<1x1x32xf32> to vector<1x32xf32>
    %314 = vector.broadcast %313 : vector<1x32xf32> to vector<16x32xf32>
    %315 = arith.addf %311, %314 : vector<16x32xf32>
    %316 = arith.addf %270, %297 : vector<16x32xf32>
    %317 = arith.negf %316 : vector<16x32xf32>
    %318 = math.exp %317 : vector<16x32xf32>
    %cst_190 = arith.constant 1.000000e+00 : f32
    %319 = vector.broadcast %cst_190 : f32 to vector<16x32xf32>
    %320 = arith.addf %319, %318 : vector<16x32xf32>
    %321 = arith.divf %319, %320 : vector<16x32xf32>
    %322 = arith.addf %279, %306 : vector<16x32xf32>
    %323 = arith.negf %322 : vector<16x32xf32>
    %324 = math.exp %323 : vector<16x32xf32>
    %cst_191 = arith.constant 1.000000e+00 : f32
    %325 = vector.broadcast %cst_191 : f32 to vector<16x32xf32>
    %326 = arith.addf %325, %324 : vector<16x32xf32>
    %327 = arith.divf %325, %326 : vector<16x32xf32>
    %328 = arith.mulf %321, %315 : vector<16x32xf32>
    %329 = arith.addf %288, %328 : vector<16x32xf32>
    %330 = math.tanh %329 : vector<16x32xf32>
    %cst_192 = arith.constant 1.000000e+00 : f32
    %331 = vector.broadcast %cst_192 : f32 to vector<16x32xf32>
    %332 = arith.subf %331, %327 : vector<16x32xf32>
    %333 = arith.mulf %332, %330 : vector<16x32xf32>
    %334 = arith.mulf %327, %240 : vector<16x32xf32>
    %335 = arith.addf %333, %334 : vector<16x32xf32>
    %c0_193 = arith.constant 0 : index
    %c0_194 = arith.constant 0 : index
    %336 = vector.load %arg18[%c0_193, %c0_194] : memref<16x32xf32, #tpu.memory_space<vmem>>, vector<16x32xf32>
    tpu.vector_store %arg18[%c0_193, %c0_194], %335 {strides = array<i32>} : memref<16x32xf32, #tpu.memory_space<vmem>>, vector<16x32xf32>,
    return
  }
}

</mosaic_0001>

<bundles_post_ra>
// kernel: tpu_custom_call.1
= control target key start
LH: loop header
LB: loop body
LE: loop exit
PB: predicated region body
PF: predicated region fallthrough
CT: control target
= control target key end

     0   :  { %s7023_s0 = inlined_call_operand.vmem [shape: f32[16,8], index: 0, kind: input, shape index: {}]   ;;  %s7024_s1 = inlined_call_operand.vmem [shape: f32[32,5], index: 1, kind: input, shape index: {}]   ;;  %s7025_s2 = inlined_call_operand.vmem [shape: s32[32,1], index: 2, kind: input, shape index: {}]   ;;  %s7026_s3 = inlined_call_operand.vmem [shape: s32[1,32], index: 3, kind: input, shape index: {}]   ;;  %s7027_s4 = inlined_call_operand.vmem [shape: bf16[32,1024], index: 4, kind: input, shape index: {}]   ;;  %s7028_s5 = inlined_call_operand.vmem [shape: bf16[1024,32], index: 5, kind: input, shape index: {}]   ;;  %s7029_s6 = inlined_call_operand.vmem [shape: f32[8,32], index: 6, kind: input, shape index: {}]   ;;  %s7030_s7 = inlined_call_operand.vmem [shape: f32[1,32], index: 7, kind: input, shape index: {}]   ;;  %s7031_s8 = inlined_call_operand.vmem [shape: f32[5,128], index: 8, kind: input, shape index: {}]   ;;  %s7032_s9 = inlined_call_operand.vmem [shape: f32[1,128], index: 9, kind: input, shape index: {}]   ;;  %s7033_s10 = inlined_call_operand.hbm [shape: f32[128,1024], index: 10, kind: input, shape index: {}]   ;;  %s7034_s11 = inlined_call_operand.vmem [shape: f32[1,1024], index: 11, kind: input, shape index: {}]   ;;  %s7035_s12 = inlined_call_operand.vmem [shape: f32[32,32], index: 12, kind: input, shape index: {}]   ;;  %s7036_s13 = inlined_call_operand.vmem [shape: f32[1,32], index: 13, kind: input, shape index: {}]   ;;  %s7037_s14 = inlined_call_operand.vmem [shape: f32[3,32,32], index: 14, kind: input, shape index: {}]   ;;  %s7038_s15 = inlined_call_operand.vmem [shape: f32[3,32,32], index: 15, kind: input, shape index: {}]   ;;  %s7039_s16 = inlined_call_operand.vmem [shape: f32[3,1,32], index: 16, kind: input, shape index: {}]   ;;  %s7040_s17 = inlined_call_operand.vmem [shape: f32[3,1,32], index: 17, kind: input, shape index: {}]   ;;  %s7041_s18 = inlined_call_operand.hbm [shape: f32[16,32], index: 18, kind: output, shape index: {}]  }
   0x1   :  { %7219 = sst [smem:[#allocation131_spill]] %s7023_s0 }
   0x2   :  { %7220 = sst [smem:[#allocation132_spill]] %s7024_s1 }
   0x3   :  { %7221 = sst [smem:[#allocation133_spill]] %s7025_s2 }
   0x4   :  { %23 = vsyncpa [#allocation3], 0 }
   0x5   :  { %24 = vsyncpa [#allocation4], 0  ;;  %s5251_s27 = smov [#allocation2]  }
   0x6   :  { %s50_s28 = sshll.u32 %s5251_s27, 4  ;;  %s51_s28 = int_to_ptr.vmem [resolvable:$true] %s50_s28 }
   0x7   :  { %s5215_s29 = scalar_lea.vmem %s51_s28, 16384  ;;  %p5220_p1 = scmp.lt.s32.totalorder %s51_s28, %s51_s28 }
   0x8   :  { %p5216_p0 = scmp.ne.s32.totalorder %s51_s28, %s5215_s29  ;;  %p5221_p2 = scmp.lt.s32.totalorder %s5215_s29, %s5215_s29 }
   0xa   :  { %p5222_p3 = por %p5221_p2, %p5220_p1 }
   0xc   :  { %p5223_p4 = pnand %p5222_p3, %p5216_p0 }
   0xe   :  { %5226 = shalt.err (!%p5223_p4)
}
   0xf   :  { %s5252_s30 = smov 1024   ;;  %s5253_s0 = smov 64  }
  0x10   :  { %56 = dma.hbm_to_vmem [thread:$0]  %s7033_s10, 16384, %s51_s28, [#allocation3], %s5252_s30, %s5252_s30, %s5253_s0  }
  0x11   :  { %5247 = dma.done.wait [#allocation3], 16384  }
  0x12   :  { %5248 = vsyncadd [#allocation3], 4294950912  ;;  %vm160_vm0 = vcmask 1041408   ;;  %v7049_v0 = vmov 0.0   ;;  %vm5255_vm1 = vmmov 0   ;;  %v7047_v1 = vmov 0  }
  0x13   :  { %4774 = vmatprep.subr.bf16.mxu0 %v7049_v0  ;;  %4776 = vmatprep.mubr.msk.bf16.mxu0 %vm5255_vm1, %v7049_v0  ;;  %vm161_vm2 = vcmask 1042432   ;;  %v5257_v2 = vmov 65535   ;;  %v142_v4 = vld [vmem:[%s7031_s8] sm:$0x1f]  ;;  %s7222_s2 = sld [smem:[#allocation132_spill]]  ;;  %vm153_vm3 = vcmask 39936  }
  0x14   :  { %5006 = vset.pattern.permute.xlu0 %v7047_v1  ;;  %5007 = vset.pattern.permute.xlu1 %v7047_v1  ;;  %v162_v3 = vsel %vm160_vm0, 4294967295, %v5257_v2  ;;  %v145_v8 = vpack.c.bf16 %v142_v4, %v142_v4  ;;  %v77_v12 = vld [vmem:[%s7029_s6] sm:$0xff]  ;;  %vm91_vm4 = vcmask 1043456   ;;  %s7223_s19 = sld [smem:[#allocation131_spill]]  ;;  %v333_v23 = vld [vmem:[#allocation2 + $0x388] sm:$0xff]  ;;  %v335_v25 = vld [vmem:[#allocation2 + $0x398] sm:$0xff] }
  0x15   :  { %v163_v5 = vsel %vm161_vm2, %v162_v3, 0  ;;  %v79_v13 = vpack.c.bf16 %v77_v12, %v77_v12  ;;  %s7224_s22 = sld [smem:[#allocation133_spill]]  ;;  %v341_v24 = vld [vmem:[#allocation2 + $0x3c8] sm:$0xff]  ;;  %vm87_vm5 = vcmask 64512   ;;  %v343_v28 = vld [vmem:[#allocation2 + $0x3d8] sm:$0xff]  ;;  %v332_v29 = vld [vmem:[#allocation2 + $0x380] sm:$0xff] }
  0x16   :  { %v165_v17 = vand.u32 %v163_v5, %v145_v8  ;;  %v407_v27 = vpack.c.bf16 %v341_v24, %v333_v23  ;;  %v340_v30 = vld [vmem:[#allocation2 + $0x3c0] sm:$0xff]  ;;  %v409_v31 = vpack.c.bf16 %v343_v28, %v335_v25  ;;  %v334_v33 = vld [vmem:[#allocation2 + $0x390] sm:$0xff]  ;;  %v317_v35 = vld [vmem:[#allocation2 + $0x308] sm:$0xff]  ;;  %vm873_vm8 = vcmask 130048  }
  0x17   :  { %v93_v21 = vsel %vm91_vm4, %v79_v13, 0  ;;  %v406_v32 = vpack.c.bf16 %v340_v30, %v332_v29  ;;  %v342_v34 = vld [vmem:[#allocation2 + $0x3d0] sm:$0xff]  ;;  %v325_v37 = vld [vmem:[#allocation2 + $0x348] sm:$0xff]  ;;  %v319_v38 = vld [vmem:[#allocation2 + $0x318] sm:$0xff]  ;;  %vm715_vm11 = vcmask 261120  }
  0x18   :  { %4780 = vmatprep.subr.bf16.mxu1 %v165_v17  ;;  %4775 = vmatpush3.bf16.msra.mxu0 %v93_v21  ;;  %v408_v36 = vpack.c.bf16 %v342_v34, %v334_v33  ;;  %v327_v39 = vld [vmem:[#allocation2 + $0x358] sm:$0xff]  ;;  %v399_v40 = vpack.c.bf16 %v325_v37, %v317_v35  ;;  %v316_v42 = vld [vmem:[#allocation2 + $0x300] sm:$0xff]  ;;  %v318_v44 = vld [vmem:[#allocation2 + $0x310] sm:$0xff] }
  0x19   :  { %v138_v6 = vld [vmem:[%s7222_s2] sm:$0xff]  ;;  %v139_v7 = vld [vmem:[%s7222_s2 + $0x8] sm:$0xff]  ;;  %v140_v10 = vld [vmem:[%s7222_s2 + $0x10] sm:$0xff]  ;;  %4781 = vmatpush3.bf16.msra.mxu1 %v165_v17  ;;  %456 = vmatprep.subr.bf16.mxu0 %v407_v27  ;;  %v401_v41 = vpack.c.bf16 %v327_v39, %v319_v38 }
  0x1a   :  { %v143_v9 = vpack.c.bf16 %v139_v7, %v138_v6  ;;  %v141_v11 = vld [vmem:[%s7222_s2 + $0x18] sm:$0xff]  ;;  %v75_v14 = vld [vmem:[%s7223_s19] sm:$0xff]  ;;  %v76_v15 = vld [vmem:[%s7223_s19 + $0x8] sm:$0xff]  ;;  %509 = vmatprep.subr.bf16.mxu1 %v409_v31 }
  0x1b   :  { %v670_v16 = vld [vmem:[%s7224_s22] sm:$0xff]  ;;  %v672_v18 = vld [vmem:[%s7224_s22 + $0x10] sm:$0xff]  ;;  %v671_v19 = vld [vmem:[%s7224_s22 + $0x8] sm:$0xff]  ;;  %v78_v22 = vpack.c.bf16 %v76_v15, %v75_v14  ;;  %v144_v26 = vpack.c.bf16 %v141_v11, %v140_v10 }
  0x1c   :  { %4782 = vmatprep.mubr.msk.bf16.mxu1 %vm153_vm3, %v143_v9  ;;  %675 = vperm.xlu0 %5006, %v670_v16   ;;  %v673_v20 = vld [vmem:[%s7224_s22 + $0x18] sm:$0xff]  ;;  %v324_v43 = vld [vmem:[#allocation2 + $0x340] sm:$0xff]  ;;  %v326_v45 = vld [vmem:[#allocation2 + $0x350] sm:$0xff] }
  0x1d   :  { %681 = vperm.xlu1 %5007, %v672_v18   ;;  %4777 = vmatmul.mubr.msk.bf16.vlgmr.msra.gmra.mxu0 %vm87_vm5, %v78_v22  ;;  %v301_v46 = vld [vmem:[#allocation2 + $0x288] sm:$0xff]  ;;  %v398_v48 = vpack.c.bf16 %v324_v43, %v316_v42  ;;  %v400_v49 = vpack.c.bf16 %v326_v45, %v318_v44  ;;  %v303_v50 = vld [vmem:[#allocation2 + $0x298] sm:$0xff]  ;;  %v300_v52 = vld [vmem:[#allocation2 + $0x280] sm:$0xff] }
  0x1e   :  { %4783 = vmatmul.mubr.msk.bf16.vlgmr.msra.gmra.mxu1 %vm153_vm3, %v144_v26  ;;  %v309_v47 = vld [vmem:[#allocation2 + $0x2c8] sm:$0xff]  ;;  %457 = vmatpush1.bf16.msra.mxu0 %v406_v32  ;;  %v311_v51 = vld [vmem:[#allocation2 + $0x2d8] sm:$0xff]  ;;  %v308_v55 = vld [vmem:[#allocation2 + $0x2c0] sm:$0xff] }
  0x1f   :  { %510 = vmatpush1.bf16.msra.mxu1 %v408_v36  ;;  %458 = vmatprep.subr.bf16.mxu0 %v399_v40  ;;  %v391_v53 = vpack.c.bf16 %v309_v47, %v301_v46  ;;  %v393_v54 = vpack.c.bf16 %v311_v51, %v303_v50  ;;  %v302_v56 = vld [vmem:[#allocation2 + $0x290] sm:$0xff]  ;;  %v285_v58 = vld [vmem:[#allocation2 + $0x208] sm:$0xff]  ;;  %v287_v60 = vld [vmem:[#allocation2 + $0x218] sm:$0xff]  ;;  %v390_v62 = vpack.c.bf16 %v308_v55, %v300_v52 }
  0x20   :  { %678 = vperm.xlu0 %5006, %v671_v19   ;;  %511 = vmatprep.subr.bf16.mxu1 %v401_v41  ;;  %v310_v57 = vld [vmem:[#allocation2 + $0x2d0] sm:$0xff]  ;;  %v293_v59 = vld [vmem:[#allocation2 + $0x248] sm:$0xff]  ;;  %v295_v61 = vld [vmem:[#allocation2 + $0x258] sm:$0xff] }
  0x21   :  { %684 = vperm.xlu1 %5007, %v673_v20   ;;  %488 = vmatprep.mubr.bf16.mxu0 %v7047_v1  ;;  %v392_v63 = vpack.c.bf16 %v310_v57, %v302_v56  ;;  %v284_v2 = vld [vmem:[#allocation2 + $0x200] sm:$0xff]  ;;  %v383_v4 = vpack.c.bf16 %v293_v59, %v285_v58  ;;  %v385_v5 = vpack.c.bf16 %v295_v61, %v287_v60  ;;  %v286_v6 = vld [vmem:[#allocation2 + $0x210] sm:$0xff]  ;;  %v269_v8 = vld [vmem:[#allocation2 + $0x188] sm:$0xff] }
  0x22   :  { %541 = vmatprep.mubr.bf16.mxu1 %v7047_v1  ;;  %459 = vmatpush1.bf16.msra.mxu0 %v398_v48  ;;  %v292_v3 = vld [vmem:[#allocation2 + $0x240] sm:$0xff]  ;;  %v294_v7 = vld [vmem:[#allocation2 + $0x250] sm:$0xff]  ;;  %v277_v9 = vld [vmem:[#allocation2 + $0x1c8] sm:$0xff] }
  0x23   :  { %512 = vmatpush1.bf16.msra.mxu1 %v400_v49  ;;  %460 = vmatprep.subr.bf16.mxu0 %v391_v53  ;;  %v271_v10 = vld [vmem:[#allocation2 + $0x198] sm:$0xff]  ;;  %v268_v12 = vld [vmem:[#allocation2 + $0x180] sm:$0xff]  ;;  %v270_v14 = vld [vmem:[#allocation2 + $0x190] sm:$0xff]  ;;  %v382_v16 = vpack.c.bf16 %v292_v3, %v284_v2  ;;  %v384_v17 = vpack.c.bf16 %v294_v7, %v286_v6  ;;  %v375_v18 = vpack.c.bf16 %v277_v9, %v269_v8 }
  0x24   :  { %513 = vmatprep.subr.bf16.mxu1 %v393_v54  ;;  %v279_v11 = vld [vmem:[#allocation2 + $0x1d8] sm:$0xff]  ;;  %v276_v13 = vld [vmem:[#allocation2 + $0x1c0] sm:$0xff]  ;;  %v278_v15 = vld [vmem:[#allocation2 + $0x1d0] sm:$0xff] }
  0x25   :  { %v377_v19 = vpack.c.bf16 %v279_v11, %v271_v10  ;;  %v374_v20 = vpack.c.bf16 %v276_v13, %v268_v12  ;;  %v376_v21 = vpack.c.bf16 %v278_v15, %v270_v14  ;;  %v253_v22 = vld [vmem:[#allocation2 + $0x108] sm:$0xff]  ;;  %v255_v24 = vld [vmem:[#allocation2 + $0x118] sm:$0xff]  ;;  %v252_v27 = vld [vmem:[#allocation2 + $0x100] sm:$0xff] }
  0x26   :  { %461 = vmatpush1.bf16.msra.mxu0 %v390_v62  ;;  %v261_v23 = vld [vmem:[#allocation2 + $0x148] sm:$0xff]  ;;  %v263_v26 = vld [vmem:[#allocation2 + $0x158] sm:$0xff]  ;;  %v260_v28 = vld [vmem:[#allocation2 + $0x140] sm:$0xff] }
  0x27   :  { %514 = vmatpush1.bf16.msra.mxu1 %v392_v63  ;;  %462 = vmatprep.subr.bf16.mxu0 %v383_v4  ;;  %v367_v25 = vpack.c.bf16 %v261_v23, %v253_v22  ;;  %v369_v29 = vpack.c.bf16 %v263_v26, %v255_v24  ;;  %v366_v30 = vpack.c.bf16 %v260_v28, %v252_v27  ;;  %v254_v31 = vld [vmem:[#allocation2 + $0x110] sm:$0xff]  ;;  %v237_v34 = vld [vmem:[#allocation2 + $0x88] sm:$0xff]  ;;  %v239_v36 = vld [vmem:[#allocation2 + $0x98] sm:$0xff] }
  0x28   :  { %515 = vmatprep.subr.bf16.mxu1 %v385_v5  ;;  %v262_v32 = vld [vmem:[#allocation2 + $0x150] sm:$0xff]  ;;  %v245_v35 = vld [vmem:[#allocation2 + $0xc8] sm:$0xff]  ;;  %v247_v38 = vld [vmem:[#allocation2 + $0xd8] sm:$0xff] }
  0x29   :  { %v368_v33 = vpack.c.bf16 %v262_v32, %v254_v31  ;;  %v359_v37 = vpack.c.bf16 %v245_v35, %v237_v34  ;;  %v236_v39 = vld [vmem:[#allocation2 + $0x80] sm:$0xff]  ;;  %v361_v41 = vpack.c.bf16 %v247_v38, %v239_v36  ;;  %v238_v43 = vld [vmem:[#allocation2 + $0x90] sm:$0xff]  ;;  %v221_v46 = vld [vmem:[#allocation2 + $0x8] sm:$0xff] }
  0x2a   :  { %463 = vmatpush1.bf16.msra.mxu0 %v382_v16  ;;  %v244_v40 = vld [vmem:[#allocation2 + $0xc0] sm:$0xff]  ;;  %v246_v44 = vld [vmem:[#allocation2 + $0xd0] sm:$0xff]  ;;  %v229_v47 = vld [vmem:[#allocation2 + $0x48] sm:$0xff] }
  0x2b   :  { %516 = vmatpush1.bf16.msra.mxu1 %v384_v17  ;;  %464 = vmatprep.subr.bf16.mxu0 %v375_v18  ;;  %v358_v42 = vpack.c.bf16 %v244_v40, %v236_v39  ;;  %v360_v45 = vpack.c.bf16 %v246_v44, %v238_v43  ;;  %v223_v48 = vld [vmem:[#allocation2 + $0x18] sm:$0xff]  ;;  %v351_v49 = vpack.c.bf16 %v229_v47, %v221_v46  ;;  %v220_v51 = vld [vmem:[#allocation2] sm:$0xff]  ;;  %v222_v55 = vld [vmem:[#allocation2 + $0x10] sm:$0xff] }
  0x2c   :  { %517 = vmatprep.subr.bf16.mxu1 %v377_v19  ;;  %v231_v50 = vld [vmem:[#allocation2 + $0x58] sm:$0xff]  ;;  %v228_v52 = vld [vmem:[#allocation2 + $0x40] sm:$0xff]  ;;  %v230_v56 = vld [vmem:[#allocation2 + $0x50] sm:$0xff] }
  0x2d   :  { %v353_v53 = vpack.c.bf16 %v231_v50, %v223_v48  ;;  %v350_v54 = vpack.c.bf16 %v228_v52, %v220_v51  ;;  %v352_v57 = vpack.c.bf16 %v230_v56, %v222_v55  ;;  %v337_v58 = vld [vmem:[#allocation2 + $0x3a8] sm:$0xff]  ;;  %v339_v60 = vld [vmem:[#allocation2 + $0x3b8] sm:$0xff]  ;;  %v4169_v7 = vld [vmem:[%s7032_s9] ss:$0 sm:$0xff] }
  0x2e   :  { %465 = vmatpush1.bf16.msra.mxu0 %v374_v20  ;;  %v345_v59 = vld [vmem:[#allocation2 + $0x3e8] sm:$0xff]  ;;  %v347_v62 = vld [vmem:[#allocation2 + $0x3f8] sm:$0xff]  ;;  %v336_v12 = vld [vmem:[#allocation2 + $0x3a0] sm:$0xff] }
  0x2f   :  { %518 = vmatpush1.bf16.msra.mxu1 %v376_v21  ;;  %466 = vmatprep.subr.bf16.mxu0 %v367_v25  ;;  %v411_v61 = vpack.c.bf16 %v345_v59, %v337_v58  ;;  %v413_v63 = vpack.c.bf16 %v347_v62, %v339_v60  ;;  %v344_v13 = vld [vmem:[#allocation2 + $0x3e0] sm:$0xff]  ;;  %v338_v15 = vld [vmem:[#allocation2 + $0x3b0] sm:$0xff]  ;;  %v321_v17 = vld [vmem:[#allocation2 + $0x328] sm:$0xff] }
  0x30   :  { %519 = vmatprep.subr.bf16.mxu1 %v369_v29  ;;  %v346_v16 = vld [vmem:[#allocation2 + $0x3f0] sm:$0xff]  ;;  %v329_v18 = vld [vmem:[#allocation2 + $0x368] sm:$0xff]  ;;  %v323_v19 = vld [vmem:[#allocation2 + $0x338] sm:$0xff]  ;;  %v410_v23 = vpack.c.bf16 %v344_v13, %v336_v12 }
  0x31   :  { %v331_v20 = vld [vmem:[#allocation2 + $0x378] sm:$0xff]  ;;  %v412_v24 = vpack.c.bf16 %v346_v16, %v338_v15  ;;  %v320_v25 = vld [vmem:[#allocation2 + $0x320] sm:$0xff]  ;;  %v403_v29 = vpack.c.bf16 %v329_v18, %v321_v17  ;;  %v322_v31 = vld [vmem:[#allocation2 + $0x330] sm:$0xff] }
  0x32   :  { %467 = vmatpush1.bf16.msra.mxu0 %v366_v30  ;;  %v328_v26 = vld [vmem:[#allocation2 + $0x360] sm:$0xff]  ;;  %v405_v30 = vpack.c.bf16 %v331_v20, %v323_v19  ;;  %v330_v32 = vld [vmem:[#allocation2 + $0x370] sm:$0xff]  ;;  %v313_v34 = vld [vmem:[#allocation2 + $0x2e8] sm:$0xff] }
  0x33   :  { %520 = vmatpush1.bf16.msra.mxu1 %v368_v33  ;;  %468 = vmatprep.subr.bf16.mxu0 %v359_v37  ;;  %v305_v33 = vld [vmem:[#allocation2 + $0x2a8] sm:$0xff]  ;;  %v307_v35 = vld [vmem:[#allocation2 + $0x2b8] sm:$0xff]  ;;  %v402_v38 = vpack.c.bf16 %v328_v26, %v320_v25  ;;  %v404_v39 = vpack.c.bf16 %v330_v32, %v322_v31  ;;  %v304_v40 = vld [vmem:[#allocation2 + $0x2a0] sm:$0xff] }
  0x34   :  { %521 = vmatprep.subr.bf16.mxu1 %v361_v41  ;;  %v315_v36 = vld [vmem:[#allocation2 + $0x2f8] sm:$0xff]  ;;  %v312_v41 = vld [vmem:[#allocation2 + $0x2e0] sm:$0xff]  ;;  %v395_v43 = vpack.c.bf16 %v313_v34, %v305_v33  ;;  %v314_v46 = vld [vmem:[#allocation2 + $0x2f0] sm:$0xff] }
  0x35   :  { %v397_v44 = vpack.c.bf16 %v315_v36, %v307_v35  ;;  %v289_v47 = vld [vmem:[#allocation2 + $0x228] sm:$0xff]  ;;  %v299_v50 = vld [vmem:[#allocation2 + $0x278] sm:$0xff]  ;;  %v394_v52 = vpack.c.bf16 %v312_v41, %v304_v40  ;;  %v296_v55 = vld [vmem:[#allocation2 + $0x260] sm:$0xff] }
  0x36   :  { %469 = vmatpush1.bf16.msra.mxu0 %v358_v42  ;;  %v297_v48 = vld [vmem:[#allocation2 + $0x268] sm:$0xff]  ;;  %v290_v59 = vld [vmem:[#allocation2 + $0x230] sm:$0xff]  ;;  %v259_v15 = vld [vmem:[#allocation2 + $0x138] sm:$0xff] }
  0x37   :  { %522 = vmatpush1.bf16.msra.mxu1 %v360_v45  ;;  %470 = vmatprep.subr.bf16.mxu0 %v351_v49  ;;  %v306_v45 = vld [vmem:[#allocation2 + $0x2b0] sm:$0xff]  ;;  %v291_v49 = vld [vmem:[#allocation2 + $0x238] sm:$0xff]  ;;  %v281_v62 = vld [vmem:[#allocation2 + $0x1e8] sm:$0xff] }
  0x38   :  { %523 = vmatprep.subr.bf16.mxu1 %v353_v53  ;;  %v396_v53 = vpack.c.bf16 %v314_v46, %v306_v45  ;;  %v389_v58 = vpack.c.bf16 %v299_v50, %v291_v49  ;;  %v298_v60 = vld [vmem:[#allocation2 + $0x270] sm:$0xff]  ;;  %v257_v13 = vld [vmem:[#allocation2 + $0x128] sm:$0xff]  ;;  %v267_v16 = vld [vmem:[#allocation2 + $0x178] sm:$0xff] }
  0x39   :  { %v282_v12 = vld [vmem:[#allocation2 + $0x1f0] sm:$0xff]  ;;  %v256_v19 = vld [vmem:[#allocation2 + $0x120] sm:$0xff]  ;;  %v241_v25 = vld [vmem:[#allocation2 + $0xa8] sm:$0xff] }
  0x3a   :  { %471 = vmatpush1.bf16.msra.mxu0 %v350_v54  ;;  %v288_v54 = vld [vmem:[#allocation2 + $0x220] sm:$0xff]  ;;  %v249_v26 = vld [vmem:[#allocation2 + $0xe8] sm:$0xff] }
  0x3b   :  { %524 = vmatpush1.bf16.msra.mxu1 %v352_v57  ;;  %562 = vmatprep.subr.bf16.mxu0 %v411_v61  ;;  %v387_v57 = vpack.c.bf16 %v297_v48, %v289_v47  ;;  %v273_v61 = vld [vmem:[#allocation2 + $0x1a8] sm:$0xff]  ;;  %v264_v20 = vld [vmem:[#allocation2 + $0x160] sm:$0xff]  ;;  %v363_v33 = vpack.c.bf16 %v249_v26, %v241_v25  ;;  %v739_v25 = vld [vmem:[%s7027_s4 + $0x58] sm:$0xff] }
  0x3c   :  { %615 = vmatprep.subr.bf16.mxu1 %v413_v63  ;;  %v275_v63 = vld [vmem:[#allocation2 + $0x1b8] sm:$0xff]  ;;  %v370_v31 = vpack.c.bf16 %v264_v20, %v256_v19  ;;  %v240_v34 = vld [vmem:[#allocation2 + $0xa0] sm:$0xff]  ;;  %v225_v41 = vld [vmem:[#allocation2 + $0x28] sm:$0xff] }
  0x3d   :  { %v248_v35 = vld [vmem:[#allocation2 + $0xe0] sm:$0xff]  ;;  %v733_v19 = vld [vmem:[%s7027_s4 + $0x28] sm:$0xff] }
  0x3e   :  { %v362_v45 = vpack.c.bf16 %v248_v35, %v240_v34  ;;  %v224_v47 = vld [vmem:[#allocation2 + $0x20] sm:$0xff] }
  0xdd   :  { %v5405_v2 = vpop.f32.mrf.mxu0 }
  0xde   :  { %v4784_v3 = vpop.f32.mrf.mxu1 }
  0xdf   :  { %v4778_v4 = vpop.f32.mrf.mxu0  ;;  %v210_v37 = vadd.f32 %v4784_v3, %v4169_v7  ;;  %v283_v3 = vld [vmem:[#allocation2 + $0x1f8] sm:$0xff] }
  0xe0   :  { %v201_v5 = vpop.f32.mrf.mxu1  ;;  %v386_v4 = vpack.c.bf16 %v296_v55, %v288_v54  ;;  %v416_v54 = vlaneseq }
  0xe1   :  { %v5407_v6 = vpop.f32.mrf.mxu0  ;;  %v202_v9 = vadd.f32 %v4169_v7, %v201_v5  ;;  %v218_v51 = vmax.f32 %v210_v37, 0.0  ;;  %v388_v5 = vpack.c.bf16 %v298_v60, %v290_v59 }
  0xe2   :  { %v4785_v8 = vpop.f32.mrf.mxu1  ;;  %v669_v59 = vand.u32 127, %v416_v54 }
  0xe3   :  { %v4779_v10 = vpop.f32.mrf.mxu0  ;;  %v216_v21 = vmax.f32 %v202_v9, 0.0  ;;  %v213_v27 = vadd.f32 %v4785_v8, %v4169_v7  ;;  %v280_v8 = vld [vmem:[#allocation2 + $0x1e0] sm:$0xff]  ;;  %v379_v9 = vpack.c.bf16 %v281_v62, %v273_v61  ;;  %v682_v61 = vpop.permute.xlu1 %681 }
  0xe4   :  { %v204_v11 = vpop.f32.mrf.mxu1  ;;  %v381_v10 = vpack.c.bf16 %v283_v3, %v275_v63  ;;  %vm688_vm9 = vcmp.eq.s32.totalorder %v669_v59, %v682_v61 }
  0xe5   :  { %v205_v14 = vadd.f32 %v4169_v7, %v204_v11  ;;  %v219_v42 = vmax.f32 %v213_v27, 0.0  ;;  %v272_v7 = vld [vmem:[#allocation2 + $0x1a0] sm:$0xff]  ;;  %v274_v11 = vld [vmem:[#allocation2 + $0x1b0] sm:$0xff] }
  0xe6   :  { %v378_v17 = vpack.c.bf16 %v280_v8, %v272_v7  ;;  %v380_v18 = vpack.c.bf16 %v282_v12, %v274_v11  ;;  %v4167_v27 = vld [vmem:[%s7030_s7] ss:$0 sm:$0xff]  ;;  %v741_v11 = vld [vmem:[%s7027_s4 + $0x68] sm:$0xff] }
  0xe7   :  { %v217_v22 = vmax.f32 %v205_v14, 0.0  ;;  %v5418_v56 = vpack.c.bf16 %v219_v42, %v218_v51  ;;  %v265_v14 = vld [vmem:[#allocation2 + $0x168] sm:$0xff]  ;;  %v5428_v36 = vadd.f32 %v4167_v27, %v5405_v2  ;;  %v5431_v40 = vadd.f32 %v4167_v27, %v5407_v6  ;;  %v232_v51 = vld [vmem:[#allocation2 + $0x60] sm:$0xff]  ;;  %v226_v6 = vld [vmem:[#allocation2 + $0x30] sm:$0xff] }
  0xe8   :  { %v233_v42 = vld [vmem:[#allocation2 + $0x68] sm:$0xff]  ;;  %v354_v55 = vpack.c.bf16 %v232_v51, %v224_v47  ;;  %v740_v8 = vld [vmem:[%s7027_s4 + $0x60] sm:$0xff]  ;;  %v743_v27 = vld [vmem:[%s7027_s4 + $0x78] sm:$0xff] }
  0xe9   :  { %v5412_v28 = vpack.c.bf16 %v217_v22, %v216_v21  ;;  %v258_v21 = vld [vmem:[#allocation2 + $0x130] sm:$0xff]  ;;  %v371_v22 = vpack.c.bf16 %v265_v14, %v257_v13  ;;  %7225 = vst [vmem:[#allocation8_spill] sm:$0xff] %v5428_v36  ;;  %7226 = vst [vmem:[#allocation9_spill] sm:$0xff] %v5431_v40  ;;  %v7046_v48 = vmax.f32 %v5428_v36, 0.0  ;;  %v7045_v2 = vmax.f32 %v5431_v40, 0.0 }
  0xea   :  { %v355_v49 = vpack.c.bf16 %v233_v42, %v225_v41 }
  0xeb   :  { %489 = vmatmul.mubr.bf16.vlgmr.msra.gmra.mxu0 %v5412_v28  ;;  %542 = vmatmul.mubr.bf16.vlgmr.msra.gmra.mxu1 %v5412_v28 }
  0xec   :  { %563 = vmatpush1.bf16.msra.mxu0 %v410_v23  ;;  %616 = vmatpush1.bf16.msra.mxu1 %v412_v24  ;;  %v373_v23 = vpack.c.bf16 %v267_v16, %v259_v15  ;;  %v266_v24 = vld [vmem:[#allocation2 + $0x170] sm:$0xff]  ;;  %v728_v15 = vld [vmem:[%s7027_s4] sm:$0xff] }
  0xed   :  { %564 = vmatprep.subr.bf16.mxu0 %v403_v29  ;;  %617 = vmatprep.subr.bf16.mxu1 %v405_v30  ;;  %v243_v29 = vld [vmem:[#allocation2 + $0xb8] sm:$0xff]  ;;  %v372_v32 = vpack.c.bf16 %v266_v24, %v258_v21  ;;  %v732_v16 = vld [vmem:[%s7027_s4 + $0x20] sm:$0xff]  ;;  %v742_v24 = vld [vmem:[%s7027_s4 + $0x70] sm:$0xff] }
  0xee   :  { %498 = vmatprep.mubr.bf16.mxu0 %v7047_v1  ;;  %551 = vmatprep.mubr.bf16.mxu1 %v7047_v1  ;;  %v251_v30 = vld [vmem:[#allocation2 + $0xf8] sm:$0xff]  ;;  %v5502_v20 = vcombine.low %v728_v15, %v732_v16 }
  0xef   :  { %v365_v37 = vpack.c.bf16 %v251_v30, %v243_v29  ;;  %v5528_v30 = vcombine.low %v739_v25, %v743_v27 }
  0xf0   :  { %565 = vmatpush1.bf16.msra.mxu0 %v402_v38  ;;  %618 = vmatpush1.bf16.msra.mxu1 %v404_v39  ;;  %v242_v38 = vld [vmem:[#allocation2 + $0xb0] sm:$0xff]  ;;  %7231 = vst [vmem:[#allocation14_spill] sm:$0xff] %v5502_v20 }
  0xf1   :  { %566 = vmatprep.subr.bf16.mxu0 %v395_v43  ;;  %619 = vmatprep.subr.bf16.mxu1 %v397_v44  ;;  %v250_v39 = vld [vmem:[#allocation2 + $0xf0] sm:$0xff]  ;;  %v227_v43 = vld [vmem:[#allocation2 + $0x38] sm:$0xff]  ;;  %7236 = vst [vmem:[#allocation19_spill] sm:$0xff] %v5528_v30 }
  0xf2   :  { %v235_v44 = vld [vmem:[#allocation2 + $0x78] sm:$0xff]  ;;  %v364_v46 = vpack.c.bf16 %v250_v39, %v242_v38 }
  0xf3   :  { %499 = vmatmul.mubr.bf16.gmra.mxu0 %v5418_v56  ;;  %552 = vmatmul.mubr.bf16.gmra.mxu1 %v5418_v56  ;;  %v357_v50 = vpack.c.bf16 %v235_v44, %v227_v43 }
  0xf4   :  { %567 = vmatpush1.bf16.msra.mxu0 %v394_v52  ;;  %620 = vmatpush1.bf16.msra.mxu1 %v396_v53  ;;  %v234_v52 = vld [vmem:[#allocation2 + $0x70] sm:$0xff]  ;;  %v676_v53 = vpop.permute.xlu0 %675 }
  0xf5   :  { %568 = vmatprep.subr.bf16.mxu0 %v387_v57  ;;  %621 = vmatprep.subr.bf16.mxu1 %v389_v58  ;;  %v356_v57 = vpack.c.bf16 %v234_v52, %v226_v6  ;;  %v5439_v58 = vpack.c.bf16 %v7045_v2, %v7046_v48  ;;  %vm686_vm6 = vcmp.eq.s32.totalorder %v669_v59, %v676_v53  ;;  %v730_v53 = vld [vmem:[%s7027_s4 + $0x10] sm:$0xff] }
  0xf6   :  { %594 = vmatprep.mubr.bf16.mxu0 %v7047_v1  ;;  %647 = vmatprep.mubr.bf16.mxu1 %v7047_v1  ;;  %v4172_v62 = vsel %vm686_vm6, 1.0, %v7049_v0 }
  0xf8   :  { %569 = vmatpush1.bf16.msra.mxu0 %v386_v4  ;;  %622 = vmatpush1.bf16.msra.mxu1 %v388_v5  ;;  %v679_v60 = vpop.permute.xlu0 %678  ;;  %v685_v4 = vpop.permute.xlu1 %684 }
  0xf9   :  { %570 = vmatprep.subr.bf16.mxu0 %v379_v9  ;;  %623 = vmatprep.subr.bf16.mxu1 %v381_v10  ;;  %vm687_vm7 = vcmp.eq.s32.totalorder %v669_v59, %v679_v60  ;;  %vm689_vm10 = vcmp.eq.s32.totalorder %v669_v59, %v685_v4  ;;  %v737_v9 = vld [vmem:[%s7027_s4 + $0x48] sm:$0xff]  ;;  %v735_v59 = vld [vmem:[%s7027_s4 + $0x38] sm:$0xff] }
  0xfa   :  { %v4173_v63 = vsel %vm687_vm7, 1.0, %v7049_v0  ;;  %v4175_v5 = vsel %vm689_vm10, 1.0, %v7049_v0  ;;  %v5480_v13 = vcombine.low %v737_v9, %v741_v11  ;;  %v5482_v14 = vcombine.high %v737_v9, %v741_v11  ;;  %v5010_v9 = vld [vmem:[%s7028_s5 + $0x38] sm:$0xff]  }
  0xfb   :  { %v5450_v3 = vpack.c.bf16 %v4173_v63, %v4172_v62  ;;  %v5011_v11 = vld [vmem:[%s7028_s5 + $0xb8] sm:$0xff]  }
  0xfc   :  { %571 = vmatpush1.bf16.msra.mxu0 %v378_v17  ;;  %624 = vmatpush1.bf16.msra.mxu1 %v380_v18  ;;  %7228 = vst [vmem:[#allocation11_spill] sm:$0xff] %v5480_v13  ;;  %7229 = vst [vmem:[#allocation12_spill] sm:$0xff] %v5482_v14  ;;  %v729_v17 = vld [vmem:[%s7027_s4 + $0x8] sm:$0xff]  ;;  %v5497_v18 = vcombine.high %v728_v15, %v732_v16  ;;  %v5012_v15 = vld [vmem:[%s7028_s5 + $0x70] sm:$0xff]  }
  0xfd   :  { %572 = vmatprep.subr.bf16.mxu0 %v371_v22  ;;  %625 = vmatprep.subr.bf16.mxu1 %v373_v23  ;;  %v5504_v21 = vcombine.low %v729_v17, %v733_v19  ;;  %v5506_v22 = vcombine.high %v729_v17, %v733_v19  ;;  %v738_v23 = vld [vmem:[%s7027_s4 + $0x50] sm:$0xff] }
  0xfe   :  { %7230 = vst [vmem:[#allocation13_spill] sm:$0xff] %v5497_v18  ;;  %v5521_v26 = vcombine.high %v738_v23, %v742_v24  ;;  %v5526_v29 = vcombine.low %v738_v23, %v742_v24  ;;  %v5013_v16 = vld [vmem:[%s7028_s5 + $0xf0] sm:$0xff]   ;;  %v5016_v23 = vld [vmem:[%s7028_s5 + $0x68] sm:$0xff]  }
  0xff   :  { %7232 = vst [vmem:[#allocation15_spill] sm:$0xff] %v5504_v21  ;;  %7233 = vst [vmem:[#allocation16_spill] sm:$0xff] %v5506_v22  ;;  %v5014_v17 = vld [vmem:[%s7028_s5 + $0x30] sm:$0xff]   ;;  %v5017_v24 = vld [vmem:[%s7028_s5 + $0xe8] sm:$0xff]  }
 0x100   :  { %573 = vmatpush1.bf16.msra.mxu0 %v370_v31  ;;  %626 = vmatpush1.bf16.msra.mxu1 %v372_v32  ;;  %7234 = vst [vmem:[#allocation17_spill] sm:$0xff] %v5521_v26  ;;  %7235 = vst [vmem:[#allocation18_spill] sm:$0xff] %v5526_v29  ;;  %v5530_v31 = vcombine.high %v739_v25, %v743_v27  ;;  %v5015_v19 = vld [vmem:[%s7028_s5 + $0xb0] sm:$0xff]   ;;  %v5018_v25 = vld [vmem:[%s7028_s5 + $0x28] sm:$0xff]  }
 0x101   :  { %574 = vmatprep.subr.bf16.mxu0 %v363_v33  ;;  %627 = vmatprep.subr.bf16.mxu1 %v365_v37  ;;  %v5019_v27 = vld [vmem:[%s7028_s5 + $0xa8] sm:$0xff]  }
 0x102   :  { %7237 = vst [vmem:[#allocation20_spill] sm:$0xff] %v5530_v31 }
 0x104   :  { %575 = vmatpush1.bf16.msra.mxu0 %v362_v45  ;;  %628 = vmatpush1.bf16.msra.mxu1 %v364_v46 }
 0x105   :  { %576 = vmatprep.subr.bf16.mxu0 %v355_v49  ;;  %629 = vmatprep.subr.bf16.mxu1 %v357_v50 }
 0x108   :  { %577 = vmatpush1.bf16.msra.mxu0 %v354_v55  ;;  %630 = vmatpush1.bf16.msra.mxu1 %v356_v57  ;;  %v734_v55 = vld [vmem:[%s7027_s4 + $0x30] sm:$0xff]  ;;  %v731_v57 = vld [vmem:[%s7027_s4 + $0x18] sm:$0xff] }
 0x109   :  { %4786 = vmatprep.subr.bf16.mxu0 %v5439_v58  ;;  %v5578_v62 = vcombine.high %v730_v53, %v734_v55  ;;  %v5580_v63 = vcombine.high %v731_v57, %v735_v59  ;;  %v5588_v4 = vcombine.low %v730_v53, %v734_v55  ;;  %v5023_v53 = vld [vmem:[%s7028_s5 + $0xa0] sm:$0xff]   ;;  %v5024_v55 = vld [vmem:[%s7028_s5 + $0x58] sm:$0xff]  }
 0x10b   :  { %595 = vmatmul.mubr.bf16.vlgmr.msra.gmra.mxu0 %v5412_v28  ;;  %648 = vmatmul.mubr.bf16.vlgmr.msra.gmra.mxu1 %v5412_v28  ;;  %v4174_v28 = vsel %vm688_vm9, 1.0, %v7049_v0  ;;  %7238 = vst [vmem:[#allocation21_spill] sm:$0xff] %v5578_v62  ;;  %7239 = vst [vmem:[#allocation22_spill] sm:$0xff] %v5580_v63 }
 0x10c   :  { %4787 = vmatpush3.bf16.msra.mxu0 %v5439_v58  ;;  %604 = vmatprep.mubr.bf16.mxu0 %v7047_v1  ;;  %v5459_v7 = vpack.c.bf16 %v4175_v5, %v4174_v28  ;;  %7240 = vst [vmem:[#allocation23_spill] sm:$0xff] %v5588_v4  ;;  %v5590_v28 = vcombine.low %v731_v57, %v735_v59  ;;  %v5008_v5 = vld [vmem:[%s7028_s5 + $0x78] sm:$0xff]  }
 0x10d   :  { %657 = vmatprep.mubr.bf16.mxu1 %v7047_v1  ;;  %1082 = vmatprep.subr.bf16.mxu0 %v5482_v14  ;;  %v5025_v57 = vld [vmem:[%s7028_s5 + $0xd8] sm:$0xff]  }
 0x10e   :  { %7227 = vst [vmem:[#allocation10_spill] sm:$0xff] %v5459_v7  ;;  %7241 = vst [vmem:[#allocation24_spill] sm:$0xff] %v5590_v28  ;;  %v5026_v59 = vld [vmem:[%s7028_s5 + $0x18] sm:$0xff]  }
 0x113   :  { %605 = vmatmul.mubr.bf16.gmra.mxu0 %v5418_v56  ;;  %658 = vmatmul.mubr.bf16.gmra.mxu1 %v5418_v56  ;;  %v736_v56 = vld [vmem:[%s7027_s4 + $0x40] sm:$0xff] }
 0x114   :  { %4788 = vmatprep.mubr.msk.bf16.mxu0 %vm873_vm8, %v5450_v3  ;;  %1049 = vmatprep.mubr.bf16.mxu1 %v7047_v1  ;;  %v5473_v10 = vcombine.high %v736_v56, %v740_v8  ;;  %v5478_v12 = vcombine.low %v736_v56, %v740_v8  ;;  %v5009_v56 = vld [vmem:[%s7028_s5 + $0xf8] sm:$0xff]  }
 0x116   :  { %1029 = vmatprep.subr.bf16.mxu1 %v5473_v10 }
 0x117   :  { %1030 = vmatpush1.bf16.msra.mxu1 %v5478_v12 }
 0x118   :  { %1031 = vmatprep.subr.bf16.mxu1 %v5497_v18 }
 0x11b   :  { %4789 = vmatmul.mubr.msk.bf16.vlgmr.msra.gmra.mxu0 %vm873_vm8, %v5459_v7  ;;  %1032 = vmatpush1.bf16.msra.mxu1 %v5502_v20 }
 0x11c   :  { %1102 = vmatprep.mubr.bf16.mxu0 %v7047_v1  ;;  %1083 = vmatpush1.bf16.msra.mxu0 %v5480_v13 }
 0x11d   :  { %1084 = vmatprep.subr.bf16.mxu0 %v5506_v22  ;;  %1135 = vmatprep.subr.bf16.mxu1 %v5521_v26 }
 0x120   :  { %1085 = vmatpush1.bf16.msra.mxu0 %v5504_v21 }
 0x121   :  { %1188 = vmatprep.subr.bf16.mxu0 %v5530_v31 }
 0x1ab   :  { %v5534_v32 = vpop.f32.mrf.mxu0 }
 0x1ad   :  { %v5536_v33 = vpop.f32.mrf.mxu0 }
 0x1af   :  { %v5538_v34 = vpop.f32.mrf.mxu0 }
 0x1b1   :  { %v5540_v35 = vpop.f32.mrf.mxu0 }
 0x1b3   :  { %v5542_v37 = vpop.f32.mrf.mxu0 }
 0x1b5   :  { %v5544_v38 = vpop.f32.mrf.mxu0 }
 0x1b7   :  { %v5546_v39 = vpop.f32.mrf.mxu0 }
 0x1b9   :  { %v5548_v41 = vpop.f32.mrf.mxu0 }
 0x1cb   :  { %v5550_v42 = vpop.f32.mrf.mxu0 }
 0x1cd   :  { %v5552_v43 = vpop.f32.mrf.mxu0 }
 0x1cf   :  { %v5554_v44 = vpop.f32.mrf.mxu0 }
 0x1d1   :  { %v5556_v45 = vpop.f32.mrf.mxu0 }
 0x1d3   :  { %v5558_v46 = vpop.f32.mrf.mxu0 }
 0x1d5   :  { %v5560_v47 = vpop.f32.mrf.mxu0 }
 0x1d7   :  { %v5562_v49 = vpop.f32.mrf.mxu0 }
 0x1d9   :  { %v5564_v50 = vpop.f32.mrf.mxu0 }
 0x1db   :  { %v4790_v51 = vpop.f32.mrf.mxu0 }
 0x1dd   :  { %v914_v6 = vpop.f32.mrf.mxu0 }
 0x1df   :  { %v4791_v52 = vpop.f32.mrf.mxu0 }
 0x1e0   :  { %v930_v8 = vpack.c.bf16 %v4791_v52, %v4790_v51  ;;  %v5020_v51 = vld [vmem:[%s7028_s5 + $0x60] sm:$0xff]  }
 0x1e1   :  { %v917_v60 = vpop.f32.mrf.mxu0  ;;  %v5022_v52 = vld [vmem:[%s7028_s5 + $0x20] sm:$0xff]  }
 0x1e2   :  { %v929_v61 = vpack.c.bf16 %v917_v60, %v914_v6  ;;  %v5021_v6 = vld [vmem:[%s7028_s5 + $0xe0] sm:$0xff]   ;;  %v5027_v60 = vld [vmem:[%s7028_s5 + $0x98] sm:$0xff]  }
 0x1e4   :  { %4197 = vmatmul.mubr.msk.bf16.vlgmr.msra.gmra.mxu1 %vm715_vm11, %v929_v61  ;;  %4199 = vmatmul.mubr.msk.bf16.vlgmr.msra.gmra.mxu0 %vm715_vm11, %v929_v61 }
 0x1e5   :  { %1059 = vmatprep.mubr.bf16.mxu1 %v7047_v1  ;;  %1112 = vmatprep.mubr.bf16.mxu0 %v7047_v1 }
 0x1e6   :  { %1136 = vmatpush1.bf16.msra.mxu1 %v5526_v29  ;;  %1189 = vmatpush1.bf16.msra.mxu0 %v5528_v30 }
 0x1e7   :  { %1137 = vmatprep.subr.bf16.mxu1 %v5578_v62  ;;  %1190 = vmatprep.subr.bf16.mxu0 %v5580_v63 }
 0x1ea   :  { %1138 = vmatpush1.bf16.msra.mxu1 %v5588_v4  ;;  %1191 = vmatpush1.bf16.msra.mxu0 %v5590_v28 }
 0x1eb   :  { %4360 = vmatprep.subr.bf16.mxu1 %v5008_v5  ;;  %4388 = vmatprep.subr.bf16.mxu0 %v5009_v56  ;;  %v5029_v5 = vld [vmem:[%s7028_s5 + $0xd0] sm:$0xff]  }
 0x1ec   :  { %4198 = vmatmul.mubr.msk.bf16.gmra.mxu1 %vm715_vm11, %v930_v8  ;;  %4200 = vmatmul.mubr.msk.bf16.gmra.mxu0 %vm715_vm11, %v930_v8  ;;  %v5030_v56 = vld [vmem:[%s7028_s5 + $0x10] sm:$0xff]  }
 0x1ed   :  { %1155 = vmatprep.mubr.bf16.mxu1 %v7047_v1  ;;  %1208 = vmatprep.mubr.bf16.mxu0 %v7047_v1 }
 0x1f4   :  { %4201 = vmatmul.mubr.msk.bf16.vlgmr.msra.gmra.mxu1 %vm715_vm11, %v929_v61  ;;  %4203 = vmatmul.mubr.msk.bf16.vlgmr.msra.gmra.mxu0 %vm715_vm11, %v929_v61  ;;  %v5028_v61 = vld [vmem:[%s7028_s5 + $0x50] sm:$0xff]  }
 0x1f5   :  { %1165 = vmatprep.mubr.bf16.mxu1 %v7047_v1  ;;  %1218 = vmatprep.mubr.bf16.mxu0 %v7047_v1 }
 0x1f6   :  { %4361 = vmatpush3.bf16.msra.mxu1 %v5010_v9  ;;  %4389 = vmatpush3.bf16.msra.mxu0 %v5011_v11  ;;  %v5032_v9 = vld [vmem:[%s7028_s5 + $0x48] sm:$0xff]  }
 0x1f7   :  { %4362 = vmatprep.subr.bf16.mxu1 %v5012_v15  ;;  %4390 = vmatprep.subr.bf16.mxu0 %v5013_v16  ;;  %v5033_v11 = vld [vmem:[%s7028_s5 + $0xc8] sm:$0xff]  }
 0x1f8   :  { %v5034_v15 = vld [vmem:[%s7028_s5 + $0x8] sm:$0xff]  }
 0x1f9   :  { %v5035_v16 = vld [vmem:[%s7028_s5 + $0x88] sm:$0xff]  }
 0x1fa   :  { %4363 = vmatpush3.bf16.msra.mxu1 %v5014_v17  ;;  %4391 = vmatpush3.bf16.msra.mxu0 %v5015_v19  ;;  %v5036_v17 = vld [vmem:[%s7028_s5 + $0x40] sm:$0xff]  }
 0x1fb   :  { %4364 = vmatprep.subr.bf16.mxu1 %v5016_v23  ;;  %4392 = vmatprep.subr.bf16.mxu0 %v5017_v24  ;;  %v5037_v19 = vld [vmem:[%s7028_s5 + $0xc0] sm:$0xff]  }
 0x1fc   :  { %4202 = vmatmul.mubr.msk.bf16.gmra.mxu1 %vm715_vm11, %v930_v8  ;;  %4204 = vmatmul.mubr.msk.bf16.gmra.mxu0 %vm715_vm11, %v930_v8  ;;  %v5031_v8 = vld [vmem:[%s7028_s5 + $0x90] sm:$0xff]   ;;  %v5038_v23 = vld [vmem:[%s7028_s5] sm:$0xff]  }
 0x1fd   :  { %v5039_v24 = vld [vmem:[%s7028_s5 + $0x80] sm:$0xff]  }
 0x1fe   :  { %4365 = vmatpush3.bf16.msra.mxu1 %v5018_v25  ;;  %4393 = vmatpush3.bf16.msra.mxu0 %v5019_v27  ;;  %v5040_v25 = vld [vmem:[%s7028_s5 + $0x178] sm:$0xff]  }
 0x1ff   :  { %4366 = vmatprep.subr.bf16.mxu1 %v5020_v51  ;;  %4394 = vmatprep.subr.bf16.mxu0 %v5021_v6  ;;  %v5041_v27 = vld [vmem:[%s7028_s5 + $0x1f8] sm:$0xff]   ;;  %v543_v51 = vpop.f32.mrf.mxu1 }
 0x201   :  { %v545_v6 = vpop.f32.mrf.mxu1 }
 0x202   :  { %4367 = vmatpush3.bf16.msra.mxu1 %v5022_v52  ;;  %4395 = vmatpush3.bf16.msra.mxu0 %v5023_v53 }
 0x203   :  { %4368 = vmatprep.subr.bf16.mxu1 %v5024_v55  ;;  %4396 = vmatprep.subr.bf16.mxu0 %v5025_v57  ;;  %v547_v52 = vpop.f32.mrf.mxu1 }
 0x205   :  { %v549_v53 = vpop.f32.mrf.mxu1 }
 0x206   :  { %4369 = vmatpush3.bf16.msra.mxu1 %v5026_v59  ;;  %4397 = vmatpush3.bf16.msra.mxu0 %v5027_v60 }
 0x207   :  { %4370 = vmatprep.subr.bf16.mxu1 %v5028_v61  ;;  %4398 = vmatprep.subr.bf16.mxu0 %v5029_v5  ;;  %v5708_v55 = vpop.f32.mrf.mxu1 }
 0x209   :  { %v555_v57 = vpop.f32.mrf.mxu1 }
 0x20a   :  { %4371 = vmatpush3.bf16.msra.mxu1 %v5030_v56  ;;  %4399 = vmatpush3.bf16.msra.mxu0 %v5031_v8 }
 0x20b   :  { %4372 = vmatprep.subr.bf16.mxu1 %v5032_v9  ;;  %4400 = vmatprep.subr.bf16.mxu0 %v5033_v11  ;;  %v5710_v59 = vpop.f32.mrf.mxu1 }
 0x20d   :  { %v5712_v60 = vpop.f32.mrf.mxu1 }
 0x20e   :  { %4373 = vmatpush3.bf16.msra.mxu1 %v5034_v15  ;;  %4401 = vmatpush3.bf16.msra.mxu0 %v5035_v16  ;;  %v5727_v15 = vshrl.u32 %v416_v54, 7 }
 0x20f   :  { %4374 = vmatprep.subr.bf16.mxu1 %v5036_v17  ;;  %4402 = vmatprep.subr.bf16.mxu0 %v5037_v19  ;;  %v5714_v61 = vpop.f32.mrf.mxu1 }
 0x210   :  { %v422_v17 = vsub.s32 1, %v5727_v15  ;;  %v430_v19 = vsub.s32 3, %v5727_v15 }
 0x211   :  { %v5716_v5 = vpop.f32.mrf.mxu1 }
 0x212   :  { %4375 = vmatpush3.bf16.msra.mxu1 %v5038_v23  ;;  %4403 = vmatpush3.bf16.msra.mxu0 %v5039_v24  ;;  %v418_v23 = vsub.s32 0, %v5727_v15  ;;  %v426_v24 = vsub.s32 2, %v5727_v15 }
 0x213   :  { %4416 = vmatprep.subr.bf16.mxu1 %v5040_v25  ;;  %4444 = vmatprep.subr.bf16.mxu0 %v5041_v27  ;;  %v5718_v56 = vpop.f32.mrf.mxu1  ;;  %v5740_v27 = vld [vmem:[%s7034_s11] sm:$0xff] }
 0x214   :  { %v423_v48 = vrot.slane %v5740_v27, %v422_v17  ;;  %v431_v1 = vrot.slane %v5740_v27, %v430_v19  ;;  %v419_v0 = vrot.slane %v5740_v27, %v418_v23  ;;  %v427_v28 = vrot.slane %v5740_v27, %v426_v24 }
 0x215   :  { %v5720_v8 = vpop.f32.mrf.mxu1 }
 0x216   :  { %v5747_v62 = vadd.f32 %v5538_v34, %v419_v0  ;;  %v5749_v30 = vadd.f32 %v547_v52, %v427_v28  ;;  %v5752_v21 = vadd.f32 %v5536_v33, %v423_v48  ;;  %v5754_v22 = vadd.f32 %v545_v6, %v431_v1 }
 0x217   :  { %v5722_v9 = vpop.f32.mrf.mxu1  ;;  %v5757_v17 = vadd.f32 %v5540_v35, %v423_v48  ;;  %v5759_v19 = vadd.f32 %v549_v53, %v431_v1  ;;  %v5762_v23 = vadd.f32 %v5534_v32, %v419_v0  ;;  %v5764_v24 = vadd.f32 %v543_v51, %v427_v28 }
 0x218   :  { %7242 = vst [vmem:[#allocation25_spill] sm:$0xff] %v5747_v62  ;;  %7243 = vst [vmem:[#allocation26_spill] sm:$0xff] %v5749_v30 }
 0x219   :  { %v5724_v11 = vpop.f32.mrf.mxu1  ;;  %7244 = vst [vmem:[#allocation27_spill] sm:$0xff] %v5752_v21  ;;  %7245 = vst [vmem:[#allocation28_spill] sm:$0xff] %v5754_v22 }
 0x21a   :  { %7246 = vst [vmem:[#allocation29_spill] sm:$0xff] %v5757_v17  ;;  %7247 = vst [vmem:[#allocation30_spill] sm:$0xff] %v5759_v19 }
 0x21b   :  { %v5729_v16 = vpop.f32.mrf.mxu1  ;;  %7248 = vst [vmem:[#allocation31_spill] sm:$0xff] %v5762_v23  ;;  %7249 = vst [vmem:[#allocation32_spill] sm:$0xff] %v5764_v24 }
 0x21d   :  { %v5735_v25 = vpop.f32.mrf.mxu1 }
 0x2a4   :  { %v1051_v2 = vpop.f32.mrf.mxu1  ;;  %v1104_v54 = vpop.f32.mrf.mxu0 }
 0x2a5   :  { %v1229_v14 = vmul.f32 %v1051_v2, %v5762_v23  ;;  %v1231_v32 = vmul.f32 %v1104_v54, %v5764_v24  ;;  %v5044_v2 = vld [vmem:[%s7028_s5 + $0x170] sm:$0xff]  }
 0x2a6   :  { %v1053_v4 = vpop.f32.mrf.mxu1  ;;  %v1106_v63 = vpop.f32.mrf.mxu0  ;;  %v5045_v54 = vld [vmem:[%s7028_s5 + $0x1f0] sm:$0xff]  }
 0x2a7   :  { %v1230_v33 = vmul.f32 %v1053_v4, %v5752_v21  ;;  %v1232_v6 = vmul.f32 %v1106_v63, %v5754_v22  ;;  %v5043_v63 = vld [vmem:[%s7028_s5 + $0x1b8] sm:$0xff]  }
 0x2a8   :  { %v1055_v29 = vpop.f32.mrf.mxu1  ;;  %v1108_v31 = vpop.f32.mrf.mxu0 }
 0x2a9   :  { %v1237_v34 = vmul.f32 %v1055_v29, %v5747_v62  ;;  %v1239_v52 = vmul.f32 %v1108_v31, %v5749_v30  ;;  %v5042_v31 = vld [vmem:[%s7028_s5 + $0x138] sm:$0xff]  }
 0x2aa   :  { %v1057_v13 = vpop.f32.mrf.mxu1  ;;  %v1110_v7 = vpop.f32.mrf.mxu0 }
 0x2ab   :  { %v1238_v35 = vmul.f32 %v1057_v13, %v5757_v17  ;;  %v1240_v53 = vmul.f32 %v1110_v7, %v5759_v19  ;;  %v1261_v4 = vpack.c.bf16 %v1237_v34, %v1229_v14  ;;  %v1263_v13 = vpack.c.bf16 %v1239_v52, %v1231_v32 }
 0x2ac   :  { %v1061_v51 = vpop.f32.mrf.mxu1  ;;  %v1114_v40 = vpop.f32.mrf.mxu0  ;;  %v5792_v14 = vadd.f32 %v555_v57, %v431_v1  ;;  %v5795_v34 = vadd.f32 %v5546_v39, %v419_v0  ;;  %v438_v52 = vsub.s32 5, %v5727_v15  ;;  %v5799_v32 = vadd.f32 %v5710_v59, %v427_v28 }
 0x2ad   :  { %v1262_v36 = vpack.c.bf16 %v1238_v35, %v1230_v33  ;;  %v1264_v29 = vpack.c.bf16 %v1240_v53, %v1232_v6  ;;  %v5787_v33 = vadd.f32 %v5542_v37, %v419_v0  ;;  %v5790_v6 = vadd.f32 %v5544_v38, %v423_v48  ;;  %v5046_v0 = vld [vmem:[%s7028_s5 + $0x130] sm:$0xff]  }
 0x2ae   :  { %v1063_v17 = vpop.f32.mrf.mxu1  ;;  %v1116_v7 = vpop.f32.mrf.mxu0  ;;  %7252 = vst [vmem:[#allocation35_spill] sm:$0xff] %v5792_v14  ;;  %7253 = vst [vmem:[#allocation36_spill] sm:$0xff] %v5795_v34  ;;  %v5805_v37 = vadd.f32 %v5712_v60, %v431_v1  ;;  %v446_v38 = vsub.s32 7, %v5727_v15  ;;  %v5812_v39 = vadd.f32 %v5708_v55, %v427_v28  ;;  %v5047_v1 = vld [vmem:[%s7028_s5 + $0x1b0] sm:$0xff]   ;;  %v5048_v60 = vld [vmem:[%s7028_s5 + $0x168] sm:$0xff]  }
 0x2af   :  { %7250 = vst [vmem:[#allocation33_spill] sm:$0xff] %v5787_v33  ;;  %1693 = vmatprep.mubr.bf16.mxu1 %v1262_v36  ;;  %1742 = vmatprep.mubr.bf16.mxu0 %v1264_v29  ;;  %7251 = vst [vmem:[#allocation34_spill] sm:$0xff] %v5790_v6  ;;  %v5802_v36 = vadd.f32 %v5548_v41, %v423_v48  ;;  %v1246_v57 = vmul.f32 %v1063_v17, %v5790_v6 }
 0x2b0   :  { %v1065_v35 = vpop.f32.mrf.mxu1  ;;  %v1118_v53 = vpop.f32.mrf.mxu0  ;;  %1694 = vmatmul.mubr.bf16.vlgmr.msra.gmra.mxu1 %v1261_v4  ;;  %1743 = vmatmul.mubr.bf16.vlgmr.msra.gmra.mxu0 %v1263_v13  ;;  %7254 = vst [vmem:[#allocation37_spill] sm:$0xff] %v5799_v32  ;;  %7256 = vst [vmem:[#allocation39_spill] sm:$0xff] %v5805_v37  ;;  %v1248_v29 = vmul.f32 %v1116_v7, %v5792_v14  ;;  %v5838_v7 = vrot.slane %v5740_v27, %v446_v38 }
 0x2b1   :  { %7255 = vst [vmem:[#allocation38_spill] sm:$0xff] %v5802_v36  ;;  %4417 = vmatpush3.bf16.msra.mxu1 %v5042_v31  ;;  %4445 = vmatpush3.bf16.msra.mxu0 %v5043_v63  ;;  %7257 = vst [vmem:[#allocation40_spill] sm:$0xff] %v5812_v39  ;;  %v1253_v59 = vmul.f32 %v1065_v35, %v5795_v34  ;;  %v1255_v28 = vmul.f32 %v1118_v53, %v5799_v32 }
 0x2b2   :  { %v1067_v48 = vpop.f32.mrf.mxu1  ;;  %v1120_v41 = vpop.f32.mrf.mxu0  ;;  %4418 = vmatprep.subr.bf16.mxu1 %v5044_v2  ;;  %4446 = vmatprep.subr.bf16.mxu0 %v5045_v54  ;;  %v5827_v31 = vrot.slane %v5740_v27, %v438_v52  ;;  %v1245_v63 = vmul.f32 %v1061_v51, %v5787_v33  ;;  %v5049_v2 = vld [vmem:[%s7028_s5 + $0x1e8] sm:$0xff]   ;;  %v1247_v54 = vmul.f32 %v1114_v40, %v5812_v39  ;;  %v5052_v40 = vld [vmem:[%s7028_s5 + $0x160] sm:$0xff]  }
 0x2b3   :  { %v1254_v55 = vmul.f32 %v1067_v48, %v5802_v36  ;;  %v1256_v17 = vmul.f32 %v1120_v41, %v5805_v37  ;;  %v5050_v51 = vld [vmem:[%s7028_s5 + $0x128] sm:$0xff]  }
 0x2b4   :  { %v5830_v4 = vpop.f32.mrf.mxu1  ;;  %v5832_v13 = vpop.f32.mrf.mxu0  ;;  %v1269_v52 = vpack.c.bf16 %v1253_v59, %v1245_v63  ;;  %v5051_v33 = vld [vmem:[%s7028_s5 + $0x1a8] sm:$0xff]   ;;  %v1271_v38 = vpack.c.bf16 %v1255_v28, %v1247_v54  ;;  %v5871_v28 = vadd.f32 %v5720_v8, %v5838_v7 }
 0x2b5   :  { %v1270_v35 = vpack.c.bf16 %v1254_v55, %v1246_v57  ;;  %v1272_v53 = vpack.c.bf16 %v1256_v17, %v1248_v29  ;;  %4419 = vmatpush3.bf16.msra.mxu1 %v5046_v0  ;;  %4447 = vmatpush3.bf16.msra.mxu0 %v5047_v1  ;;  %v5053_v0 = vld [vmem:[%s7028_s5 + $0x1e0] sm:$0xff]   ;;  %v5855_v57 = vadd.f32 %v5552_v43, %v5827_v31 }
 0x2b6   :  { %v1159_v48 = vpop.f32.mrf.mxu1  ;;  %v1212_v41 = vpop.f32.mrf.mxu0  ;;  %4420 = vmatprep.subr.bf16.mxu1 %v5048_v60  ;;  %4448 = vmatprep.subr.bf16.mxu0 %v5049_v2  ;;  %v5863_v60 = vadd.f32 %v5716_v5, %v5838_v7  ;;  %v5867_v29 = vadd.f32 %v5556_v45, %v5827_v31  ;;  %7261 = vst [vmem:[#allocation44_spill] sm:$0xff] %v5871_v28  ;;  %v5054_v43 = vld [vmem:[%s7028_s5 + $0x120] sm:$0xff]   ;;  %v5056_v45 = vld [vmem:[%s7028_s5 + $0x158] sm:$0xff]  }
 0x2b7   :  { %1701 = vmatprep.mubr.bf16.mxu1 %v1270_v35  ;;  %1750 = vmatprep.mubr.bf16.mxu0 %v1272_v53  ;;  %7258 = vst [vmem:[#allocation41_spill] sm:$0xff] %v5855_v57  ;;  %v5055_v5 = vld [vmem:[%s7028_s5 + $0x1a0] sm:$0xff]   ;;  %v1234_v8 = vmul.f32 %v1159_v48, %v5855_v57  ;;  %v5058_v48 = vld [vmem:[%s7028_s5 + $0x118] sm:$0xff]  }
 0x2b8   :  { %v5857_v59 = vpop.f32.mrf.mxu1  ;;  %v5859_v1 = vpop.f32.mrf.mxu0  ;;  %1702 = vmatmul.mubr.bf16.gmra.mxu1 %v1269_v52  ;;  %7259 = vst [vmem:[#allocation42_spill] sm:$0xff] %v5863_v60  ;;  %7260 = vst [vmem:[#allocation43_spill] sm:$0xff] %v5867_v29  ;;  %1751 = vmatmul.mubr.bf16.gmra.mxu0 %v1271_v38  ;;  %v1236_v63 = vmul.f32 %v1212_v41, %v5863_v60  ;;  %v5059_v41 = vld [vmem:[%s7028_s5 + $0x198] sm:$0xff]   ;;  %v5905_v38 = vld [vmem:[%s7028_s5 + $0x1d0] sm:$0xff]  }
 0x2b9   :  { %4421 = vmatpush3.bf16.msra.mxu1 %v5050_v51  ;;  %4449 = vmatpush3.bf16.msra.mxu0 %v5051_v33  ;;  %v5057_v33 = vld [vmem:[%s7028_s5 + $0x1d8] sm:$0xff]   ;;  %7262 = vst [vmem:[#allocation45_spill] sm:$0xff] %v5905_v38 }
 0x2ba   :  { %v1163_v55 = vpop.f32.mrf.mxu1  ;;  %v1216_v17 = vpop.f32.mrf.mxu0  ;;  %4422 = vmatprep.subr.bf16.mxu1 %v5052_v40  ;;  %4450 = vmatprep.subr.bf16.mxu0 %v5053_v0  ;;  %v5060_v40 = vld [vmem:[%s7028_s5 + $0x150] sm:$0xff]  }
 0x2bb   :  { %v1242_v2 = vmul.f32 %v1163_v55, %v5867_v29  ;;  %v1244_v54 = vmul.f32 %v1216_v17, %v5871_v28  ;;  %v5910_v55 = vld [vmem:[%s7028_s5 + $0x110] sm:$0xff]   ;;  %v434_v17 = vsub.s32 4, %v5727_v15 }
 0x2bc   :  { %v5889_v35 = vpop.f32.mrf.mxu1  ;;  %v5891_v52 = vpop.f32.mrf.mxu0  ;;  %7263 = vst [vmem:[#allocation46_spill] sm:$0xff] %v5910_v55 }
 0x2bd   :  { %v1266_v53 = vpack.c.bf16 %v1242_v2, %v1234_v8  ;;  %v1268_v51 = vpack.c.bf16 %v1244_v54, %v1236_v63  ;;  %4423 = vmatpush3.bf16.msra.mxu1 %v5054_v43  ;;  %4451 = vmatpush3.bf16.msra.mxu0 %v5055_v5  ;;  %v5916_v5 = vld [vmem:[%s7028_s5 + $0x190] sm:$0xff]   ;;  %v442_v8 = vsub.s32 6, %v5727_v15  ;;  %v5928_v63 = vld [vmem:[%s7028_s5 + $0x1c8] sm:$0xff]  }
 0x2be   :  { %4424 = vmatprep.subr.bf16.mxu1 %v5056_v45  ;;  %4452 = vmatprep.subr.bf16.mxu0 %v5057_v33  ;;  %v1169_v0 = vpop.f32.mrf.mxu1  ;;  %v1222_v43 = vpop.f32.mrf.mxu0  ;;  %7264 = vst [vmem:[#allocation47_spill] sm:$0xff] %v5916_v5  ;;  %v5921_v45 = vld [vmem:[%s7028_s5 + $0x148] sm:$0xff]   ;;  %7266 = vst [vmem:[#allocation49_spill] sm:$0xff] %v5928_v63 }
 0x2bf   :  { %1791 = vmatprep.mubr.bf16.mxu1 %v1266_v53  ;;  %1840 = vmatprep.mubr.bf16.mxu0 %v1268_v51  ;;  %7265 = vst [vmem:[#allocation48_spill] sm:$0xff] %v5921_v45  ;;  %v5934_v33 = vld [vmem:[%s7028_s5 + $0x108] sm:$0xff]   ;;  %v435_v53 = vrot.slane %v5740_v27, %v434_v17 }
 0x2c0   :  { %v1171_v2 = vpop.f32.mrf.mxu1  ;;  %v1224_v54 = vpop.f32.mrf.mxu0  ;;  %7267 = vst [vmem:[#allocation50_spill] sm:$0xff] %v5934_v33  ;;  %v5942_v51 = vld [vmem:[%s7028_s5 + $0x188] sm:$0xff]  }
 0x2c1   :  { %4425 = vmatpush3.bf16.msra.mxu1 %v5058_v48  ;;  %4453 = vmatpush3.bf16.msra.mxu0 %v5059_v41  ;;  %7268 = vst [vmem:[#allocation51_spill] sm:$0xff] %v5942_v51  ;;  %v5947_v48 = vld [vmem:[%s7028_s5 + $0x140] sm:$0xff]   ;;  %v443_v41 = vrot.slane %v5740_v27, %v442_v8  ;;  %v5957_v17 = vadd.f32 %v5554_v44, %v435_v53 }
 0x2c2   :  { %4426 = vmatprep.subr.bf16.mxu1 %v5060_v40  ;;  %4454 = vmatprep.subr.bf16.mxu0 %v5905_v38  ;;  %7269 = vst [vmem:[#allocation52_spill] sm:$0xff] %v5947_v48  ;;  %v5954_v40 = vld [vmem:[%s7028_s5 + $0x1c0] sm:$0xff]   ;;  %v1226_v38 = vpop.f32.mrf.mxu0  ;;  %v5973_v8 = vadd.f32 %v5550_v42, %v435_v53  ;;  %v5977_v44 = vadd.f32 %v5735_v25, %v5838_v7 }
 0x2c3   :  { %7270 = vst [vmem:[#allocation53_spill] sm:$0xff] %v5954_v40  ;;  %7271 = vst [vmem:[#allocation54_spill] sm:$0xff] %v5957_v17  ;;  %v5970_v27 = vld [vmem:[%s7028_s5 + $0x100] sm:$0xff]   ;;  %v5993_v42 = vadd.f32 %v5560_v47, %v5827_v31 }
 0x2c4   :  { %7274 = vst [vmem:[#allocation57_spill] sm:$0xff] %v5970_v27  ;;  %7275 = vst [vmem:[#allocation58_spill] sm:$0xff] %v5973_v8  ;;  %v1233_v47 = vmul.f32 %v5830_v4, %v5973_v8 }
 0x2c5   :  { %4427 = vmatpush3.bf16.msra.mxu1 %v5910_v55  ;;  %4455 = vmatpush3.bf16.msra.mxu0 %v5916_v5  ;;  %v5960_v5 = vadd.f32 %v5718_v56, %v443_v41  ;;  %v5964_v55 = vadd.f32 %v5564_v50, %v5827_v31  ;;  %7276 = vst [vmem:[#allocation59_spill] sm:$0xff] %v5977_v44  ;;  %v5986_v50 = vld [vmem:[%s7028_s5 + $0x180] sm:$0xff]   ;;  %7279 = vst [vmem:[#allocation62_spill] sm:$0xff] %v5993_v42 }
 0x2c6   :  { %4428 = vmatprep.subr.bf16.mxu1 %v5921_v45  ;;  %4456 = vmatprep.subr.bf16.mxu0 %v5928_v63  ;;  %v1173_v45 = vpop.f32.mrf.mxu1  ;;  %v1241_v56 = vmul.f32 %v5857_v59, %v5957_v17  ;;  %7277 = vst [vmem:[#allocation60_spill] sm:$0xff] %v5986_v50  ;;  %v1260_v31 = vmul.f32 %v1226_v38, %v5977_v44  ;;  %v1906_v38 = vld [vmem:[%s7035_s12 + $0x8] sm:$0xff] }
 0x2c7   :  { %7272 = vst [vmem:[#allocation55_spill] sm:$0xff] %v5960_v5  ;;  %7273 = vst [vmem:[#allocation56_spill] sm:$0xff] %v5964_v55  ;;  %v1243_v25 = vmul.f32 %v5859_v1, %v5960_v5  ;;  %v1258_v59 = vmul.f32 %v1173_v45, %v5964_v55  ;;  %v1250_v45 = vmul.f32 %v1169_v0, %v5993_v42 }
 0x2c8   :  { %v6029_v0 = vadd.f32 %v5562_v49, %v435_v53  ;;  %v6042_v49 = vadd.f32 %v5722_v9, %v443_v41  ;;  %v702_v9 = vadd.s32 8, %v5727_v15 }
 0x2c9   :  { %4429 = vmatpush3.bf16.msra.mxu1 %v5934_v33  ;;  %4457 = vmatpush3.bf16.msra.mxu0 %v5942_v51  ;;  %v5989_v33 = vadd.f32 %v5714_v61, %v443_v41  ;;  %v1908_v61 = vld [vmem:[%s7035_s12 + $0x18] sm:$0xff]  ;;  %v6007_v51 = vadd.f32 %v5724_v11, %v5838_v7  ;;  %v7282_v11 = vmov 0.0   ;;  %v1274_v4 = vpack.c.bf16 %v1258_v59, %v1250_v45 }
 0x2ca   :  { %4430 = vmatprep.subr.bf16.mxu1 %v5947_v48  ;;  %4458 = vmatprep.subr.bf16.mxu0 %v5954_v40  ;;  %v1907_v48 = vld [vmem:[%s7035_s12 + $0x10] sm:$0xff]  ;;  %v1265_v40 = vpack.c.bf16 %v1241_v56, %v1233_v47  ;;  %7283 = vst [vmem:[#allocation65_spill] sm:$0xff] %v6029_v0  ;;  %v6035_v56 = vadd.f32 %v5558_v46, %v435_v53  ;;  %7287 = vst [vmem:[#allocation69_spill] sm:$0xff] %v6042_v49 }
 0x2cb   :  { %7278 = vst [vmem:[#allocation61_spill] sm:$0xff] %v5989_v33  ;;  %7280 = vst [vmem:[#allocation63_spill] sm:$0xff] %v6007_v51  ;;  %v1235_v1 = vmul.f32 %v5832_v13, %v5989_v33  ;;  %v1252_v55 = vmul.f32 %v1222_v43, %v6007_v51  ;;  %v6018_v5 = vpack.c.bf16 %v1908_v61, %v1907_v48  ;;  %v1905_v13 = vld [vmem:[%s7035_s12] sm:$0xff] }
 0x2cc   :  { %v6032_v48 = vadd.f32 %v5729_v16, %v443_v41  ;;  %7285 = vst [vmem:[#allocation67_spill] sm:$0xff] %v6035_v56  ;;  %v6039_v59 = vpack.c.bf16 %v1906_v38, %v1905_v13  ;;  %v1249_v16 = vmul.f32 %v5889_v35, %v6035_v56  ;;  %v1251_v46 = vmul.f32 %v5891_v52, %v6042_v49  ;;  %v4176_v35 = vld [vmem:[%s7026_s3] ss:$0 sm:$0xff] }
 0x2cd   :  { %4431 = vmatpush3.bf16.msra.mxu1 %v5970_v27  ;;  %4459 = vmatpush3.bf16.msra.mxu0 %v5986_v50  ;;  %7281 = vst [vmem:[#allocation64_spill] sm:$0xff] %v6018_v5  ;;  %v1267_v7 = vpack.c.bf16 %v1243_v25, %v1235_v1  ;;  %v1276_v43 = vpack.c.bf16 %v1260_v31, %v1252_v55 }
 0x2ce   :  { %4792 = vmatprep.subr.bf16.mxu1 %v7282_v11  ;;  %4800 = vmatprep.subr.bf16.mxu0 %v7282_v11  ;;  %7284 = vst [vmem:[#allocation66_spill] sm:$0xff] %v6032_v48  ;;  %v1257_v25 = vmul.f32 %v1171_v2, %v6029_v0  ;;  %7286 = vst [vmem:[#allocation68_spill] sm:$0xff] %v6039_v59  ;;  %v1259_v55 = vmul.f32 %v1224_v54, %v6032_v48 }
 0x2cf   :  { %vm708_vm12 = vcmp.eq.s32.totalorder %v5727_v15, %v4176_v35  ;;  %vm709_vm13 = vcmp.eq.s32.totalorder %v702_v9, %v4176_v35 }
 0x2d0   :  { %1792 = vmatmul.mubr.bf16.vlgmr.msra.gmra.mxu1 %v1265_v40  ;;  %1841 = vmatmul.mubr.bf16.vlgmr.msra.gmra.mxu0 %v1267_v7  ;;  %v1273_v53 = vpack.c.bf16 %v1257_v25, %v1249_v16  ;;  %v1275_v2 = vpack.c.bf16 %v1259_v55, %v1251_v46  ;;  %v4177_v52 = vsel %vm708_vm12, 1.0, %v7282_v11  ;;  %v4178_v54 = vsel %vm709_vm13, 1.0, %v7282_v11 }
 0x2d1   :  { %1799 = vmatprep.mubr.bf16.mxu1 %v1274_v4  ;;  %1848 = vmatprep.mubr.bf16.mxu0 %v1276_v43  ;;  %v6067_v41 = vpack.c.bf16 %v4178_v54, %v4177_v52  ;;  %v716_v40 = vsel %vm715_vm11, %v4177_v52, 0.0  ;;  %v719_v61 = vsel %vm715_vm11, %v4178_v54, 0.0 }
 0x2d2   :  { %4801 = vmatpush3.bf16.msra.mxu0 %v6018_v5  ;;  %717 = vadd.xlane.f32.xlu0 %v716_v40 }
 0x2d3   :  { %4802 = vmatprep.subr.bf16.mxu0 %v7282_v11  ;;  %720 = vadd.xlane.f32.xlu1 %v719_v61 }
 0x2d6   :  { %4803 = vmatpush3.bf16.msra.mxu0 %v6039_v59 }
 0x2d7   :  { %4816 = vmatprep.subr.bf16.mxu0 %v7282_v11 }
 0x2d8   :  { %1800 = vmatmul.mubr.bf16.gmra.mxu1 %v1273_v53  ;;  %1849 = vmatmul.mubr.bf16.gmra.mxu0 %v1275_v2 }
 0x2d9   :  { %4796 = vmatprep.mubr.msk.bf16.mxu1 %vm5255_vm1, %v7282_v11  ;;  %4804 = vmatprep.mubr.msk.bf16.mxu0 %vm5255_vm1, %v7282_v11 }
 0x2e0   :  { %4805 = vmatmul.mubr.msk.bf16.vlgmr.msra.gmra.mxu0 %vm715_vm11, %v5439_v58 }
 0x2e1   :  { %4820 = vmatprep.mubr.msk.bf16.mxu0 %vm5255_vm1, %v7282_v11 }
 0x370   :  { %v4376_v47 = vpop.f32.mrf.mxu1  ;;  %v4404_v31 = vpop.f32.mrf.mxu0 }
 0x372   :  { %v4377_v1 = vpop.f32.mrf.mxu1  ;;  %v4405_v45 = vpop.f32.mrf.mxu0 }
 0x373   :  { %v4378_v17 = vadd.f32 %v4377_v1, %v4376_v47  ;;  %v4406_v63 = vadd.f32 %v4405_v45, %v4404_v31 }
 0x374   :  { %v4379_v7 = vpop.f32.mrf.mxu1  ;;  %v4407_v4 = vpop.f32.mrf.mxu0 }
 0x376   :  { %v4380_v15 = vpop.f32.mrf.mxu1  ;;  %v4408_v13 = vpop.f32.mrf.mxu0 }
 0x377   :  { %v4381_v50 = vadd.f32 %v4380_v15, %v4379_v7  ;;  %v4409_v51 = vadd.f32 %v4408_v13, %v4407_v4  ;;  %v1745_v7 = vadd.f32 %v4406_v63, %v4378_v17  ;;  %v1969_v63 = vld [vmem:[%s7037_s14 + $0x8] sm:$0xff]  ;;  %v4274_v17 = vld [vmem:[%s7037_s14 + $0x20] sm:$0xff] }
 0x378   :  { %v4382_v38 = vpop.f32.mrf.mxu1  ;;  %v4410_v43 = vpop.f32.mrf.mxu0 }
 0x379   :  { %v1748_v39 = vadd.f32 %v4409_v51, %v4381_v50 }
 0x37a   :  { %v4383_v25 = vpop.f32.mrf.mxu1  ;;  %v4411_v55 = vpop.f32.mrf.mxu0 }
 0x37b   :  { %v4384_v48 = vadd.f32 %v4383_v25, %v4382_v38  ;;  %v4412_v5 = vadd.f32 %v4411_v55, %v4410_v43 }
 0x37c   :  { %v4385_v16 = vpop.f32.mrf.mxu1  ;;  %v4413_v46 = vpop.f32.mrf.mxu0 }
 0x37d   :  { %v1753_v29 = vadd.f32 %v4412_v5, %v4384_v48 }
 0x37e   :  { %v4386_v53 = vpop.f32.mrf.mxu1  ;;  %v4414_v2 = vpop.f32.mrf.mxu0 }
 0x37f   :  { %v4387_v42 = vadd.f32 %v4386_v53, %v4385_v16  ;;  %v4415_v33 = vadd.f32 %v4414_v2, %v4413_v46  ;;  %v721_v16 = vpop.xlane.xlu1 %720 }
 0x380   :  { %v723_v46 = vmax.f32 %v721_v16, 1.0 }
 0x381   :  { %v1756_v36 = vadd.f32 %v4415_v33, %v4387_v42 }
 0x390   :  { %v4432_v9 = vpop.f32.mrf.mxu1  ;;  %v4460_v35 = vpop.f32.mrf.mxu0 }
 0x392   :  { %v4433_v52 = vpop.f32.mrf.mxu1  ;;  %v4461_v54 = vpop.f32.mrf.mxu0 }
 0x393   :  { %v4434_v32 = vadd.f32 %v4433_v52, %v4432_v9  ;;  %v4462_v48 = vadd.f32 %v4461_v54, %v4460_v35 }
 0x394   :  { %v4435_v40 = vpop.f32.mrf.mxu1  ;;  %v4463_v61 = vpop.f32.mrf.mxu0 }
 0x396   :  { %v4436_v59 = vpop.f32.mrf.mxu1  ;;  %v4464_v49 = vpop.f32.mrf.mxu0 }
 0x397   :  { %v4437_v60 = vadd.f32 %v4436_v59, %v4435_v40  ;;  %v4465_v47 = vadd.f32 %v4464_v49, %v4463_v61  ;;  %v718_v49 = vpop.xlane.xlu0 %717  ;;  %v6125_v40 = vld [vmem:[%s7036_s13] ss:$0 sm:$0xff] }
 0x398   :  { %v4438_v56 = vpop.f32.mrf.mxu1  ;;  %v4466_v0 = vpop.f32.mrf.mxu0  ;;  %v722_v45 = vmax.f32 %v718_v49, 1.0  ;;  %v4298_v49 = vld [vmem:[%s7038_s15 + $0x48] sm:$0xff] }
 0x399   :  { %v1797_v4 = vadd.f32 %v4437_v60, %v1748_v39  ;;  %v4276_v39 = vld [vmem:[%s7037_s14 + $0x30] sm:$0xff]  ;;  %v4277_v60 = vld [vmem:[%s7037_s14 + $0x38] sm:$0xff] }
 0x39a   :  { %v4439_v27 = vpop.f32.mrf.mxu1  ;;  %v4467_v8 = vpop.f32.mrf.mxu0  ;;  %5072 = vrcp.f32 %v722_v45 }
 0x39b   :  { %v4440_v44 = vadd.f32 %v4439_v27, %v4438_v56  ;;  %v4468_v15 = vadd.f32 %v4467_v8, %v4466_v0  ;;  %v1794_v56 = vadd.f32 %v4434_v32, %v1745_v7  ;;  %v1846_v59 = vadd.f32 %v4465_v47, %v1797_v4  ;;  %v1970_v32 = vld [vmem:[%s7037_s14 + $0x10] sm:$0xff] }
 0x39c   :  { %v4441_v28 = vpop.f32.mrf.mxu1  ;;  %v4469_v57 = vpop.f32.mrf.mxu0  ;;  %5074 = vrcp.f32 %v723_v46  ;;  %v4283_v4 = vld [vmem:[%s7037_s14 + $0x50] sm:$0xff]  ;;  %v7290_v46 = vmov 0  }
 0x39d   :  { %v1802_v38 = vadd.f32 %v4440_v44, %v1753_v29  ;;  %v1843_v33 = vadd.f32 %v4462_v48, %v1794_v56  ;;  %v6091_v29 = vpack.c.bf16 %v4277_v60, %v4276_v39  ;;  %v4275_v44 = vld [vmem:[%s7037_s14 + $0x28] sm:$0xff]  ;;  %v4300_v39 = vld [vmem:[%s7038_s15 + $0x58] sm:$0xff] }
 0x39e   :  { %v4442_v37 = vpop.f32.mrf.mxu1  ;;  %v4470_v25 = vpop.f32.mrf.mxu0  ;;  %v6111_v0 = vpack.c.bf16 %v4275_v44, %v4274_v17  ;;  %v4291_v17 = vld [vmem:[%s7038_s15 + $0x28] sm:$0xff]  ;;  %v4297_v44 = vld [vmem:[%s7038_s15 + $0x40] sm:$0xff] }
 0x39f   :  { %v4443_v43 = vadd.f32 %v4442_v37, %v4441_v28  ;;  %v4471_v55 = vadd.f32 %v4470_v25, %v4469_v57  ;;  %v1851_v31 = vadd.f32 %v4468_v15, %v1802_v38  ;;  %v1857_v37 = vpack.c.bf16 %v1846_v59, %v1843_v33  ;;  %7288 = vst [vmem:[#allocation70_spill] sm:$0xff] %v6091_v29  ;;  %v1968_v28 = vld [vmem:[%s7037_s14] sm:$0xff]  ;;  %v4282_v59 = vld [vmem:[%s7037_s14 + $0x48] sm:$0xff] }
 0x3a0   :  { %v1948_v27 = vpop.f32.mrf.mxu0  ;;  %4817 = vmatpush3.bf16.msra.mxu0 %v6091_v29  ;;  %v6106_v8 = vpack.c.bf16 %v1969_v63, %v1968_v28  ;;  %7289 = vst [vmem:[#allocation71_spill] sm:$0xff] %v6111_v0  ;;  %v4290_v63 = vld [vmem:[%s7038_s15 + $0x20] sm:$0xff]  ;;  %v6211_v16 = vpack.c.bf16 %v4298_v49, %v4297_v44 }
 0x3a1   :  { %v1805_v13 = vadd.f32 %v4443_v43, %v1756_v36  ;;  %v1971_v36 = vld [vmem:[%s7037_s14 + $0x18] sm:$0xff]  ;;  %4818 = vmatprep.subr.bf16.mxu0 %v7282_v11  ;;  %v6209_v45 = vpack.c.bf16 %v4291_v17, %v4290_v63 }
 0x3a2   :  { %v4806_v5 = vpop.f32.mrf.mxu0  ;;  %v6086_v57 = vpack.c.bf16 %v1971_v36, %v1970_v32  ;;  %v4293_v32 = vld [vmem:[%s7038_s15 + $0x38] sm:$0xff]  ;;  %v4299_v36 = vld [vmem:[%s7038_s15 + $0x50] sm:$0xff] }
 0x3a3   :  { %v1854_v1 = vadd.f32 %v4471_v55, %v1805_v13  ;;  %v4284_v13 = vld [vmem:[%s7037_s14 + $0x58] sm:$0xff]  ;;  %v2140_v55 = vld [vmem:[%s7038_s15 + $0x10] sm:$0xff]  ;;  %v4281_v5 = vld [vmem:[%s7037_s14 + $0x40] sm:$0xff]  ;;  %v6188_v28 = vpack.c.bf16 %v4300_v39, %v4299_v36 }
 0x3a4   :  { %v1951_v50 = vpop.f32.mrf.mxu0  ;;  %4819 = vmatpush3.bf16.msra.mxu0 %v6111_v0  ;;  %v6162_v33 = vpack.c.bf16 %v4282_v59, %v4281_v5  ;;  %v6255_v39 = vld [vmem:[%s7040_s17 + $0x1] ss:$0 sm:$0xff] }
 0x3a5   :  { %v1858_v51 = vpack.c.bf16 %v1854_v1, %v1851_v31  ;;  %4832 = vmatprep.subr.bf16.mxu0 %v7282_v11  ;;  %v6142_v31 = vpack.c.bf16 %v4284_v13, %v4283_v4  ;;  %7294 = vst [vmem:[#allocation75_spill] sm:$0xff] %v6255_v39 }
 0x3a6   :  { %v4807_v42 = vpop.f32.mrf.mxu0 }
 0x3a7   :  { %4793 = vmatpush3.bf16.msra.mxu1 %v1858_v51  ;;  %v6117_v53 = vpop.eup %5072  ;;  %v2138_v51 = vld [vmem:[%s7038_s15] sm:$0xff] }
 0x3a8   :  { %4794 = vmatprep.subr.bf16.mxu1 %v7282_v11 }
 0x3a9   :  { %v6120_v35 = vpop.eup %5074 }
 0x3ab   :  { %4795 = vmatpush3.bf16.msra.mxu1 %v1857_v37  ;;  %v4292_v37 = vld [vmem:[%s7038_s15 + $0x30] sm:$0xff] }
 0x3ac   :  { %4808 = vmatprep.subr.bf16.mxu1 %v7282_v11  ;;  %v6186_v60 = vpack.c.bf16 %v4293_v32, %v4292_v37  ;;  %v6250_v37 = vld [vmem:[%s7039_s16 + $0x1] ss:$0 sm:$0xff] }
 0x3ad   :  { %7293 = vst [vmem:[#allocation74_spill] sm:$0xff] %v6250_v37 }
 0x3ae   :  { %4797 = vmatmul.mubr.msk.bf16.vlgmr.msra.gmra.mxu1 %vm715_vm11, %v6067_v41 }
 0x3af   :  { %4812 = vmatprep.mubr.msk.bf16.mxu1 %vm5255_vm1, %v7282_v11  ;;  %4809 = vmatpush3.bf16.msra.mxu1 %v6086_v57 }
 0x3b0   :  { %4810 = vmatprep.subr.bf16.mxu1 %v7282_v11 }
 0x3b3   :  { %4811 = vmatpush3.bf16.msra.mxu1 %v6106_v8 }
 0x3b4   :  { %4824 = vmatprep.subr.bf16.mxu1 %v7282_v11 }
 0x46e   :  { %v1896_v2 = vpop.f32.mrf.mxu1 }
 0x46f   :  { %v1903_v9 = vmul.f32 %v6117_v53, %v1896_v2 }
 0x470   :  { %v4798_v52 = vpop.f32.mrf.mxu1 }
 0x471   :  { %v1955_v54 = vadd.f32 %v1948_v27, %v1903_v9  ;;  %v2141_v27 = vld [vmem:[%s7038_s15 + $0x18] sm:$0xff] }
 0x472   :  { %v1899_v61 = vpop.f32.mrf.mxu1  ;;  %v6144_v1 = vpack.c.bf16 %v2141_v27, %v2140_v55 }
 0x473   :  { %v1904_v38 = vmul.f32 %v6120_v35, %v1899_v61  ;;  %v1964_v25 = vadd.f32 %v6125_v40, %v1955_v54 }
 0x474   :  { %v4799_v43 = vpop.f32.mrf.mxu1 }
 0x475   :  { %v1956_v7 = vadd.f32 %v1951_v50, %v1904_v38  ;;  %v1966_v56 = vmax.f32 %v1964_v25, 0.0  ;;  %v2139_v50 = vld [vmem:[%s7038_s15 + $0x8] sm:$0xff] }
 0x476   :  { %v6164_v42 = vpack.c.bf16 %v2139_v50, %v2138_v51 }
 0x477   :  { %v1965_v15 = vadd.f32 %v6125_v40, %v1956_v7  ;;  %v6241_v7 = vld [vmem:[%s7040_s17] ss:$0 sm:$0xff] }
 0x478   :  { %7292 = vst [vmem:[#allocation73_spill] sm:$0xff] %v6241_v7 }
 0x479   :  { %v1967_v47 = vmax.f32 %v1965_v15, 0.0 }
 0x47b   :  { %v1972_v48 = vpack.c.bf16 %v1967_v47, %v1966_v56 }
 0x47d   :  { %4813 = vmatmul.mubr.msk.bf16.vlgmr.msra.gmra.mxu1 %vm715_vm11, %v1972_v48  ;;  %4821 = vmatmul.mubr.msk.bf16.vlgmr.msra.gmra.mxu0 %vm715_vm11, %v1972_v48 }
 0x47e   :  { %4825 = vmatpush3.bf16.msra.mxu1 %v6142_v31  ;;  %4833 = vmatpush3.bf16.msra.mxu0 %v6144_v1 }
 0x47f   :  { %4826 = vmatprep.subr.bf16.mxu1 %v7282_v11  ;;  %4834 = vmatprep.subr.bf16.mxu0 %v7282_v11 }
 0x480   :  { %4828 = vmatprep.mubr.msk.bf16.mxu1 %vm5255_vm1, %v7282_v11  ;;  %4836 = vmatprep.mubr.msk.bf16.mxu0 %vm5255_vm1, %v7282_v11 }
 0x482   :  { %4827 = vmatpush3.bf16.msra.mxu1 %v6162_v33  ;;  %4835 = vmatpush3.bf16.msra.mxu0 %v6164_v42 }
 0x483   :  { %4840 = vmatprep.subr.bf16.mxu1 %v7282_v11  ;;  %4848 = vmatprep.subr.bf16.mxu0 %v7282_v11 }
 0x485   :  { %4829 = vmatmul.mubr.msk.bf16.vlgmr.msra.gmra.mxu1 %vm715_vm11, %v1972_v48  ;;  %4837 = vmatmul.mubr.msk.bf16.vlgmr.msra.gmra.mxu0 %vm715_vm11, %v5439_v58 }
 0x486   :  { %4841 = vmatpush3.bf16.msra.mxu1 %v6186_v60  ;;  %4849 = vmatpush3.bf16.msra.mxu0 %v6188_v28 }
 0x487   :  { %4842 = vmatprep.subr.bf16.mxu1 %v7282_v11  ;;  %4850 = vmatprep.subr.bf16.mxu0 %v7282_v11 }
 0x488   :  { %4844 = vmatprep.mubr.msk.bf16.mxu1 %vm5255_vm1, %v7282_v11  ;;  %4852 = vmatprep.mubr.msk.bf16.mxu0 %vm5255_vm1, %v7282_v11 }
 0x48a   :  { %4843 = vmatpush3.bf16.msra.mxu1 %v6209_v45  ;;  %4851 = vmatpush3.bf16.msra.mxu0 %v6211_v16 }
 0x48b   :  { %2416 = vmatprep.subr.bf16.mxu0 %v5473_v10 }
 0x48d   :  { %4845 = vmatmul.mubr.msk.bf16.vlgmr.msra.gmra.mxu1 %vm715_vm11, %v5439_v58  ;;  %4853 = vmatmul.mubr.msk.bf16.vlgmr.msra.gmra.mxu0 %vm715_vm11, %v5439_v58  ;;  %v6236_v58 = vld [vmem:[%s7039_s16] ss:$0 sm:$0xff] }
 0x48e   :  { %4858 = vmatprep.mubr.msk.bf16.mxu1 %vm873_vm8, %v5450_v3  ;;  %2417 = vmatpush1.bf16.msra.mxu0 %v5478_v12  ;;  %7291 = vst [vmem:[#allocation72_spill] sm:$0xff] %v6236_v58 }
 0x48f   :  { %2418 = vmatprep.subr.bf16.mxu0 %v5497_v18  ;;  %2436 = vmatprep.mubr.bf16.mxu0 %v7290_v46 }
 0x492   :  { %2419 = vmatpush1.bf16.msra.mxu0 %v5502_v20 }
 0x493   :  { %2522 = vmatprep.subr.bf16.mxu0 %v5521_v26 }
 0x53d   :  { %v2019_v2 = vpop.f32.mrf.mxu1  ;;  %v2075_v9 = vpop.f32.mrf.mxu0 }
 0x53e   :  { %v2020_v13 = vadd.f32 %v6236_v58, %v2019_v2  ;;  %v2076_v49 = vadd.f32 %v6250_v37, %v2075_v9 }
 0x53f   :  { %v4814_v52 = vpop.f32.mrf.mxu1  ;;  %v4822_v54 = vpop.f32.mrf.mxu0 }
 0x541   :  { %v2022_v61 = vpop.f32.mrf.mxu1  ;;  %v2078_v38 = vpop.f32.mrf.mxu0 }
 0x542   :  { %v2023_v59 = vadd.f32 %v6236_v58, %v2022_v61 }
 0x543   :  { %v4815_v43 = vpop.f32.mrf.mxu1  ;;  %v4823_v25 = vpop.f32.mrf.mxu0 }
 0x545   :  { %v2131_v4 = vpop.f32.mrf.mxu1  ;;  %v2185_v15 = vpop.f32.mrf.mxu0 }
 0x546   :  { %v2186_v55 = vadd.f32 %v6241_v7, %v2185_v15 }
 0x547   :  { %v4830_v27 = vpop.f32.mrf.mxu1  ;;  %v4838_v56 = vpop.f32.mrf.mxu0 }
 0x548   :  { %v2304_v47 = vadd.f32 %v2186_v55, %v2020_v13  ;;  %v2079_v13 = vadd.f32 %v6250_v37, %v2078_v38  ;;  %v6264_v38 = vld [vmem:[%s7040_s17 + $0x2] ss:$0 sm:$0xff] }
 0x549   :  { %v2134_v5 = vpop.f32.mrf.mxu1  ;;  %v2188_v48 = vpop.f32.mrf.mxu0  ;;  %7295 = vst [vmem:[#allocation76_spill] sm:$0xff] %v6264_v38 }
 0x54a   :  { %v4304_v51 = vmul.f32 -1.442695, %v2304_v47  ;;  %v2189_v50 = vadd.f32 %v6241_v7, %v2188_v48 }
 0x54b   :  { %v4831_v32 = vpop.f32.mrf.mxu1  ;;  %v4839_v36 = vpop.f32.mrf.mxu0 }
 0x54c   :  { %5076 = vpow2.f32 %v4304_v51  ;;  %v2305_v63 = vadd.f32 %v2189_v50, %v2023_v59 }
 0x54d   :  { %v2241_v17 = vpop.f32.mrf.mxu1  ;;  %v2297_v44 = vpop.f32.mrf.mxu0 }
 0x54e   :  { %v4305_v2 = vmul.f32 -1.442695, %v2305_v63  ;;  %v2242_v52 = vadd.f32 %v6255_v39, %v2241_v17  ;;  %v6269_v17 = vld [vmem:[%s7039_s16 + $0x2] ss:$0 sm:$0xff] }
 0x54f   :  { %v4846_v54 = vpop.f32.mrf.mxu1  ;;  %v4854_v61 = vpop.f32.mrf.mxu0  ;;  %7296 = vst [vmem:[#allocation77_spill] sm:$0xff] %v6269_v17 }
 0x550   :  { %5078 = vpow2.f32 %v4305_v2  ;;  %v2318_v43 = vadd.f32 %v2242_v52, %v2076_v49  ;;  %v2298_v2 = vadd.f32 %v6264_v38, %v2297_v44  ;;  %v2132_v61 = vadd.f32 %v6269_v17, %v2131_v4 }
 0x551   :  { %v2244_v25 = vpop.f32.mrf.mxu1  ;;  %v2300_v15 = vpop.f32.mrf.mxu0 }
 0x552   :  { %v2245_v55 = vadd.f32 %v6255_v39, %v2244_v25  ;;  %v4306_v47 = vmul.f32 -1.442695, %v2318_v43 }
 0x553   :  { %v4847_v27 = vpop.f32.mrf.mxu1  ;;  %v4855_v56 = vpop.f32.mrf.mxu0 }
 0x554   :  { %v2319_v48 = vadd.f32 %v2245_v55, %v2079_v13  ;;  %5080 = vpow2.f32 %v4306_v47  ;;  %v2301_v13 = vadd.f32 %v6264_v38, %v2300_v15  ;;  %v2135_v27 = vadd.f32 %v6269_v17, %v2134_v5  ;;  %v7299_v15 = vld [vmem:[#allocation9_spill] sm:$0xff] }
 0x556   :  { %v4307_v59 = vmul.f32 -1.442695, %v2319_v48 }
 0x558   :  { %5082 = vpow2.f32 %v4307_v59 }
 0x559   :  { %v5077_v9 = vpop.eup %5076 }
 0x55a   :  { %v2312_v51 = vadd.f32 1.0, %v5077_v9 }
 0x55c   :  { %5084 = vrcp.f32 %v2312_v51 }
 0x55d   :  { %v5079_v50 = vpop.eup %5078 }
 0x55e   :  { %v2313_v32 = vadd.f32 1.0, %v5079_v50 }
 0x560   :  { %5086 = vrcp.f32 %v2313_v32 }
 0x561   :  { %v5081_v36 = vpop.eup %5080 }
 0x562   :  { %v2326_v49 = vadd.f32 1.0, %v5081_v36  ;;  %v7297_v36 = vld [vmem:[#allocation8_spill] sm:$0xff] }
 0x564   :  { %5088 = vrcp.f32 %v2326_v49 }
 0x565   :  { %v5083_v63 = vpop.eup %5082 }
 0x566   :  { %v2327_v54 = vadd.f32 1.0, %v5083_v63  ;;  %v7298_v63 = vmax.f32 %v7297_v36, 0.0 }
 0x568   :  { %5090 = vrcp.f32 %v2327_v54 }
 0x569   :  { %v5085_v52 = vpop.eup %5084 }
 0x56a   :  { %v2332_v43 = vmul.f32 %v5085_v52, %v2298_v2  ;;  %v7300_v2 = vmax.f32 %v7299_v15, 0.0  ;;  %v6310_v15 = vld [vmem:[%s7028_s5 + $0x78] sm:$0xff]  }
 0x56b   :  { %7315 = vst [vmem:[#allocation78_spill] sm:$0xff] %v6310_v15 }
 0x56c   :  { %v2334_v25 = vadd.f32 %v2332_v43, %v2132_v61  ;;  %v7303_v43 = vld [vmem:[#allocation12_spill] sm:$0xff] }
 0x56d   :  { %v5087_v55 = vpop.eup %5086 }
 0x56e   :  { %5092 = vtanh.f32 %v2334_v25  ;;  %v2333_v56 = vmul.f32 %v5087_v55, %v2301_v13  ;;  %v7304_v25 = vld [vmem:[#allocation10_spill] sm:$0xff]  ;;  %v7305_v13 = vld [vmem:[#allocation11_spill] sm:$0xff]  ;;  %v7306_v55 = vld [vmem:[#allocation16_spill] sm:$0xff] }
 0x570   :  { %v2335_v47 = vadd.f32 %v2333_v56, %v2135_v27  ;;  %v7307_v27 = vld [vmem:[#allocation15_spill] sm:$0xff]  ;;  %v7308_v56 = vld [vmem:[#allocation20_spill] sm:$0xff] }
 0x571   :  { %v5089_v48 = vpop.eup %5088 }
 0x572   :  { %5094 = vtanh.f32 %v2335_v47  ;;  %v2338_v9 = vsub.f32 1.0, %v5089_v48  ;;  %v2342_v49 = vmul.f32 %v5089_v48, %v7298_v63  ;;  %v7313_v63 = vld [vmem:[#allocation23_spill] sm:$0xff] }
 0x575   :  { %v5091_v59 = vpop.eup %5090 }
 0x576   :  { %v2339_v50 = vsub.f32 1.0, %v5091_v59  ;;  %v2343_v52 = vmul.f32 %v5091_v59, %v7300_v2  ;;  %v6316_v2 = vld [vmem:[%s7028_s5 + $0xf8] sm:$0xff]  }
 0x577   :  { %7316 = vst [vmem:[#allocation79_spill] sm:$0xff] %v6316_v2 }
 0x57b   :  { %v5093_v44 = vpop.eup %5092 }
 0x57c   :  { %v2340_v51 = vmul.f32 %v5093_v44, %v2338_v9 }
 0x57e   :  { %v6279_v54 = vadd.f32 %v2342_v49, %v2340_v51  ;;  %v7309_v51 = vld [vmem:[#allocation18_spill] sm:$0xff]  ;;  %v7314_v49 = vld [vmem:[#allocation24_spill] sm:$0xff] }
 0x57f   :  { %v5095_v4 = vpop.eup %5094 }
 0x580   :  { %v2341_v32 = vmul.f32 %v5095_v4, %v2339_v50  ;;  %7301 = vst [vmem:[#allocation8_spill] sm:$0xff] %v6279_v54  ;;  %v7310_v50 = vld [vmem:[#allocation19_spill] sm:$0xff]  ;;  %v7311_v4 = vld [vmem:[#allocation21_spill] sm:$0xff] }
 0x582   :  { %v6281_v5 = vadd.f32 %v2343_v52, %v2341_v32  ;;  %v7312_v32 = vld [vmem:[#allocation22_spill] sm:$0xff]  ;;  %v6330_v52 = vld [vmem:[%s7028_s5 + $0x38] sm:$0xff]  }
 0x583   :  { %7317 = vst [vmem:[#allocation80_spill] sm:$0xff] %v6330_v52 }
 0x584   :  { %7302 = vst [vmem:[#allocation9_spill] sm:$0xff] %v6281_v5  ;;  %v6285_v61 = vpack.c.bf16 %v6281_v5, %v6279_v54 }
 0x586   :  { %4856 = vmatprep.subr.bf16.mxu1 %v6285_v61 }
 0x587   :  { %4857 = vmatpush3.bf16.msra.mxu1 %v6285_v61 }
 0x588   :  { %2469 = vmatprep.subr.bf16.mxu1 %v7303_v43 }
 0x58a   :  { %4859 = vmatmul.mubr.msk.bf16.vlgmr.msra.gmra.mxu1 %vm873_vm8, %v7304_v25 }
 0x58b   :  { %2470 = vmatpush1.bf16.msra.mxu1 %v7305_v13  ;;  %2489 = vmatprep.mubr.bf16.mxu1 %v7290_v46 }
 0x58c   :  { %2471 = vmatprep.subr.bf16.mxu1 %v7306_v55 }
 0x58f   :  { %2472 = vmatpush1.bf16.msra.mxu1 %v7307_v27 }
 0x590   :  { %2575 = vmatprep.subr.bf16.mxu1 %v7308_v56 }
 0x64a   :  { %v4860_v47 = vpop.f32.mrf.mxu1 }
 0x64c   :  { %v2381_v48 = vpop.f32.mrf.mxu1 }
 0x64e   :  { %v4861_v59 = vpop.f32.mrf.mxu1 }
 0x64f   :  { %v2397_v36 = vpack.c.bf16 %v4861_v59, %v4860_v47  ;;  %v6336_v47 = vld [vmem:[%s7028_s5 + $0xb8] sm:$0xff]   ;;  %v6348_v59 = vld [vmem:[%s7028_s5 + $0xf0] sm:$0xff]  }
 0x650   :  { %v2384_v44 = vpop.f32.mrf.mxu1  ;;  %7318 = vst [vmem:[#allocation81_spill] sm:$0xff] %v6336_v47  ;;  %7320 = vst [vmem:[#allocation83_spill] sm:$0xff] %v6348_v59 }
 0x651   :  { %v2396_v9 = vpack.c.bf16 %v2384_v44, %v2381_v48  ;;  %v6342_v48 = vld [vmem:[%s7028_s5 + $0x70] sm:$0xff]  }
 0x652   :  { %7319 = vst [vmem:[#allocation82_spill] sm:$0xff] %v6342_v48  ;;  %v6354_v44 = vld [vmem:[%s7028_s5 + $0x30] sm:$0xff]  }
 0x653   :  { %4310 = vmatmul.mubr.msk.bf16.vlgmr.msra.gmra.mxu0 %vm715_vm11, %v2396_v9  ;;  %4312 = vmatmul.mubr.msk.bf16.vlgmr.msra.gmra.mxu1 %vm715_vm11, %v2396_v9  ;;  %7321 = vst [vmem:[#allocation84_spill] sm:$0xff] %v6354_v44 }
 0x654   :  { %2446 = vmatprep.mubr.bf16.mxu0 %v7290_v46  ;;  %2499 = vmatprep.mubr.bf16.mxu1 %v7290_v46 }
 0x655   :  { %2523 = vmatpush1.bf16.msra.mxu0 %v7309_v51  ;;  %2576 = vmatpush1.bf16.msra.mxu1 %v7310_v50  ;;  %v7349_v50 = vld [vmem:[#allocation29_spill] sm:$0xff] }
 0x656   :  { %2524 = vmatprep.subr.bf16.mxu0 %v7311_v4  ;;  %2577 = vmatprep.subr.bf16.mxu1 %v7312_v32 }
 0x659   :  { %2525 = vmatpush1.bf16.msra.mxu0 %v7313_v63  ;;  %2578 = vmatpush1.bf16.msra.mxu1 %v7314_v49 }
 0x65a   :  { %4499 = vmatprep.subr.bf16.mxu0 %v6310_v15  ;;  %4527 = vmatprep.subr.bf16.mxu1 %v6316_v2 }
 0x65b   :  { %4311 = vmatmul.mubr.msk.bf16.gmra.mxu0 %vm715_vm11, %v2397_v36  ;;  %4313 = vmatmul.mubr.msk.bf16.gmra.mxu1 %vm715_vm11, %v2397_v36 }
 0x65c   :  { %2542 = vmatprep.mubr.bf16.mxu0 %v7290_v46  ;;  %2595 = vmatprep.mubr.bf16.mxu1 %v7290_v46 }
 0x663   :  { %4314 = vmatmul.mubr.msk.bf16.vlgmr.msra.gmra.mxu0 %vm715_vm11, %v2396_v9  ;;  %4316 = vmatmul.mubr.msk.bf16.vlgmr.msra.gmra.mxu1 %vm715_vm11, %v2396_v9  ;;  %v6360_v9 = vld [vmem:[%s7028_s5 + $0xb0] sm:$0xff]  }
 0x664   :  { %2552 = vmatprep.mubr.bf16.mxu0 %v7290_v46  ;;  %2605 = vmatprep.mubr.bf16.mxu1 %v7290_v46  ;;  %7322 = vst [vmem:[#allocation85_spill] sm:$0xff] %v6360_v9 }
 0x665   :  { %4500 = vmatpush3.bf16.msra.mxu0 %v6330_v52  ;;  %4528 = vmatpush3.bf16.msra.mxu1 %v6336_v47 }
 0x666   :  { %4501 = vmatprep.subr.bf16.mxu0 %v6342_v48  ;;  %4529 = vmatprep.subr.bf16.mxu1 %v6348_v59  ;;  %v6366_v48 = vld [vmem:[%s7028_s5 + $0x68] sm:$0xff]  }
 0x667   :  { %7323 = vst [vmem:[#allocation86_spill] sm:$0xff] %v6366_v48  ;;  %v6372_v59 = vld [vmem:[%s7028_s5 + $0xe8] sm:$0xff]  }
 0x668   :  { %7324 = vst [vmem:[#allocation87_spill] sm:$0xff] %v6372_v59 }
 0x669   :  { %4502 = vmatpush3.bf16.msra.mxu0 %v6354_v44  ;;  %4530 = vmatpush3.bf16.msra.mxu1 %v6360_v9  ;;  %v6380_v9 = vld [vmem:[%s7028_s5 + $0x28] sm:$0xff]  }
 0x66a   :  { %4503 = vmatprep.subr.bf16.mxu0 %v6366_v48  ;;  %4531 = vmatprep.subr.bf16.mxu1 %v6372_v59  ;;  %7325 = vst [vmem:[#allocation88_spill] sm:$0xff] %v6380_v9  ;;  %v6386_v48 = vld [vmem:[%s7028_s5 + $0xa8] sm:$0xff]   ;;  %v6392_v59 = vld [vmem:[%s7028_s5 + $0x60] sm:$0xff]  }
 0x66b   :  { %4315 = vmatmul.mubr.msk.bf16.gmra.mxu0 %vm715_vm11, %v2397_v36  ;;  %4317 = vmatmul.mubr.msk.bf16.gmra.mxu1 %vm715_vm11, %v2397_v36  ;;  %7326 = vst [vmem:[#allocation89_spill] sm:$0xff] %v6386_v48  ;;  %7327 = vst [vmem:[#allocation90_spill] sm:$0xff] %v6392_v59  ;;  %v6398_v36 = vld [vmem:[%s7028_s5 + $0xe0] sm:$0xff]  }
 0x66c   :  { %7328 = vst [vmem:[#allocation91_spill] sm:$0xff] %v6398_v36 }
 0x66d   :  { %4504 = vmatpush3.bf16.msra.mxu0 %v6380_v9  ;;  %4532 = vmatpush3.bf16.msra.mxu1 %v6386_v48  ;;  %v6404_v9 = vld [vmem:[%s7028_s5 + $0x20] sm:$0xff]  }
 0x66e   :  { %4505 = vmatprep.subr.bf16.mxu0 %v6392_v59  ;;  %4533 = vmatprep.subr.bf16.mxu1 %v6398_v36  ;;  %7329 = vst [vmem:[#allocation92_spill] sm:$0xff] %v6404_v9  ;;  %v6410_v48 = vld [vmem:[%s7028_s5 + $0xa0] sm:$0xff]   ;;  %v6416_v59 = vld [vmem:[%s7028_s5 + $0x58] sm:$0xff]  }
 0x66f   :  { %7330 = vst [vmem:[#allocation93_spill] sm:$0xff] %v6410_v48  ;;  %7331 = vst [vmem:[#allocation94_spill] sm:$0xff] %v6416_v59  ;;  %v6422_v36 = vld [vmem:[%s7028_s5 + $0xd8] sm:$0xff]  }
 0x670   :  { %7332 = vst [vmem:[#allocation95_spill] sm:$0xff] %v6422_v36 }
 0x671   :  { %4506 = vmatpush3.bf16.msra.mxu0 %v6404_v9  ;;  %4534 = vmatpush3.bf16.msra.mxu1 %v6410_v48  ;;  %v6428_v9 = vld [vmem:[%s7028_s5 + $0x18] sm:$0xff]  }
 0x672   :  { %4507 = vmatprep.subr.bf16.mxu0 %v6416_v59  ;;  %4535 = vmatprep.subr.bf16.mxu1 %v6422_v36  ;;  %7333 = vst [vmem:[#allocation96_spill] sm:$0xff] %v6428_v9  ;;  %v6434_v48 = vld [vmem:[%s7028_s5 + $0x98] sm:$0xff]   ;;  %v6440_v59 = vld [vmem:[%s7028_s5 + $0x50] sm:$0xff]  }
 0x673   :  { %7334 = vst [vmem:[#allocation97_spill] sm:$0xff] %v6434_v48  ;;  %7335 = vst [vmem:[#allocation98_spill] sm:$0xff] %v6440_v59  ;;  %v6446_v36 = vld [vmem:[%s7028_s5 + $0xd0] sm:$0xff]  }
 0x674   :  { %7336 = vst [vmem:[#allocation99_spill] sm:$0xff] %v6446_v36 }
 0x675   :  { %4508 = vmatpush3.bf16.msra.mxu0 %v6428_v9  ;;  %4536 = vmatpush3.bf16.msra.mxu1 %v6434_v48  ;;  %v6452_v9 = vld [vmem:[%s7028_s5 + $0x10] sm:$0xff]  }
 0x676   :  { %4509 = vmatprep.subr.bf16.mxu0 %v6440_v59  ;;  %4537 = vmatprep.subr.bf16.mxu1 %v6446_v36  ;;  %7337 = vst [vmem:[#allocation100_spill] sm:$0xff] %v6452_v9  ;;  %v6458_v48 = vld [vmem:[%s7028_s5 + $0x90] sm:$0xff]   ;;  %v6464_v59 = vld [vmem:[%s7028_s5 + $0x48] sm:$0xff]  }
 0x677   :  { %7338 = vst [vmem:[#allocation101_spill] sm:$0xff] %v6458_v48  ;;  %7339 = vst [vmem:[#allocation102_spill] sm:$0xff] %v6464_v59  ;;  %v6470_v36 = vld [vmem:[%s7028_s5 + $0xc8] sm:$0xff]  }
 0x678   :  { %7340 = vst [vmem:[#allocation103_spill] sm:$0xff] %v6470_v36 }
 0x679   :  { %4510 = vmatpush3.bf16.msra.mxu0 %v6452_v9  ;;  %4538 = vmatpush3.bf16.msra.mxu1 %v6458_v48  ;;  %v6476_v9 = vld [vmem:[%s7028_s5 + $0x8] sm:$0xff]  }
 0x67a   :  { %4511 = vmatprep.subr.bf16.mxu0 %v6464_v59  ;;  %4539 = vmatprep.subr.bf16.mxu1 %v6470_v36  ;;  %7341 = vst [vmem:[#allocation104_spill] sm:$0xff] %v6476_v9  ;;  %v6482_v48 = vld [vmem:[%s7028_s5 + $0x88] sm:$0xff]   ;;  %v6488_v59 = vld [vmem:[%s7028_s5 + $0x40] sm:$0xff]  }
 0x67b   :  { %7342 = vst [vmem:[#allocation105_spill] sm:$0xff] %v6482_v48  ;;  %7343 = vst [vmem:[#allocation106_spill] sm:$0xff] %v6488_v59  ;;  %v6494_v36 = vld [vmem:[%s7028_s5 + $0xc0] sm:$0xff]  }
 0x67c   :  { %7344 = vst [vmem:[#allocation107_spill] sm:$0xff] %v6494_v36 }
 0x67d   :  { %4512 = vmatpush3.bf16.msra.mxu0 %v6476_v9  ;;  %4540 = vmatpush3.bf16.msra.mxu1 %v6482_v48  ;;  %v6500_v9 = vld [vmem:[%s7028_s5] sm:$0xff]  }
 0x67e   :  { %4513 = vmatprep.subr.bf16.mxu0 %v6488_v59  ;;  %4541 = vmatprep.subr.bf16.mxu1 %v6494_v36  ;;  %7345 = vst [vmem:[#allocation108_spill] sm:$0xff] %v6500_v9  ;;  %v6506_v48 = vld [vmem:[%s7028_s5 + $0x80] sm:$0xff]   ;;  %v6512_v59 = vld [vmem:[%s7028_s5 + $0x178] sm:$0xff]  }
 0x67f   :  { %7346 = vst [vmem:[#allocation109_spill] sm:$0xff] %v6506_v48  ;;  %7347 = vst [vmem:[#allocation110_spill] sm:$0xff] %v6512_v59  ;;  %v6518_v36 = vld [vmem:[%s7028_s5 + $0x1f8] sm:$0xff]  }
 0x680   :  { %7348 = vst [vmem:[#allocation111_spill] sm:$0xff] %v6518_v36 }
 0x681   :  { %4514 = vmatpush3.bf16.msra.mxu0 %v6500_v9  ;;  %4542 = vmatpush3.bf16.msra.mxu1 %v6506_v48 }
 0x682   :  { %4555 = vmatprep.subr.bf16.mxu0 %v6512_v59  ;;  %4583 = vmatprep.subr.bf16.mxu1 %v6518_v36 }
 0x713   :  { %v2438_v9 = vpop.f32.mrf.mxu0  ;;  %v2491_v44 = vpop.f32.mrf.mxu1 }
 0x714   :  { %v2616_v56 = vmul.f32 %v2438_v9, %v5762_v23  ;;  %v2618_v27 = vmul.f32 %v2491_v44, %v5764_v24  ;;  %v7356_v9 = vld [vmem:[#allocation39_spill] sm:$0xff]  ;;  %v7392_v23 = vld [vmem:[#allocation61_spill] sm:$0xff] }
 0x715   :  { %v2440_v47 = vpop.f32.mrf.mxu0  ;;  %v2493_v52 = vpop.f32.mrf.mxu1 }
 0x716   :  { %v2617_v59 = vmul.f32 %v2440_v47, %v5752_v21  ;;  %v2619_v4 = vmul.f32 %v2493_v52, %v5754_v22 }
 0x717   :  { %v2442_v2 = vpop.f32.mrf.mxu0  ;;  %v2495_v48 = vpop.f32.mrf.mxu1 }
 0x718   :  { %v2624_v15 = vmul.f32 %v2442_v2, %v5747_v62  ;;  %v2626_v49 = vmul.f32 %v2495_v48, %v5749_v30 }
 0x719   :  { %v2444_v63 = vpop.f32.mrf.mxu0  ;;  %v2497_v32 = vpop.f32.mrf.mxu1 }
 0x71a   :  { %v2625_v51 = vmul.f32 %v2444_v63, %v7349_v50  ;;  %v2627_v36 = vmul.f32 %v2497_v32, %v5759_v19  ;;  %v2648_v62 = vpack.c.bf16 %v2624_v15, %v2616_v56  ;;  %v2650_v48 = vpack.c.bf16 %v2626_v49, %v2618_v27  ;;  %v6532_v32 = vld [vmem:[%s7028_s5 + $0x138] sm:$0xff]   ;;  %v6552_v63 = vld [vmem:[%s7028_s5 + $0x1f0] sm:$0xff]   ;;  %v7393_v19 = vld [vmem:[#allocation62_spill] sm:$0xff] }
 0x71b   :  { %v2448_v55 = vpop.f32.mrf.mxu0  ;;  %v2501_v13 = vpop.f32.mrf.mxu1  ;;  %7350 = vst [vmem:[#allocation112_spill] sm:$0xff] %v6532_v32  ;;  %v6538_v56 = vld [vmem:[%s7028_s5 + $0x1b8] sm:$0xff]   ;;  %7353 = vst [vmem:[#allocation115_spill] sm:$0xff] %v6552_v63 }
 0x71c   :  { %v2649_v25 = vpack.c.bf16 %v2625_v51, %v2617_v59  ;;  %v2651_v2 = vpack.c.bf16 %v2627_v36, %v2619_v4  ;;  %7351 = vst [vmem:[#allocation113_spill] sm:$0xff] %v6538_v56  ;;  %v6546_v4 = vld [vmem:[%s7028_s5 + $0x170] sm:$0xff]   ;;  %v7354_v49 = vld [vmem:[#allocation37_spill] sm:$0xff]  ;;  %v7355_v59 = vld [vmem:[#allocation38_spill] sm:$0xff] }
 0x71d   :  { %v2450_v30 = vpop.f32.mrf.mxu0  ;;  %v2503_v43 = vpop.f32.mrf.mxu1  ;;  %7352 = vst [vmem:[#allocation114_spill] sm:$0xff] %v6546_v4 }
 0x71e   :  { %2696 = vmatprep.mubr.bf16.mxu0 %v2649_v25  ;;  %2745 = vmatprep.mubr.bf16.mxu1 %v2651_v2  ;;  %v2633_v25 = vmul.f32 %v2450_v30, %v5790_v6  ;;  %v2635_v30 = vmul.f32 %v2503_v43, %v5792_v14  ;;  %v7357_v2 = vld [vmem:[#allocation33_spill] sm:$0xff]  ;;  %v6568_v43 = vld [vmem:[%s7028_s5 + $0x130] sm:$0xff]  }
 0x71f   :  { %v2452_v47 = vpop.f32.mrf.mxu0  ;;  %v2505_v52 = vpop.f32.mrf.mxu1  ;;  %2697 = vmatmul.mubr.bf16.vlgmr.msra.gmra.mxu0 %v2648_v62  ;;  %2746 = vmatmul.mubr.bf16.vlgmr.msra.gmra.mxu1 %v2650_v48  ;;  %v2632_v48 = vmul.f32 %v2448_v55, %v7357_v2  ;;  %7359 = vst [vmem:[#allocation116_spill] sm:$0xff] %v6568_v43  ;;  %v6574_v55 = vld [vmem:[%s7028_s5 + $0x1b0] sm:$0xff]  }
 0x720   :  { %4556 = vmatpush3.bf16.msra.mxu0 %v6532_v32  ;;  %4584 = vmatpush3.bf16.msra.mxu1 %v6538_v56  ;;  %v2640_v27 = vmul.f32 %v2452_v47, %v5795_v34  ;;  %v2642_v15 = vmul.f32 %v2505_v52, %v7354_v49  ;;  %v7358_v34 = vld [vmem:[#allocation40_spill] sm:$0xff]  ;;  %7360 = vst [vmem:[#allocation117_spill] sm:$0xff] %v6574_v55 }
 0x721   :  { %v2454_v62 = vpop.f32.mrf.mxu0  ;;  %v2507_v51 = vpop.f32.mrf.mxu1  ;;  %4557 = vmatprep.subr.bf16.mxu0 %v6546_v4  ;;  %4585 = vmatprep.subr.bf16.mxu1 %v6552_v63  ;;  %v2634_v6 = vmul.f32 %v2501_v13, %v7358_v34  ;;  %v6580_v13 = vld [vmem:[%s7028_s5 + $0x168] sm:$0xff]   ;;  %v7388_v14 = vld [vmem:[#allocation56_spill] sm:$0xff]  ;;  %v7389_v63 = vld [vmem:[#allocation53_spill] sm:$0xff] }
 0x722   :  { %v2641_v44 = vmul.f32 %v2454_v62, %v7355_v59  ;;  %v2643_v36 = vmul.f32 %v2507_v51, %v7356_v9  ;;  %v2656_v52 = vpack.c.bf16 %v2640_v27, %v2632_v48  ;;  %7361 = vst [vmem:[#allocation118_spill] sm:$0xff] %v6580_v13  ;;  %v6586_v27 = vld [vmem:[%s7028_s5 + $0x1e8] sm:$0xff]   ;;  %v7366_v48 = vld [vmem:[#allocation41_spill] sm:$0xff] }
 0x723   :  { %v6560_v47 = vpop.f32.mrf.mxu0  ;;  %v6562_v4 = vpop.f32.mrf.mxu1  ;;  %7362 = vst [vmem:[#allocation119_spill] sm:$0xff] %v6586_v27 }
 0x724   :  { %v2657_v56 = vpack.c.bf16 %v2641_v44, %v2633_v25  ;;  %v2659_v32 = vpack.c.bf16 %v2643_v36, %v2635_v30  ;;  %4558 = vmatpush3.bf16.msra.mxu0 %v6568_v43  ;;  %4586 = vmatpush3.bf16.msra.mxu1 %v6574_v55  ;;  %v2658_v25 = vpack.c.bf16 %v2642_v15, %v2634_v6  ;;  %v6592_v36 = vld [vmem:[%s7028_s5 + $0x128] sm:$0xff]   ;;  %v6604_v15 = vld [vmem:[%s7028_s5 + $0x160] sm:$0xff]   ;;  %v7369_v55 = vld [vmem:[#allocation44_spill] sm:$0xff] }
 0x725   :  { %v2546_v62 = vpop.f32.mrf.mxu0  ;;  %v2599_v51 = vpop.f32.mrf.mxu1  ;;  %4559 = vmatprep.subr.bf16.mxu0 %v6580_v13  ;;  %4587 = vmatprep.subr.bf16.mxu1 %v6586_v27  ;;  %7363 = vst [vmem:[#allocation120_spill] sm:$0xff] %v6592_v36  ;;  %v6598_v6 = vld [vmem:[%s7028_s5 + $0x1a8] sm:$0xff]   ;;  %7365 = vst [vmem:[#allocation122_spill] sm:$0xff] %v6604_v15 }
 0x726   :  { %2704 = vmatprep.mubr.bf16.mxu0 %v2657_v56  ;;  %2753 = vmatprep.mubr.bf16.mxu1 %v2659_v32  ;;  %7364 = vst [vmem:[#allocation121_spill] sm:$0xff] %v6598_v6  ;;  %v7368_v27 = vld [vmem:[#allocation43_spill] sm:$0xff] }
 0x727   :  { %v2548_v30 = vpop.f32.mrf.mxu0  ;;  %v2601_v44 = vpop.f32.mrf.mxu1  ;;  %2705 = vmatmul.mubr.bf16.gmra.mxu0 %v2656_v52  ;;  %2754 = vmatmul.mubr.bf16.gmra.mxu1 %v2658_v25  ;;  %v2621_v52 = vmul.f32 %v2546_v62, %v7366_v48  ;;  %v7367_v25 = vld [vmem:[#allocation42_spill] sm:$0xff] }
 0x728   :  { %4560 = vmatpush3.bf16.msra.mxu0 %v6592_v36  ;;  %4588 = vmatpush3.bf16.msra.mxu1 %v6598_v6  ;;  %v2623_v36 = vmul.f32 %v2599_v51, %v7367_v25  ;;  %v6614_v6 = vld [vmem:[%s7028_s5 + $0x1e0] sm:$0xff]  }
 0x729   :  { %v2550_v32 = vpop.f32.mrf.mxu0  ;;  %v2603_v56 = vpop.f32.mrf.mxu1  ;;  %4561 = vmatprep.subr.bf16.mxu0 %v6604_v15  ;;  %7370 = vst [vmem:[#allocation123_spill] sm:$0xff] %v6614_v6  ;;  %4589 = vmatprep.subr.bf16.mxu1 %v6614_v6  ;;  %v6620_v62 = vld [vmem:[%s7028_s5 + $0x120] sm:$0xff]   ;;  %v7382_v6 = vld [vmem:[#allocation49_spill] sm:$0xff]  ;;  %v7385_v15 = vld [vmem:[#allocation51_spill] sm:$0xff] }
 0x72a   :  { %v2629_v13 = vmul.f32 %v2550_v32, %v7368_v27  ;;  %v2631_v43 = vmul.f32 %v2603_v56, %v7369_v55  ;;  %7371 = vst [vmem:[#allocation124_spill] sm:$0xff] %v6620_v62  ;;  %v6626_v51 = vld [vmem:[%s7028_s5 + $0x1a0] sm:$0xff]   ;;  %v6644_v56 = vld [vmem:[%s7028_s5 + $0x118] sm:$0xff]  }
 0x72b   :  { %v2554_v34 = vpop.f32.mrf.mxu0  ;;  %v2607_v59 = vpop.f32.mrf.mxu1  ;;  %7372 = vst [vmem:[#allocation125_spill] sm:$0xff] %v6626_v51  ;;  %7375 = vst [vmem:[#allocation128_spill] sm:$0xff] %v6644_v56  ;;  %v7383_v27 = vld [vmem:[#allocation50_spill] sm:$0xff] }
 0x72c   :  { %v2653_v2 = vpack.c.bf16 %v2629_v13, %v2621_v52  ;;  %v2655_v9 = vpack.c.bf16 %v2631_v43, %v2623_v36  ;;  %4562 = vmatpush3.bf16.msra.mxu0 %v6620_v62  ;;  %4590 = vmatpush3.bf16.msra.mxu1 %v6626_v51  ;;  %v6632_v13 = vld [vmem:[%s7028_s5 + $0x158] sm:$0xff]   ;;  %v6656_v52 = vld [vmem:[%s7028_s5 + $0x150] sm:$0xff]   ;;  %v7379_v51 = vld [vmem:[#allocation46_spill] sm:$0xff] }
 0x72d   :  { %7373 = vst [vmem:[#allocation126_spill] sm:$0xff] %v6632_v13  ;;  %4563 = vmatprep.subr.bf16.mxu0 %v6632_v13  ;;  %v6638_v43 = vld [vmem:[%s7028_s5 + $0x1d8] sm:$0xff]   ;;  %v2556_v36 = vpop.f32.mrf.mxu0  ;;  %v2609_v32 = vpop.f32.mrf.mxu1  ;;  %7377 = vst [vmem:[#allocation130_spill] sm:$0xff] %v6656_v52  ;;  %v7381_v62 = vld [vmem:[#allocation48_spill] sm:$0xff] }
 0x72e   :  { %2794 = vmatprep.mubr.bf16.mxu0 %v2653_v2  ;;  %7374 = vst [vmem:[#allocation127_spill] sm:$0xff] %v6638_v43  ;;  %4591 = vmatprep.subr.bf16.mxu1 %v6638_v43  ;;  %v6650_v2 = vld [vmem:[%s7028_s5 + $0x198] sm:$0xff]   ;;  %v7384_v25 = vld [vmem:[#allocation54_spill] sm:$0xff] }
 0x72f   :  { %2843 = vmatprep.mubr.bf16.mxu1 %v2655_v9  ;;  %7376 = vst [vmem:[#allocation129_spill] sm:$0xff] %v6650_v2  ;;  %v7378_v9 = vld [vmem:[#allocation45_spill] sm:$0xff]  ;;  %v2558_v43 = vpop.f32.mrf.mxu0  ;;  %v2611_v13 = vpop.f32.mrf.mxu1  ;;  %v2628_v48 = vmul.f32 %v2548_v30, %v7384_v25  ;;  %v2637_v30 = vmul.f32 %v2556_v36, %v7393_v19  ;;  %v7398_v36 = vld [vmem:[#allocation64_spill] sm:$0xff] }
 0x730   :  { %4564 = vmatpush3.bf16.msra.mxu0 %v6644_v56  ;;  %4592 = vmatpush3.bf16.msra.mxu1 %v6650_v2  ;;  %v7380_v56 = vld [vmem:[#allocation47_spill] sm:$0xff]  ;;  %v7394_v25 = vld [vmem:[#allocation57_spill] sm:$0xff] }
 0x731   :  { %4565 = vmatprep.subr.bf16.mxu0 %v6656_v52  ;;  %4593 = vmatprep.subr.bf16.mxu1 %v7378_v9  ;;  %v2560_v2 = vpop.f32.mrf.mxu0  ;;  %v2613_v55 = vpop.f32.mrf.mxu1  ;;  %v7386_v52 = vld [vmem:[#allocation52_spill] sm:$0xff]  ;;  %v7387_v9 = vld [vmem:[#allocation55_spill] sm:$0xff] }
 0x732   :  { %v2630_v49 = vmul.f32 %v2601_v44, %v7387_v9  ;;  %v7396_v44 = vld [vmem:[#allocation60_spill] sm:$0xff] }
 0x734   :  { %4566 = vmatpush3.bf16.msra.mxu0 %v7379_v51  ;;  %4594 = vmatpush3.bf16.msra.mxu1 %v7380_v56  ;;  %v2645_v51 = vmul.f32 %v2560_v2, %v7388_v14  ;;  %v7390_v56 = vld [vmem:[#allocation58_spill] sm:$0xff] }
 0x735   :  { %4567 = vmatprep.subr.bf16.mxu0 %v7381_v62  ;;  %4595 = vmatprep.subr.bf16.mxu1 %v7382_v6  ;;  %v2620_v62 = vmul.f32 %v6560_v47, %v7390_v56  ;;  %v7391_v6 = vld [vmem:[#allocation59_spill] sm:$0xff] }
 0x736   :  { %v2647_v24 = vmul.f32 %v2613_v55, %v7391_v6  ;;  %v2661_v2 = vpack.c.bf16 %v2645_v51, %v2637_v30 }
 0x738   :  { %4568 = vmatpush3.bf16.msra.mxu0 %v7383_v27  ;;  %4596 = vmatpush3.bf16.msra.mxu1 %v7385_v15  ;;  %v2622_v27 = vmul.f32 %v6562_v4, %v7392_v23  ;;  %v2652_v15 = vpack.c.bf16 %v2628_v48, %v2620_v62  ;;  %v7397_v4 = vld [vmem:[#allocation65_spill] sm:$0xff]  ;;  %v7399_v48 = vld [vmem:[#allocation66_spill] sm:$0xff] }
 0x739   :  { %4569 = vmatprep.subr.bf16.mxu0 %v7386_v52  ;;  %4597 = vmatprep.subr.bf16.mxu1 %v7389_v63  ;;  %v7395_v52 = vld [vmem:[#allocation63_spill] sm:$0xff]  ;;  %v2644_v55 = vmul.f32 %v2558_v43, %v7397_v4 }
 0x73a   :  { %v2639_v50 = vmul.f32 %v2609_v32, %v7395_v52  ;;  %v2654_v63 = vpack.c.bf16 %v2630_v49, %v2622_v27  ;;  %v7400_v32 = vld [vmem:[#allocation67_spill] sm:$0xff]  ;;  %v7402_v27 = vld [vmem:[#allocation68_spill] sm:$0xff] }
 0x73b   :  { %v2636_v62 = vmul.f32 %v2554_v34, %v7400_v32 }
 0x73c   :  { %4570 = vmatpush3.bf16.msra.mxu0 %v7394_v25  ;;  %4598 = vmatpush3.bf16.msra.mxu1 %v7396_v44  ;;  %v2663_v47 = vpack.c.bf16 %v2647_v24, %v2639_v50  ;;  %v2646_v25 = vmul.f32 %v2611_v13, %v7399_v48  ;;  %v7401_v44 = vld [vmem:[#allocation69_spill] sm:$0xff] }
 0x73d   :  { %4862 = vmatprep.subr.bf16.mxu0 %v7282_v11  ;;  %4870 = vmatprep.subr.bf16.mxu1 %v7282_v11  ;;  %v2638_v49 = vmul.f32 %v2607_v59, %v7401_v44  ;;  %v2660_v51 = vpack.c.bf16 %v2644_v55, %v2636_v62 }
 0x73f   :  { %2795 = vmatmul.mubr.bf16.vlgmr.msra.gmra.mxu0 %v2652_v15  ;;  %2844 = vmatmul.mubr.bf16.vlgmr.msra.gmra.mxu1 %v2654_v63  ;;  %v2662_v24 = vpack.c.bf16 %v2646_v25, %v2638_v49 }
 0x740   :  { %2802 = vmatprep.mubr.bf16.mxu0 %v2661_v2  ;;  %2851 = vmatprep.mubr.bf16.mxu1 %v2663_v47 }
 0x741   :  { %4871 = vmatpush3.bf16.msra.mxu1 %v7398_v36 }
 0x742   :  { %4872 = vmatprep.subr.bf16.mxu1 %v7282_v11 }
 0x745   :  { %4873 = vmatpush3.bf16.msra.mxu1 %v7402_v27 }
 0x746   :  { %4886 = vmatprep.subr.bf16.mxu1 %v7282_v11 }
 0x747   :  { %2803 = vmatmul.mubr.bf16.gmra.mxu0 %v2660_v51  ;;  %2852 = vmatmul.mubr.bf16.gmra.mxu1 %v2662_v24 }
 0x748   :  { %4866 = vmatprep.mubr.msk.bf16.mxu0 %vm5255_vm1, %v7282_v11  ;;  %4874 = vmatprep.mubr.msk.bf16.mxu1 %vm5255_vm1, %v7282_v11 }
 0x74f   :  { %4875 = vmatmul.mubr.msk.bf16.vlgmr.msra.gmra.mxu1 %vm715_vm11, %v6285_v61 }
 0x750   :  { %4887 = vmatpush3.bf16.msra.mxu1 %v6091_v29  ;;  %4890 = vmatprep.mubr.msk.bf16.mxu1 %vm5255_vm1, %v7282_v11 }
 0x751   :  { %4888 = vmatprep.subr.bf16.mxu1 %v7282_v11 }
 0x754   :  { %4889 = vmatpush3.bf16.msra.mxu1 %v6111_v0 }
 0x755   :  { %4902 = vmatprep.subr.bf16.mxu1 %v7282_v11 }
 0x7df   :  { %v4515_v34 = vpop.f32.mrf.mxu0  ;;  %v4543_v50 = vpop.f32.mrf.mxu1 }
 0x7e1   :  { %v4516_v59 = vpop.f32.mrf.mxu0  ;;  %v4544_v13 = vpop.f32.mrf.mxu1 }
 0x7e2   :  { %v4517_v17 = vadd.f32 %v4516_v59, %v4515_v34  ;;  %v4545_v38 = vadd.f32 %v4544_v13, %v4543_v50 }
 0x7e3   :  { %v4518_v43 = vpop.f32.mrf.mxu0  ;;  %v4546_v30 = vpop.f32.mrf.mxu1 }
 0x7e5   :  { %v4519_v15 = vpop.f32.mrf.mxu0  ;;  %v4547_v63 = vpop.f32.mrf.mxu1 }
 0x7e6   :  { %v4520_v56 = vadd.f32 %v4519_v15, %v4518_v43  ;;  %v4548_v14 = vadd.f32 %v4547_v63, %v4546_v30  ;;  %v2748_v43 = vadd.f32 %v4545_v38, %v4517_v17 }
 0x7e7   :  { %v4521_v2 = vpop.f32.mrf.mxu0  ;;  %v4549_v47 = vpop.f32.mrf.mxu1 }
 0x7e8   :  { %v2751_v26 = vadd.f32 %v4548_v14, %v4520_v56 }
 0x7e9   :  { %v4522_v55 = vpop.f32.mrf.mxu0  ;;  %v4550_v25 = vpop.f32.mrf.mxu1 }
 0x7ea   :  { %v4523_v19 = vadd.f32 %v4522_v55, %v4521_v2  ;;  %v4551_v23 = vadd.f32 %v4550_v25, %v4549_v47 }
 0x7eb   :  { %v4524_v62 = vpop.f32.mrf.mxu0  ;;  %v4552_v49 = vpop.f32.mrf.mxu1 }
 0x7ec   :  { %v2756_v37 = vadd.f32 %v4551_v23, %v4523_v19 }
 0x7ed   :  { %v4525_v51 = vpop.f32.mrf.mxu0  ;;  %v4553_v24 = vpop.f32.mrf.mxu1 }
 0x7ee   :  { %v4526_v22 = vadd.f32 %v4525_v51, %v4524_v62  ;;  %v4554_v21 = vadd.f32 %v4553_v24, %v4552_v49  ;;  %v7407_v24 = vld [vmem:[#allocation72_spill] sm:$0xff] }
 0x7f0   :  { %v2759_v46 = vadd.f32 %v4554_v21, %v4526_v22 }
 0x7ff   :  { %v4571_v29 = vpop.f32.mrf.mxu0  ;;  %v4599_v0 = vpop.f32.mrf.mxu1 }
 0x801   :  { %v4572_v27 = vpop.f32.mrf.mxu0  ;;  %v4600_v44 = vpop.f32.mrf.mxu1 }
 0x802   :  { %v4573_v18 = vadd.f32 %v4572_v27, %v4571_v29  ;;  %v4601_v23 = vadd.f32 %v4600_v44, %v4599_v0 }
 0x803   :  { %v4574_v32 = vpop.f32.mrf.mxu0  ;;  %v4602_v48 = vpop.f32.mrf.mxu1 }
 0x805   :  { %v4575_v36 = vpop.f32.mrf.mxu0  ;;  %v4603_v4 = vpop.f32.mrf.mxu1 }
 0x806   :  { %v4576_v7 = vadd.f32 %v4575_v36, %v4574_v32  ;;  %v4604_v34 = vadd.f32 %v4603_v4, %v4602_v48  ;;  %v7405_v4 = vld [vmem:[#allocation14_spill] sm:$0xff]  ;;  %v7406_v48 = vld [vmem:[#allocation17_spill] sm:$0xff] }
 0x807   :  { %v4577_v52 = vpop.f32.mrf.mxu0  ;;  %v4605_v6 = vpop.f32.mrf.mxu1 }
 0x808   :  { %v2800_v30 = vadd.f32 %v4576_v7, %v2751_v26 }
 0x809   :  { %v4578_v9 = vpop.f32.mrf.mxu0  ;;  %v4606_v54 = vpop.f32.mrf.mxu1 }
 0x80a   :  { %v4579_v5 = vadd.f32 %v4578_v9, %v4577_v52  ;;  %v4607_v15 = vadd.f32 %v4606_v54, %v4605_v6  ;;  %v2797_v52 = vadd.f32 %v4573_v18, %v2748_v43  ;;  %v2849_v36 = vadd.f32 %v4604_v34, %v2800_v30 }
 0x80b   :  { %v4580_v39 = vpop.f32.mrf.mxu0  ;;  %v4608_v58 = vpop.f32.mrf.mxu1  ;;  %v7404_v6 = vmov 0  }
 0x80c   :  { %v2805_v2 = vadd.f32 %v4579_v5, %v2756_v37  ;;  %v2846_v21 = vadd.f32 %v4601_v23, %v2797_v52 }
 0x80d   :  { %v4581_v20 = vpop.f32.mrf.mxu0  ;;  %v4609_v55 = vpop.f32.mrf.mxu1 }
 0x80e   :  { %v4582_v47 = vadd.f32 %v4581_v20, %v4580_v39  ;;  %v4610_v25 = vadd.f32 %v4609_v55, %v4608_v58  ;;  %v2854_v50 = vadd.f32 %v4607_v15, %v2805_v2  ;;  %v2860_v20 = vpack.c.bf16 %v2849_v36, %v2846_v21  ;;  %v7408_v2 = vld [vmem:[#allocation73_spill] sm:$0xff]  ;;  %v7409_v36 = vld [vmem:[#allocation74_spill] sm:$0xff]  ;;  %v7410_v21 = vld [vmem:[#allocation75_spill] sm:$0xff] }
 0x80f   :  { %v2942_v9 = vpop.f32.mrf.mxu1 }
 0x810   :  { %v2808_v63 = vadd.f32 %v4582_v47, %v2759_v46 }
 0x811   :  { %v4876_v19 = vpop.f32.mrf.mxu1 }
 0x812   :  { %v2857_v59 = vadd.f32 %v4610_v25, %v2808_v63 }
 0x813   :  { %v2945_v56 = vpop.f32.mrf.mxu1 }
 0x814   :  { %v2861_v14 = vpack.c.bf16 %v2857_v59, %v2854_v50 }
 0x815   :  { %v4877_v22 = vpop.f32.mrf.mxu1 }
 0x816   :  { %4863 = vmatpush3.bf16.msra.mxu0 %v2861_v14 }
 0x817   :  { %4864 = vmatprep.subr.bf16.mxu0 %v7282_v11 }
 0x81a   :  { %4865 = vmatpush3.bf16.msra.mxu0 %v2860_v20 }
 0x81b   :  { %4878 = vmatprep.subr.bf16.mxu0 %v7282_v11 }
 0x81d   :  { %4867 = vmatmul.mubr.msk.bf16.vlgmr.msra.gmra.mxu0 %vm715_vm11, %v6067_v41 }
 0x81e   :  { %4879 = vmatpush3.bf16.msra.mxu0 %v6086_v57  ;;  %4882 = vmatprep.mubr.msk.bf16.mxu0 %vm5255_vm1, %v7282_v11 }
 0x81f   :  { %4880 = vmatprep.subr.bf16.mxu0 %v7282_v11 }
 0x822   :  { %4881 = vmatpush3.bf16.msra.mxu0 %v6106_v8 }
 0x823   :  { %4894 = vmatprep.subr.bf16.mxu0 %v7282_v11 }
 0x8dd   :  { %v2896_v18 = vpop.f32.mrf.mxu0 }
 0x8de   :  { %v2903_v26 = vmul.f32 %v6117_v53, %v2896_v18 }
 0x8df   :  { %v4868_v29 = vpop.f32.mrf.mxu0 }
 0x8e0   :  { %v2949_v0 = vadd.f32 %v2942_v9, %v2903_v26 }
 0x8e1   :  { %v2899_v46 = vpop.f32.mrf.mxu0 }
 0x8e2   :  { %v2904_v58 = vmul.f32 %v6120_v35, %v2899_v46  ;;  %v2951_v37 = vadd.f32 %v6125_v40, %v2949_v0 }
 0x8e3   :  { %v4869_v7 = vpop.f32.mrf.mxu0 }
 0x8e4   :  { %v2950_v39 = vadd.f32 %v2945_v56, %v2904_v58  ;;  %v2953_v17 = vmax.f32 %v2951_v37, 0.0 }
 0x8e6   :  { %v2952_v38 = vadd.f32 %v6125_v40, %v2950_v39  ;;  %v7403_v40 = vld [vmem:[#allocation13_spill] sm:$0xff] }
 0x8e8   :  { %v2954_v54 = vmax.f32 %v2952_v38, 0.0 }
 0x8ea   :  { %v2955_v5 = vpack.c.bf16 %v2954_v54, %v2953_v17 }
 0x8ec   :  { %4883 = vmatmul.mubr.msk.bf16.vlgmr.msra.gmra.mxu0 %vm715_vm11, %v2955_v5  ;;  %4891 = vmatmul.mubr.msk.bf16.vlgmr.msra.gmra.mxu1 %vm715_vm11, %v2955_v5 }
 0x8ed   :  { %4895 = vmatpush3.bf16.msra.mxu0 %v6142_v31  ;;  %4903 = vmatpush3.bf16.msra.mxu1 %v6144_v1 }
 0x8ee   :  { %4896 = vmatprep.subr.bf16.mxu0 %v7282_v11  ;;  %4904 = vmatprep.subr.bf16.mxu1 %v7282_v11 }
 0x8ef   :  { %4898 = vmatprep.mubr.msk.bf16.mxu0 %vm5255_vm1, %v7282_v11  ;;  %4906 = vmatprep.mubr.msk.bf16.mxu1 %vm5255_vm1, %v7282_v11 }
 0x8f1   :  { %4897 = vmatpush3.bf16.msra.mxu0 %v6162_v33  ;;  %4905 = vmatpush3.bf16.msra.mxu1 %v6164_v42 }
 0x8f2   :  { %4910 = vmatprep.subr.bf16.mxu0 %v7282_v11  ;;  %4918 = vmatprep.subr.bf16.mxu1 %v7282_v11 }
 0x8f4   :  { %4899 = vmatmul.mubr.msk.bf16.vlgmr.msra.gmra.mxu0 %vm715_vm11, %v2955_v5  ;;  %4907 = vmatmul.mubr.msk.bf16.vlgmr.msra.gmra.mxu1 %vm715_vm11, %v6285_v61 }
 0x8f5   :  { %4911 = vmatpush3.bf16.msra.mxu0 %v6186_v60  ;;  %4919 = vmatpush3.bf16.msra.mxu1 %v6188_v28 }
 0x8f6   :  { %4912 = vmatprep.subr.bf16.mxu0 %v7282_v11  ;;  %4920 = vmatprep.subr.bf16.mxu1 %v7282_v11 }
 0x8f7   :  { %4914 = vmatprep.mubr.msk.bf16.mxu0 %vm5255_vm1, %v7282_v11  ;;  %4922 = vmatprep.mubr.msk.bf16.mxu1 %vm5255_vm1, %v7282_v11 }
 0x8f9   :  { %4913 = vmatpush3.bf16.msra.mxu0 %v6209_v45  ;;  %4921 = vmatpush3.bf16.msra.mxu1 %v6211_v16 }
 0x8fa   :  { %3317 = vmatprep.subr.bf16.mxu1 %v5473_v10 }
 0x8fc   :  { %4915 = vmatmul.mubr.msk.bf16.vlgmr.msra.gmra.mxu0 %vm715_vm11, %v6285_v61  ;;  %4923 = vmatmul.mubr.msk.bf16.vlgmr.msra.gmra.mxu1 %vm715_vm11, %v6285_v61 }
 0x8fd   :  { %4928 = vmatprep.mubr.msk.bf16.mxu0 %vm873_vm8, %v5450_v3  ;;  %3318 = vmatpush1.bf16.msra.mxu1 %v5478_v12 }
 0x8fe   :  { %3319 = vmatprep.subr.bf16.mxu1 %v7403_v40  ;;  %3337 = vmatprep.mubr.bf16.mxu1 %v7404_v6 }
 0x901   :  { %3320 = vmatpush1.bf16.msra.mxu1 %v7405_v4 }
 0x902   :  { %3423 = vmatprep.subr.bf16.mxu1 %v7406_v48 }
 0x9ac   :  { %v2993_v10 = vpop.f32.mrf.mxu0  ;;  %v3034_v32 = vpop.f32.mrf.mxu1 }
 0x9ad   :  { %v2994_v12 = vadd.f32 %v7407_v24, %v2993_v10  ;;  %v3035_v14 = vadd.f32 %v7409_v36, %v3034_v32 }
 0x9ae   :  { %v4884_v44 = vpop.f32.mrf.mxu0  ;;  %v4892_v27 = vpop.f32.mrf.mxu1 }
 0x9af   :  { %v7411_v44 = vld [vmem:[#allocation76_spill] sm:$0xff] }
 0x9b0   :  { %v2996_v13 = vpop.f32.mrf.mxu0  ;;  %v3037_v62 = vpop.f32.mrf.mxu1 }
 0x9b1   :  { %v2997_v25 = vadd.f32 %v7407_v24, %v2996_v13  ;;  %v3038_v46 = vadd.f32 %v7409_v36, %v3037_v62 }
 0x9b2   :  { %v4885_v61 = vpop.f32.mrf.mxu0  ;;  %v4893_v49 = vpop.f32.mrf.mxu1 }
 0x9b3   :  { %v7412_v61 = vld [vmem:[#allocation77_spill] sm:$0xff] }
 0x9b4   :  { %v3075_v51 = vpop.f32.mrf.mxu0  ;;  %v3116_v3 = vpop.f32.mrf.mxu1 }
 0x9b5   :  { %v3117_v47 = vadd.f32 %v7408_v2, %v3116_v3  ;;  %v3076_v49 = vadd.f32 %v7412_v61, %v3075_v51 }
 0x9b6   :  { %v4900_v55 = vpop.f32.mrf.mxu0  ;;  %v4908_v43 = vpop.f32.mrf.mxu1 }
 0x9b7   :  { %v3205_v30 = vadd.f32 %v3117_v47, %v2994_v12 }
 0x9b8   :  { %v3078_v15 = vpop.f32.mrf.mxu0  ;;  %v3119_v63 = vpop.f32.mrf.mxu1 }
 0x9b9   :  { %v4326_v9 = vmul.f32 -1.442695, %v3205_v30  ;;  %v3120_v52 = vadd.f32 %v7408_v2, %v3119_v63  ;;  %v3079_v47 = vadd.f32 %v7412_v61, %v3078_v15  ;;  %v7434_v61 = vld [vmem:[#allocation85_spill] sm:$0xff] }
 0x9ba   :  { %v4901_v34 = vpop.f32.mrf.mxu0  ;;  %v4909_v50 = vpop.f32.mrf.mxu1 }
 0x9bb   :  { %5096 = vpow2.f32 %v4326_v9  ;;  %v3206_v59 = vadd.f32 %v3120_v52, %v2997_v25 }
 0x9bc   :  { %v3157_v19 = vpop.f32.mrf.mxu0  ;;  %v3198_v23 = vpop.f32.mrf.mxu1 }
 0x9bd   :  { %v4327_v56 = vmul.f32 -1.442695, %v3206_v59  ;;  %v3158_v22 = vadd.f32 %v7410_v21, %v3157_v19  ;;  %v3199_v27 = vadd.f32 %v7411_v44, %v3198_v23  ;;  %v7413_v59 = vld [vmem:[#allocation8_spill] sm:$0xff]  ;;  %v7414_v23 = vld [vmem:[#allocation9_spill] sm:$0xff] }
 0x9be   :  { %v4916_v20 = vpop.f32.mrf.mxu0  ;;  %v4924_v18 = vpop.f32.mrf.mxu1 }
 0x9bf   :  { %5098 = vpow2.f32 %v4327_v56  ;;  %v3219_v26 = vadd.f32 %v3158_v22, %v3035_v14  ;;  %v7416_v22 = vld [vmem:[#allocation10_spill] sm:$0xff]  ;;  %v7417_v20 = vld [vmem:[#allocation11_spill] sm:$0xff]  ;;  %v7418_v18 = vld [vmem:[#allocation16_spill] sm:$0xff] }
 0x9c0   :  { %v3160_v29 = vpop.f32.mrf.mxu0  ;;  %v3201_v0 = vpop.f32.mrf.mxu1 }
 0x9c1   :  { %v3161_v58 = vadd.f32 %v7410_v21, %v3160_v29  ;;  %v4328_v39 = vmul.f32 -1.442695, %v3219_v26  ;;  %v3202_v12 = vadd.f32 %v7411_v44, %v3201_v0  ;;  %v7415_v21 = vld [vmem:[#allocation12_spill] sm:$0xff]  ;;  %v7419_v26 = vld [vmem:[#allocation15_spill] sm:$0xff]  ;;  %v7430_v44 = vld [vmem:[#allocation81_spill] sm:$0xff] }
 0x9c2   :  { %v4917_v7 = vpop.f32.mrf.mxu0  ;;  %v4925_v37 = vpop.f32.mrf.mxu1  ;;  %v7420_v29 = vld [vmem:[#allocation20_spill] sm:$0xff] }
 0x9c3   :  { %v3220_v38 = vadd.f32 %v3161_v58, %v3038_v46  ;;  %5100 = vpow2.f32 %v4328_v39  ;;  %v7421_v39 = vld [vmem:[#allocation18_spill] sm:$0xff] }
 0x9c5   :  { %v4329_v17 = vmul.f32 -1.442695, %v3220_v38  ;;  %v7422_v38 = vld [vmem:[#allocation19_spill] sm:$0xff] }
 0x9c7   :  { %5102 = vpow2.f32 %v4329_v17  ;;  %v7423_v17 = vld [vmem:[#allocation21_spill] sm:$0xff] }
 0x9c8   :  { %v5097_v54 = vpop.eup %5096 }
 0x9c9   :  { %v3213_v5 = vadd.f32 1.0, %v5097_v54  ;;  %v7424_v54 = vld [vmem:[#allocation22_spill] sm:$0xff] }
 0x9cb   :  { %5104 = vrcp.f32 %v3213_v5 }
 0x9cc   :  { %v5099_v40 = vpop.eup %5098 }
 0x9cd   :  { %v3214_v4 = vadd.f32 1.0, %v5099_v40  ;;  %v7425_v40 = vld [vmem:[#allocation23_spill] sm:$0xff] }
 0x9cf   :  { %5106 = vrcp.f32 %v3214_v4  ;;  %v7426_v4 = vld [vmem:[#allocation24_spill] sm:$0xff] }
 0x9d0   :  { %v5101_v48 = vpop.eup %5100 }
 0x9d1   :  { %v3227_v32 = vadd.f32 1.0, %v5101_v48  ;;  %v7427_v48 = vld [vmem:[#allocation78_spill] sm:$0xff] }
 0x9d3   :  { %5108 = vrcp.f32 %v3227_v32  ;;  %v7429_v32 = vld [vmem:[#allocation80_spill] sm:$0xff] }
 0x9d4   :  { %v5103_v10 = vpop.eup %5102 }
 0x9d5   :  { %v3228_v62 = vadd.f32 1.0, %v5103_v10  ;;  %v7428_v10 = vld [vmem:[#allocation79_spill] sm:$0xff] }
 0x9d7   :  { %5110 = vrcp.f32 %v3228_v62  ;;  %v7433_v62 = vld [vmem:[#allocation84_spill] sm:$0xff] }
 0x9d8   :  { %v5105_v13 = vpop.eup %5104 }
 0x9d9   :  { %v3233_v3 = vmul.f32 %v5105_v13, %v3199_v27  ;;  %v7431_v27 = vld [vmem:[#allocation82_spill] sm:$0xff]  ;;  %v7432_v13 = vld [vmem:[#allocation83_spill] sm:$0xff] }
 0x9db   :  { %v3235_v24 = vadd.f32 %v3233_v3, %v3076_v49  ;;  %v7435_v49 = vld [vmem:[#allocation86_spill] sm:$0xff]  ;;  %v7436_v3 = vld [vmem:[#allocation87_spill] sm:$0xff] }
 0x9dc   :  { %v5107_v2 = vpop.eup %5106 }
 0x9dd   :  { %5112 = vtanh.f32 %v3235_v24  ;;  %v3234_v55 = vmul.f32 %v5107_v2, %v3202_v12  ;;  %v7438_v24 = vld [vmem:[#allocation89_spill] sm:$0xff]  ;;  %v7439_v12 = vld [vmem:[#allocation90_spill] sm:$0xff]  ;;  %v7440_v2 = vld [vmem:[#allocation91_spill] sm:$0xff] }
 0x9df   :  { %v3236_v43 = vadd.f32 %v3234_v55, %v3079_v47  ;;  %v7441_v47 = vld [vmem:[#allocation92_spill] sm:$0xff]  ;;  %v7442_v55 = vld [vmem:[#allocation93_spill] sm:$0xff] }
 0x9e0   :  { %v5109_v30 = vpop.eup %5108 }
 0x9e1   :  { %5114 = vtanh.f32 %v3236_v43  ;;  %v3239_v9 = vsub.f32 1.0, %v5109_v30  ;;  %v3243_v19 = vmul.f32 %v5109_v30, %v7413_v59  ;;  %v7443_v43 = vld [vmem:[#allocation94_spill] sm:$0xff]  ;;  %v7444_v30 = vld [vmem:[#allocation95_spill] sm:$0xff] }
 0x9e2   :  { %v7452_v59 = vld [vmem:[#allocation103_spill] sm:$0xff] }
 0x9e4   :  { %v5111_v63 = vpop.eup %5110 }
 0x9e5   :  { %v3240_v34 = vsub.f32 1.0, %v5111_v63  ;;  %v3244_v36 = vmul.f32 %v5111_v63, %v7414_v23  ;;  %v7445_v63 = vld [vmem:[#allocation96_spill] sm:$0xff]  ;;  %v7454_v23 = vld [vmem:[#allocation105_spill] sm:$0xff] }
 0x9ea   :  { %v5113_v25 = vpop.eup %5112 }
 0x9eb   :  { %v3241_v52 = vmul.f32 %v5113_v25, %v3239_v9  ;;  %v7446_v25 = vld [vmem:[#allocation97_spill] sm:$0xff]  ;;  %v7447_v9 = vld [vmem:[#allocation98_spill] sm:$0xff] }
 0x9ed   :  { %v6769_v14 = vadd.f32 %v3243_v19, %v3241_v52  ;;  %v7448_v52 = vld [vmem:[#allocation99_spill] sm:$0xff]  ;;  %v7453_v19 = vld [vmem:[#allocation104_spill] sm:$0xff] }
 0x9ee   :  { %v5115_v51 = vpop.eup %5114 }
 0x9ef   :  { %v3242_v50 = vmul.f32 %v5115_v51, %v3240_v34  ;;  %v7449_v34 = vld [vmem:[#allocation100_spill] sm:$0xff]  ;;  %v7450_v51 = vld [vmem:[#allocation101_spill] sm:$0xff] }
 0x9f1   :  { %v6771_v56 = vadd.f32 %v3244_v36, %v3242_v50  ;;  %v7451_v50 = vld [vmem:[#allocation102_spill] sm:$0xff] }
 0x9f2   :  { %v7455_v36 = vld [vmem:[#allocation106_spill] sm:$0xff] }
 0x9f3   :  { %v6775_v15 = vpack.c.bf16 %v6771_v56, %v6769_v14 }
 0x9f5   :  { %4926 = vmatprep.subr.bf16.mxu0 %v6775_v15 }
 0x9f6   :  { %4927 = vmatpush3.bf16.msra.mxu0 %v6775_v15 }
 0x9f7   :  { %3370 = vmatprep.subr.bf16.mxu0 %v7415_v21  ;;  %v7456_v21 = vld [vmem:[#allocation107_spill] sm:$0xff] }
 0x9f9   :  { %4929 = vmatmul.mubr.msk.bf16.vlgmr.msra.gmra.mxu0 %vm873_vm8, %v7416_v22  ;;  %v7457_v22 = vld [vmem:[#allocation108_spill] sm:$0xff] }
 0x9fa   :  { %3371 = vmatpush1.bf16.msra.mxu0 %v7417_v20  ;;  %3390 = vmatprep.mubr.bf16.mxu0 %v7404_v6  ;;  %v7458_v20 = vld [vmem:[#allocation109_spill] sm:$0xff] }
 0x9fb   :  { %3372 = vmatprep.subr.bf16.mxu0 %v7418_v18  ;;  %v7459_v18 = vld [vmem:[#allocation110_spill] sm:$0xff] }
 0x9fe   :  { %3373 = vmatpush1.bf16.msra.mxu0 %v7419_v26  ;;  %v7460_v26 = vld [vmem:[#allocation111_spill] sm:$0xff] }
 0x9ff   :  { %3476 = vmatprep.subr.bf16.mxu0 %v7420_v29 }
 0xab9   :  { %v4930_v0 = vpop.f32.mrf.mxu0 }
 0xabb   :  { %v3282_v46 = vpop.f32.mrf.mxu0 }
 0xabd   :  { %v4931_v58 = vpop.f32.mrf.mxu0 }
 0xabe   :  { %v3298_v5 = vpack.c.bf16 %v4931_v58, %v4930_v0 }
 0xabf   :  { %v3285_v7 = vpop.f32.mrf.mxu0 }
 0xac0   :  { %v3297_v37 = vpack.c.bf16 %v3285_v7, %v3282_v46 }
 0xac2   :  { %4332 = vmatmul.mubr.msk.bf16.vlgmr.msra.gmra.mxu1 %vm715_vm11, %v3297_v37  ;;  %4334 = vmatmul.mubr.msk.bf16.vlgmr.msra.gmra.mxu0 %vm715_vm11, %v3297_v37 }
 0xac3   :  { %3347 = vmatprep.mubr.bf16.mxu1 %v7404_v6  ;;  %3400 = vmatprep.mubr.bf16.mxu0 %v7404_v6 }
 0xac4   :  { %3424 = vmatpush1.bf16.msra.mxu1 %v7421_v39  ;;  %3477 = vmatpush1.bf16.msra.mxu0 %v7422_v38  ;;  %v7461_v39 = vld [vmem:[#allocation25_spill] sm:$0xff] }
 0xac5   :  { %3425 = vmatprep.subr.bf16.mxu1 %v7423_v17  ;;  %3478 = vmatprep.subr.bf16.mxu0 %v7424_v54  ;;  %v7462_v17 = vld [vmem:[#allocation26_spill] sm:$0xff] }
 0xac8   :  { %3426 = vmatpush1.bf16.msra.mxu1 %v7425_v40  ;;  %3479 = vmatpush1.bf16.msra.mxu0 %v7426_v4  ;;  %v7463_v4 = vld [vmem:[#allocation27_spill] sm:$0xff] }
 0xac9   :  { %4638 = vmatprep.subr.bf16.mxu1 %v7427_v48  ;;  %4666 = vmatprep.subr.bf16.mxu0 %v7428_v10  ;;  %v7464_v10 = vld [vmem:[#allocation28_spill] sm:$0xff] }
 0xaca   :  { %4333 = vmatmul.mubr.msk.bf16.gmra.mxu1 %vm715_vm11, %v3298_v5  ;;  %4335 = vmatmul.mubr.msk.bf16.gmra.mxu0 %vm715_vm11, %v3298_v5 }
 0xacb   :  { %3443 = vmatprep.mubr.bf16.mxu1 %v7404_v6  ;;  %3496 = vmatprep.mubr.bf16.mxu0 %v7404_v6 }
 0xad2   :  { %4336 = vmatmul.mubr.msk.bf16.vlgmr.msra.gmra.mxu1 %vm715_vm11, %v3297_v37  ;;  %4338 = vmatmul.mubr.msk.bf16.vlgmr.msra.gmra.mxu0 %vm715_vm11, %v3297_v37 }
 0xad3   :  { %3453 = vmatprep.mubr.bf16.mxu1 %v7404_v6  ;;  %3506 = vmatprep.mubr.bf16.mxu0 %v7404_v6  ;;  %v7437_v6 = vld [vmem:[#allocation88_spill] sm:$0xff] }
 0xad4   :  { %4639 = vmatpush3.bf16.msra.mxu1 %v7429_v32  ;;  %4667 = vmatpush3.bf16.msra.mxu0 %v7430_v44  ;;  %v7465_v44 = vld [vmem:[#allocation29_spill] sm:$0xff] }
 0xad5   :  { %4640 = vmatprep.subr.bf16.mxu1 %v7431_v27  ;;  %4668 = vmatprep.subr.bf16.mxu0 %v7432_v13  ;;  %v7466_v13 = vld [vmem:[#allocation30_spill] sm:$0xff] }
 0xad8   :  { %4641 = vmatpush3.bf16.msra.mxu1 %v7433_v62  ;;  %4669 = vmatpush3.bf16.msra.mxu0 %v7434_v61  ;;  %v7467_v61 = vld [vmem:[#allocation31_spill] sm:$0xff] }
 0xad9   :  { %4642 = vmatprep.subr.bf16.mxu1 %v7435_v49  ;;  %4670 = vmatprep.subr.bf16.mxu0 %v7436_v3  ;;  %v7468_v3 = vld [vmem:[#allocation32_spill] sm:$0xff] }
 0xada   :  { %4337 = vmatmul.mubr.msk.bf16.gmra.mxu1 %vm715_vm11, %v3298_v5  ;;  %4339 = vmatmul.mubr.msk.bf16.gmra.mxu0 %vm715_vm11, %v3298_v5 }
 0xadc   :  { %4643 = vmatpush3.bf16.msra.mxu1 %v7437_v6  ;;  %4671 = vmatpush3.bf16.msra.mxu0 %v7438_v24 }
 0xadd   :  { %4644 = vmatprep.subr.bf16.mxu1 %v7439_v12  ;;  %4672 = vmatprep.subr.bf16.mxu0 %v7440_v2 }
 0xae0   :  { %4645 = vmatpush3.bf16.msra.mxu1 %v7441_v47  ;;  %4673 = vmatpush3.bf16.msra.mxu0 %v7442_v55 }
 0xae1   :  { %4646 = vmatprep.subr.bf16.mxu1 %v7443_v43  ;;  %4674 = vmatprep.subr.bf16.mxu0 %v7444_v30 }
 0xae4   :  { %4647 = vmatpush3.bf16.msra.mxu1 %v7445_v63  ;;  %4675 = vmatpush3.bf16.msra.mxu0 %v7446_v25 }
 0xae5   :  { %4648 = vmatprep.subr.bf16.mxu1 %v7447_v9  ;;  %4676 = vmatprep.subr.bf16.mxu0 %v7448_v52  ;;  %v7469_v52 = vld [vmem:[#allocation112_spill] sm:$0xff] }
 0xae8   :  { %4649 = vmatpush3.bf16.msra.mxu1 %v7449_v34  ;;  %4677 = vmatpush3.bf16.msra.mxu0 %v7450_v51  ;;  %v7470_v34 = vld [vmem:[#allocation113_spill] sm:$0xff]  ;;  %v7471_v51 = vld [vmem:[#allocation34_spill] sm:$0xff] }
 0xae9   :  { %4650 = vmatprep.subr.bf16.mxu1 %v7451_v50  ;;  %4678 = vmatprep.subr.bf16.mxu0 %v7452_v59  ;;  %v7472_v59 = vld [vmem:[#allocation36_spill] sm:$0xff] }
 0xaec   :  { %4651 = vmatpush3.bf16.msra.mxu1 %v7453_v19  ;;  %4679 = vmatpush3.bf16.msra.mxu0 %v7454_v23 }
 0xaed   :  { %4652 = vmatprep.subr.bf16.mxu1 %v7455_v36  ;;  %4680 = vmatprep.subr.bf16.mxu0 %v7456_v21  ;;  %v7473_v21 = vld [vmem:[#allocation114_spill] sm:$0xff] }
 0xaf0   :  { %4653 = vmatpush3.bf16.msra.mxu1 %v7457_v22  ;;  %4681 = vmatpush3.bf16.msra.mxu0 %v7458_v20  ;;  %v7474_v22 = vld [vmem:[#allocation115_spill] sm:$0xff] }
 0xaf1   :  { %4694 = vmatprep.subr.bf16.mxu1 %v7459_v18  ;;  %4722 = vmatprep.subr.bf16.mxu0 %v7460_v26  ;;  %v7475_v20 = vld [vmem:[#allocation35_spill] sm:$0xff]  ;;  %v7476_v26 = vld [vmem:[#allocation37_spill] sm:$0xff] }
 0xb82   :  { %v3339_v29 = vpop.f32.mrf.mxu1  ;;  %v3392_v0 = vpop.f32.mrf.mxu0 }
 0xb83   :  { %v3517_v49 = vmul.f32 %v3339_v29, %v7467_v61  ;;  %v3519_v6 = vmul.f32 %v3392_v0, %v7468_v3  ;;  %v7477_v0 = vld [vmem:[#allocation38_spill] sm:$0xff]  ;;  %v7484_v61 = vld [vmem:[#allocation119_spill] sm:$0xff] }
 0xb84   :  { %v3341_v46 = vpop.f32.mrf.mxu1  ;;  %v3394_v58 = vpop.f32.mrf.mxu0 }
 0xb85   :  { %v3518_v48 = vmul.f32 %v3341_v46, %v7463_v4  ;;  %v3520_v32 = vmul.f32 %v3394_v58, %v7464_v10  ;;  %v7478_v58 = vld [vmem:[#allocation39_spill] sm:$0xff] }
 0xb86   :  { %v3343_v7 = vpop.f32.mrf.mxu1  ;;  %v3396_v37 = vpop.f32.mrf.mxu0 }
 0xb87   :  { %v3525_v38 = vmul.f32 %v3343_v7, %v7461_v39  ;;  %v3527_v54 = vmul.f32 %v3396_v37, %v7462_v17  ;;  %v7479_v37 = vld [vmem:[#allocation33_spill] sm:$0xff] }
 0xb88   :  { %v3345_v5 = vpop.f32.mrf.mxu1  ;;  %v3398_v40 = vpop.f32.mrf.mxu0 }
 0xb89   :  { %v3526_v27 = vmul.f32 %v3345_v5, %v7465_v44  ;;  %v3528_v62 = vmul.f32 %v3398_v40, %v7466_v13  ;;  %v3549_v55 = vpack.c.bf16 %v3525_v38, %v3517_v49  ;;  %v3551_v43 = vpack.c.bf16 %v3527_v54, %v3519_v6  ;;  %v7480_v54 = vld [vmem:[#allocation40_spill] sm:$0xff]  ;;  %v7483_v13 = vld [vmem:[#allocation118_spill] sm:$0xff] }
 0xb8a   :  { %v3349_v24 = vpop.f32.mrf.mxu1  ;;  %v3402_v12 = vpop.f32.mrf.mxu0  ;;  %v7485_v6 = vld [vmem:[#allocation120_spill] sm:$0xff] }
 0xb8b   :  { %v3550_v2 = vpack.c.bf16 %v3526_v27, %v3518_v48  ;;  %v3552_v47 = vpack.c.bf16 %v3528_v62, %v3520_v32  ;;  %v3533_v39 = vmul.f32 %v3349_v24, %v7479_v37  ;;  %v3535_v5 = vmul.f32 %v3402_v12, %v7480_v54  ;;  %v7481_v48 = vld [vmem:[#allocation116_spill] sm:$0xff]  ;;  %v7482_v32 = vld [vmem:[#allocation117_spill] sm:$0xff] }
 0xb8c   :  { %v3351_v30 = vpop.f32.mrf.mxu1  ;;  %v3404_v63 = vpop.f32.mrf.mxu0  ;;  %v7486_v24 = vld [vmem:[#allocation121_spill] sm:$0xff]  ;;  %v5191_v54 = vld [vmem:[%s7028_s5 + $0x190] sm:$0xff]  }
 0xb8d   :  { %3597 = vmatprep.mubr.bf16.mxu1 %v3550_v2  ;;  %3646 = vmatprep.mubr.bf16.mxu0 %v3552_v47  ;;  %v3534_v50 = vmul.f32 %v3351_v30, %v7471_v51  ;;  %v3536_v18 = vmul.f32 %v3404_v63, %v7475_v20  ;;  %v7487_v47 = vld [vmem:[#allocation122_spill] sm:$0xff]  ;;  %v7492_v51 = vld [vmem:[#allocation123_spill] sm:$0xff] }
 0xb8e   :  { %v3353_v25 = vpop.f32.mrf.mxu1  ;;  %v3406_v9 = vpop.f32.mrf.mxu0  ;;  %3598 = vmatmul.mubr.bf16.vlgmr.msra.gmra.mxu1 %v3549_v55  ;;  %3647 = vmatmul.mubr.bf16.vlgmr.msra.gmra.mxu0 %v3551_v43  ;;  %v7488_v55 = vld [vmem:[#allocation41_spill] sm:$0xff]  ;;  %v7489_v30 = vld [vmem:[#allocation42_spill] sm:$0xff]  ;;  %v7496_v20 = vld [vmem:[#allocation127_spill] sm:$0xff] }
 0xb8f   :  { %4695 = vmatpush3.bf16.msra.mxu1 %v7469_v52  ;;  %4723 = vmatpush3.bf16.msra.mxu0 %v7470_v34  ;;  %v3541_v19 = vmul.f32 %v3353_v25, %v7472_v59  ;;  %v3543_v29 = vmul.f32 %v3406_v9, %v7476_v26  ;;  %v7490_v25 = vld [vmem:[#allocation43_spill] sm:$0xff]  ;;  %v7491_v52 = vld [vmem:[#allocation44_spill] sm:$0xff] }
 0xb90   :  { %v3355_v23 = vpop.f32.mrf.mxu1  ;;  %v3408_v36 = vpop.f32.mrf.mxu0  ;;  %4696 = vmatprep.subr.bf16.mxu1 %v7473_v21  ;;  %4724 = vmatprep.subr.bf16.mxu0 %v7474_v22  ;;  %v7494_v21 = vld [vmem:[#allocation125_spill] sm:$0xff]  ;;  %v7495_v22 = vld [vmem:[#allocation126_spill] sm:$0xff] }
 0xb91   :  { %v3542_v46 = vmul.f32 %v3355_v23, %v7477_v0  ;;  %v3544_v7 = vmul.f32 %v3408_v36, %v7478_v58  ;;  %v3557_v10 = vpack.c.bf16 %v3541_v19, %v3533_v39  ;;  %v3559_v62 = vpack.c.bf16 %v3543_v29, %v3535_v5  ;;  %v7493_v36 = vld [vmem:[#allocation124_spill] sm:$0xff]  ;;  %v7498_v0 = vld [vmem:[#allocation129_spill] sm:$0xff]  ;;  %v5192_v5 = vld [vmem:[%s7028_s5 + $0x148] sm:$0xff]  }
 0xb92   :  { %v6860_v38 = vpop.f32.mrf.mxu1  ;;  %v6862_v17 = vpop.f32.mrf.mxu0  ;;  %v7497_v29 = vld [vmem:[#allocation128_spill] sm:$0xff] }
 0xb93   :  { %v3558_v40 = vpack.c.bf16 %v3542_v46, %v3534_v50  ;;  %v3560_v4 = vpack.c.bf16 %v3544_v7, %v3536_v18  ;;  %4697 = vmatpush3.bf16.msra.mxu1 %v7481_v48  ;;  %4725 = vmatpush3.bf16.msra.mxu0 %v7482_v32  ;;  %v7499_v46 = vld [vmem:[#allocation130_spill] sm:$0xff]  ;;  %v5189_v58 = vld [vmem:[%s7028_s5 + $0x1d0] sm:$0xff]  }
 0xb94   :  { %v3447_v44 = vpop.f32.mrf.mxu1  ;;  %v3500_v27 = vpop.f32.mrf.mxu0  ;;  %4698 = vmatprep.subr.bf16.mxu1 %v7483_v13  ;;  %4726 = vmatprep.subr.bf16.mxu0 %v7484_v61  ;;  %v5190_v39 = vld [vmem:[%s7028_s5 + $0x110] sm:$0xff]   ;;  %v7500_v32 = vld [vmem:[#allocation54_spill] sm:$0xff] }
 0xb95   :  { %3605 = vmatprep.mubr.bf16.mxu1 %v3558_v40  ;;  %3654 = vmatprep.mubr.bf16.mxu0 %v3560_v4  ;;  %v3522_v43 = vmul.f32 %v3447_v44, %v7488_v55  ;;  %v3524_v63 = vmul.f32 %v3500_v27, %v7489_v30  ;;  %v5193_v40 = vld [vmem:[%s7028_s5 + $0x1c8] sm:$0xff]   ;;  %v5196_v13 = vld [vmem:[%s7028_s5 + $0x140] sm:$0xff]  }
 0xb96   :  { %v3449_v49 = vpop.f32.mrf.mxu1  ;;  %v3502_v3 = vpop.f32.mrf.mxu0  ;;  %3606 = vmatmul.mubr.bf16.gmra.mxu1 %v3557_v10  ;;  %3655 = vmatmul.mubr.bf16.gmra.mxu0 %v3559_v62  ;;  %v5194_v10 = vld [vmem:[%s7028_s5 + $0x108] sm:$0xff]  }
 0xb97   :  { %4699 = vmatpush3.bf16.msra.mxu1 %v7485_v6  ;;  %4727 = vmatpush3.bf16.msra.mxu0 %v7486_v24  ;;  %v3529_v44 = vmul.f32 %v3449_v49, %v7500_v32  ;;  %v5195_v27 = vld [vmem:[%s7028_s5 + $0x188] sm:$0xff]   ;;  %v7502_v6 = vld [vmem:[#allocation56_spill] sm:$0xff]  ;;  %v7503_v49 = vld [vmem:[#allocation58_spill] sm:$0xff] }
 0xb98   :  { %v3451_v12 = vpop.f32.mrf.mxu1  ;;  %v3504_v2 = vpop.f32.mrf.mxu0  ;;  %4700 = vmatprep.subr.bf16.mxu1 %v7487_v47  ;;  %4728 = vmatprep.subr.bf16.mxu0 %v7492_v51  ;;  %v7501_v62 = vld [vmem:[#allocation55_spill] sm:$0xff]  ;;  %v5199_v51 = vld [vmem:[%s7028_s5 + $0x180] sm:$0xff]  }
 0xb99   :  { %v3530_v9 = vmul.f32 %v3451_v12, %v7490_v25  ;;  %v3532_v34 = vmul.f32 %v3504_v2, %v7491_v52  ;;  %v3531_v61 = vmul.f32 %v3502_v3, %v7501_v62  ;;  %v5197_v12 = vld [vmem:[%s7028_s5 + $0x1c0] sm:$0xff]   ;;  %v3521_v2 = vmul.f32 %v6860_v38, %v7503_v49  ;;  %v7504_v47 = vld [vmem:[#allocation59_spill] sm:$0xff] }
 0xb9a   :  { %v6877_v50 = vpop.f32.mrf.mxu1  ;;  %v3508_v23 = vpop.f32.mrf.mxu0  ;;  %v5198_v3 = vld [vmem:[%s7028_s5 + $0x100] sm:$0xff]   ;;  %v7507_v52 = vld [vmem:[#allocation63_spill] sm:$0xff] }
 0xb9b   :  { %v3554_v59 = vpack.c.bf16 %v3530_v9, %v3522_v43  ;;  %v3556_v19 = vpack.c.bf16 %v3532_v34, %v3524_v63  ;;  %4701 = vmatpush3.bf16.msra.mxu1 %v7493_v36  ;;  %4729 = vmatpush3.bf16.msra.mxu0 %v7494_v21  ;;  %v7505_v43 = vld [vmem:[#allocation61_spill] sm:$0xff]  ;;  %v7506_v63 = vld [vmem:[#allocation62_spill] sm:$0xff]  ;;  %v3553_v9 = vpack.c.bf16 %v3529_v44, %v3521_v2  ;;  %v7509_v21 = vld [vmem:[#allocation64_spill] sm:$0xff] }
 0xb9c   :  { %4702 = vmatprep.subr.bf16.mxu1 %v7495_v22  ;;  %4730 = vmatprep.subr.bf16.mxu0 %v7496_v20  ;;  %v3457_v18 = vpop.f32.mrf.mxu1  ;;  %v3510_v26 = vpop.f32.mrf.mxu0  ;;  %v3523_v30 = vmul.f32 %v6862_v17, %v7505_v43  ;;  %v7510_v22 = vld [vmem:[#allocation66_spill] sm:$0xff] }
 0xb9d   :  { %3695 = vmatprep.mubr.bf16.mxu1 %v3554_v59  ;;  %3744 = vmatprep.mubr.bf16.mxu0 %v3556_v19  ;;  %v3538_v25 = vmul.f32 %v3457_v18, %v7506_v63  ;;  %v3540_v34 = vmul.f32 %v3510_v26, %v7507_v52  ;;  %v7508_v19 = vld [vmem:[#allocation65_spill] sm:$0xff]  ;;  %v7511_v18 = vld [vmem:[#allocation67_spill] sm:$0xff] }
 0xb9e   :  { %v3459_v7 = vpop.f32.mrf.mxu1  ;;  %v3512_v37 = vpop.f32.mrf.mxu0  ;;  %v3555_v38 = vpack.c.bf16 %v3531_v61, %v3523_v30  ;;  %v3537_v26 = vmul.f32 %v6877_v50, %v7511_v18  ;;  %v7514_v50 = vld [vmem:[#allocation70_spill] sm:$0xff] }
 0xb9f   :  { %4703 = vmatpush3.bf16.msra.mxu1 %v7497_v29  ;;  %4731 = vmatpush3.bf16.msra.mxu0 %v7498_v0  ;;  %v3545_v36 = vmul.f32 %v3459_v7, %v7508_v19  ;;  %v3547_v20 = vmul.f32 %v3512_v37, %v7510_v22  ;;  %v7512_v29 = vld [vmem:[#allocation69_spill] sm:$0xff] }
 0xba0   :  { %4704 = vmatprep.subr.bf16.mxu1 %v7499_v46  ;;  %4732 = vmatprep.subr.bf16.mxu0 %v5189_v58  ;;  %v3461_v4 = vpop.f32.mrf.mxu1  ;;  %v3514_v48 = vpop.f32.mrf.mxu0  ;;  %v3539_v0 = vmul.f32 %v3508_v23, %v7512_v29  ;;  %v7513_v58 = vld [vmem:[#allocation68_spill] sm:$0xff]  ;;  %v7515_v23 = vld [vmem:[#allocation71_spill] sm:$0xff] }
 0xba1   :  { %v3546_v24 = vmul.f32 %v3461_v4, %v7502_v6  ;;  %v3548_v55 = vmul.f32 %v3514_v48, %v7504_v47  ;;  %v3561_v46 = vpack.c.bf16 %v3545_v36, %v3537_v26 }
 0xba3   :  { %4705 = vmatpush3.bf16.msra.mxu1 %v5190_v39  ;;  %4733 = vmatpush3.bf16.msra.mxu0 %v5191_v54  ;;  %v3562_v59 = vpack.c.bf16 %v3546_v24, %v3538_v25  ;;  %v3564_v17 = vpack.c.bf16 %v3548_v55, %v3540_v34  ;;  %v3563_v39 = vpack.c.bf16 %v3547_v20, %v3539_v0 }
 0xba4   :  { %4706 = vmatprep.subr.bf16.mxu1 %v5192_v5  ;;  %4734 = vmatprep.subr.bf16.mxu0 %v5193_v40 }
 0xba7   :  { %4707 = vmatpush3.bf16.msra.mxu1 %v5194_v10  ;;  %4735 = vmatpush3.bf16.msra.mxu0 %v5195_v27 }
 0xba8   :  { %4708 = vmatprep.subr.bf16.mxu1 %v5196_v13  ;;  %4736 = vmatprep.subr.bf16.mxu0 %v5197_v12 }
 0xbab   :  { %4709 = vmatpush3.bf16.msra.mxu1 %v5198_v3  ;;  %4737 = vmatpush3.bf16.msra.mxu0 %v5199_v51 }
 0xbac   :  { %4932 = vmatprep.subr.bf16.mxu1 %v7282_v11  ;;  %4940 = vmatprep.subr.bf16.mxu0 %v7282_v11 }
 0xbae   :  { %3696 = vmatmul.mubr.bf16.vlgmr.msra.gmra.mxu1 %v3553_v9  ;;  %3745 = vmatmul.mubr.bf16.vlgmr.msra.gmra.mxu0 %v3555_v38 }
 0xbaf   :  { %3703 = vmatprep.mubr.bf16.mxu1 %v3562_v59  ;;  %3752 = vmatprep.mubr.bf16.mxu0 %v3564_v17 }
 0xbb0   :  { %4941 = vmatpush3.bf16.msra.mxu0 %v7509_v21 }
 0xbb1   :  { %4942 = vmatprep.subr.bf16.mxu0 %v7282_v11 }
 0xbb4   :  { %4943 = vmatpush3.bf16.msra.mxu0 %v7513_v58 }
 0xbb5   :  { %4956 = vmatprep.subr.bf16.mxu0 %v7282_v11 }
 0xbb6   :  { %3704 = vmatmul.mubr.bf16.gmra.mxu1 %v3561_v46  ;;  %3753 = vmatmul.mubr.bf16.gmra.mxu0 %v3563_v39 }
 0xbb7   :  { %4936 = vmatprep.mubr.msk.bf16.mxu1 %vm5255_vm1, %v7282_v11  ;;  %4944 = vmatprep.mubr.msk.bf16.mxu0 %vm5255_vm1, %v7282_v11 }
 0xbbe   :  { %4945 = vmatmul.mubr.msk.bf16.vlgmr.msra.gmra.mxu0 %vm715_vm11, %v6775_v15 }
 0xbbf   :  { %4957 = vmatpush3.bf16.msra.mxu0 %v7514_v50  ;;  %4960 = vmatprep.mubr.msk.bf16.mxu0 %vm5255_vm1, %v7282_v11 }
 0xbc0   :  { %4958 = vmatprep.subr.bf16.mxu0 %v7282_v11 }
 0xbc3   :  { %4959 = vmatpush3.bf16.msra.mxu0 %v7515_v23 }
 0xbc4   :  { %4972 = vmatprep.subr.bf16.mxu0 %v7282_v11 }
 0xc4e   :  { %v4654_v7 = vpop.f32.mrf.mxu1  ;;  %v4682_v37 = vpop.f32.mrf.mxu0 }
 0xc50   :  { %v4655_v54 = vpop.f32.mrf.mxu1  ;;  %v4683_v5 = vpop.f32.mrf.mxu0 }
 0xc51   :  { %v4656_v21 = vadd.f32 %v4655_v54, %v4654_v7  ;;  %v4684_v22 = vadd.f32 %v4683_v5, %v4682_v37 }
 0xc52   :  { %v4657_v40 = vpop.f32.mrf.mxu1  ;;  %v4685_v4 = vpop.f32.mrf.mxu0 }
 0xc54   :  { %v4658_v48 = vpop.f32.mrf.mxu1  ;;  %v4686_v10 = vpop.f32.mrf.mxu0 }
 0xc55   :  { %v4659_v34 = vadd.f32 %v4658_v48, %v4657_v40  ;;  %v4687_v51 = vadd.f32 %v4686_v10, %v4685_v4  ;;  %v3649_v40 = vadd.f32 %v4684_v22, %v4656_v21 }
 0xc56   :  { %v4660_v32 = vpop.f32.mrf.mxu1  ;;  %v4688_v44 = vpop.f32.mrf.mxu0 }
 0xc57   :  { %v3652_v0 = vadd.f32 %v4687_v51, %v4659_v34 }
 0xc58   :  { %v4661_v27 = vpop.f32.mrf.mxu1  ;;  %v4689_v13 = vpop.f32.mrf.mxu0 }
 0xc59   :  { %v4662_v3 = vadd.f32 %v4661_v27, %v4660_v32  ;;  %v4690_v9 = vadd.f32 %v4689_v13, %v4688_v44 }
 0xc5a   :  { %v4663_v62 = vpop.f32.mrf.mxu1  ;;  %v4691_v61 = vpop.f32.mrf.mxu0 }
 0xc5b   :  { %v3657_v18 = vadd.f32 %v4690_v9, %v4662_v3 }
 0xc5c   :  { %v4664_v6 = vpop.f32.mrf.mxu1  ;;  %v4692_v24 = vpop.f32.mrf.mxu0 }
 0xc5d   :  { %v4665_v59 = vadd.f32 %v4664_v6, %v4663_v62  ;;  %v4693_v17 = vadd.f32 %v4692_v24, %v4691_v61 }
 0xc5f   :  { %v3660_v58 = vadd.f32 %v4693_v17, %v4665_v59  ;;  %v5202_v59 = vld [vmem:[%s7040_s17] ss:$0 sm:$0xff] }
 0xc6e   :  { %v4710_v12 = vpop.f32.mrf.mxu1  ;;  %v4738_v49 = vpop.f32.mrf.mxu0 }
 0xc70   :  { %v4711_v2 = vpop.f32.mrf.mxu1  ;;  %v4739_v47 = vpop.f32.mrf.mxu0 }
 0xc71   :  { %v4712_v39 = vadd.f32 %v4711_v2, %v4710_v12  ;;  %v4740_v62 = vadd.f32 %v4739_v47, %v4738_v49 }
 0xc72   :  { %v4713_v55 = vpop.f32.mrf.mxu1  ;;  %v4741_v43 = vpop.f32.mrf.mxu0 }
 0xc73   :  { %v3698_v13 = vadd.f32 %v4712_v39, %v3649_v40  ;;  %v5204_v40 = vld [vmem:[%s7040_s17 + $0x1] ss:$0 sm:$0xff] }
 0xc74   :  { %v4714_v30 = vpop.f32.mrf.mxu1  ;;  %v4742_v63 = vpop.f32.mrf.mxu0 }
 0xc75   :  { %v4715_v26 = vadd.f32 %v4714_v30, %v4713_v55  ;;  %v4743_v7 = vadd.f32 %v4742_v63, %v4741_v43  ;;  %v3747_v55 = vadd.f32 %v4740_v62, %v3698_v13 }
 0xc76   :  { %v4716_v25 = vpop.f32.mrf.mxu1  ;;  %v4744_v52 = vpop.f32.mrf.mxu0 }
 0xc77   :  { %v3701_v4 = vadd.f32 %v4715_v26, %v3652_v0 }
 0xc78   :  { %v4717_v38 = vpop.f32.mrf.mxu1  ;;  %v4745_v36 = vpop.f32.mrf.mxu0 }
 0xc79   :  { %v4718_v19 = vadd.f32 %v4717_v38, %v4716_v25  ;;  %v4746_v48 = vadd.f32 %v4745_v36, %v4744_v52  ;;  %v3750_v61 = vadd.f32 %v4743_v7, %v3701_v4 }
 0xc7a   :  { %v4719_v20 = vpop.f32.mrf.mxu1  ;;  %v4747_v29 = vpop.f32.mrf.mxu0 }
 0xc7b   :  { %v3706_v50 = vadd.f32 %v4718_v19, %v3657_v18  ;;  %v3761_v2 = vpack.c.bf16 %v3750_v61, %v3747_v55 }
 0xc7c   :  { %v4720_v46 = vpop.f32.mrf.mxu1  ;;  %v4748_v32 = vpop.f32.mrf.mxu0 }
 0xc7d   :  { %v4721_v23 = vadd.f32 %v4720_v46, %v4719_v20  ;;  %v4749_v44 = vadd.f32 %v4748_v32, %v4747_v29  ;;  %v3755_v37 = vadd.f32 %v4746_v48, %v3706_v50  ;;  %v5203_v50 = vld [vmem:[%s7039_s16 + $0x1] ss:$0 sm:$0xff] }
 0xc7e   :  { %v3843_v27 = vpop.f32.mrf.mxu0 }
 0xc7f   :  { %v3709_v10 = vadd.f32 %v4721_v23, %v3660_v58 }
 0xc80   :  { %v4946_v5 = vpop.f32.mrf.mxu0 }
 0xc81   :  { %v3758_v54 = vadd.f32 %v4749_v44, %v3709_v10 }
 0xc82   :  { %v3846_v24 = vpop.f32.mrf.mxu0 }
 0xc83   :  { %v3762_v6 = vpack.c.bf16 %v3758_v54, %v3755_v37 }
 0xc84   :  { %v4947_v12 = vpop.f32.mrf.mxu0 }
 0xc85   :  { %4933 = vmatpush3.bf16.msra.mxu1 %v3762_v6 }
 0xc86   :  { %4934 = vmatprep.subr.bf16.mxu1 %v7282_v11 }
 0xc89   :  { %4935 = vmatpush3.bf16.msra.mxu1 %v3761_v2 }
 0xc8a   :  { %4948 = vmatprep.subr.bf16.mxu1 %v7282_v11 }
 0xc8c   :  { %4937 = vmatmul.mubr.msk.bf16.vlgmr.msra.gmra.mxu1 %vm715_vm11, %v6067_v41 }
 0xc8d   :  { %4949 = vmatpush3.bf16.msra.mxu1 %v6086_v57  ;;  %4952 = vmatprep.mubr.msk.bf16.mxu1 %vm5255_vm1, %v7282_v11  ;;  %v5200_v57 = vld [vmem:[%s7036_s13] ss:$0 sm:$0xff] }
 0xc8e   :  { %4950 = vmatprep.subr.bf16.mxu1 %v7282_v11 }
 0xc91   :  { %4951 = vmatpush3.bf16.msra.mxu1 %v6106_v8 }
 0xc92   :  { %4964 = vmatprep.subr.bf16.mxu1 %v7282_v11 }
 0xd4c   :  { %v3797_v49 = vpop.f32.mrf.mxu1 }
 0xd4d   :  { %v3804_v47 = vmul.f32 %v6117_v53, %v3797_v49 }
 0xd4e   :  { %v4938_v43 = vpop.f32.mrf.mxu1 }
 0xd4f   :  { %v3850_v30 = vadd.f32 %v3843_v27, %v3804_v47 }
 0xd50   :  { %v3800_v63 = vpop.f32.mrf.mxu1 }
 0xd51   :  { %v3805_v25 = vmul.f32 %v6120_v35, %v3800_v63  ;;  %v3852_v3 = vadd.f32 %v5200_v57, %v3850_v30  ;;  %v5205_v30 = vld [vmem:[%s7040_s17 + $0x2] ss:$0 sm:$0xff] }
 0xd52   :  { %v4939_v41 = vpop.f32.mrf.mxu1 }
 0xd53   :  { %v3851_v9 = vadd.f32 %v3846_v24, %v3805_v25  ;;  %v3854_v34 = vmax.f32 %v3852_v3, 0.0 }
 0xd55   :  { %v3853_v52 = vadd.f32 %v5200_v57, %v3851_v9  ;;  %v5206_v57 = vld [vmem:[%s7039_s16 + $0x2] ss:$0 sm:$0xff] }
 0xd57   :  { %v3855_v8 = vmax.f32 %v3853_v52, 0.0 }
 0xd59   :  { %v3856_v51 = vpack.c.bf16 %v3855_v8, %v3854_v34 }
 0xd5b   :  { %4953 = vmatmul.mubr.msk.bf16.vlgmr.msra.gmra.mxu1 %vm715_vm11, %v3856_v51  ;;  %4961 = vmatmul.mubr.msk.bf16.vlgmr.msra.gmra.mxu0 %vm715_vm11, %v3856_v51 }
 0xd5c   :  { %4965 = vmatpush3.bf16.msra.mxu1 %v6142_v31  ;;  %4973 = vmatpush3.bf16.msra.mxu0 %v6144_v1 }
 0xd5d   :  { %4966 = vmatprep.subr.bf16.mxu1 %v7282_v11  ;;  %4974 = vmatprep.subr.bf16.mxu0 %v7282_v11 }
 0xd5e   :  { %4968 = vmatprep.mubr.msk.bf16.mxu1 %vm5255_vm1, %v7282_v11  ;;  %4976 = vmatprep.mubr.msk.bf16.mxu0 %vm5255_vm1, %v7282_v11 }
 0xd60   :  { %4967 = vmatpush3.bf16.msra.mxu1 %v6162_v33  ;;  %4975 = vmatpush3.bf16.msra.mxu0 %v6164_v42 }
 0xd61   :  { %4980 = vmatprep.subr.bf16.mxu1 %v7282_v11  ;;  %4988 = vmatprep.subr.bf16.mxu0 %v7282_v11 }
 0xd63   :  { %4969 = vmatmul.mubr.msk.bf16.vlgmr.msra.gmra.mxu1 %vm715_vm11, %v3856_v51  ;;  %4977 = vmatmul.mubr.msk.bf16.vlgmr.msra.gmra.mxu0 %vm715_vm11, %v6775_v15 }
 0xd64   :  { %4981 = vmatpush3.bf16.msra.mxu1 %v6186_v60  ;;  %4989 = vmatpush3.bf16.msra.mxu0 %v6188_v28 }
 0xd65   :  { %4982 = vmatprep.subr.bf16.mxu1 %v7282_v11  ;;  %4990 = vmatprep.subr.bf16.mxu0 %v7282_v11 }
 0xd66   :  { %4984 = vmatprep.mubr.msk.bf16.mxu1 %vm5255_vm1, %v7282_v11  ;;  %4992 = vmatprep.mubr.msk.bf16.mxu0 %vm5255_vm1, %v7282_v11 }
 0xd68   :  { %4983 = vmatpush3.bf16.msra.mxu1 %v6209_v45  ;;  %4991 = vmatpush3.bf16.msra.mxu0 %v6211_v16  ;;  %v5201_v45 = vld [vmem:[%s7039_s16] ss:$0 sm:$0xff]  ;;  %s5258_s16 = smov [#allocation5]  }
 0xd69   :  { %s4155_s17 = sshll.u32 %s5258_s16, 4  ;;  %s4156_s17 = int_to_ptr.vmem [resolvable:$true] %s4155_s17 }
 0xd6a   :  { %s5227_s9 = scalar_lea.vmem %s4156_s17, 256  ;;  %p5232_p6 = scmp.lt.s32.totalorder %s4156_s17, %s4156_s17 }
 0xd6b   :  { %4985 = vmatmul.mubr.msk.bf16.vlgmr.msra.gmra.mxu1 %vm715_vm11, %v6775_v15  ;;  %4993 = vmatmul.mubr.msk.bf16.vlgmr.msra.gmra.mxu0 %vm715_vm11, %v6775_v15  ;;  %p5228_p5 = scmp.ne.s32.totalorder %s4156_s17, %s5227_s9  ;;  %p5233_p7 = scmp.lt.s32.totalorder %s5227_s9, %s5227_s9 }
 0xd6d   :  { %p5234_p8 = por %p5233_p7, %p5232_p6 }
 0xd6f   :  { %p5235_p9 = pnand %p5234_p8, %p5228_p5 }
 0xe1b   :  { %v3894_v53 = vpop.f32.mrf.mxu1  ;;  %v3935_v35 = vpop.f32.mrf.mxu0 }
 0xe1c   :  { %v3895_v16 = vadd.f32 %v5201_v45, %v3894_v53  ;;  %v3936_v23 = vadd.f32 %v5203_v50, %v3935_v35 }
 0xe1d   :  { %v4954_v31 = vpop.f32.mrf.mxu1  ;;  %v4962_v1 = vpop.f32.mrf.mxu0 }
 0xe1f   :  { %v3897_v33 = vpop.f32.mrf.mxu1  ;;  %v3938_v42 = vpop.f32.mrf.mxu0 }
 0xe20   :  { %v3898_v20 = vadd.f32 %v5201_v45, %v3897_v33  ;;  %v3939_v7 = vadd.f32 %v5203_v50, %v3938_v42 }
 0xe21   :  { %v4955_v60 = vpop.f32.mrf.mxu1  ;;  %v4963_v28 = vpop.f32.mrf.mxu0 }
 0xe23   :  { %v3976_v38 = vpop.f32.mrf.mxu1  ;;  %v4017_v11 = vpop.f32.mrf.mxu0 }
 0xe24   :  { %v4018_v15 = vadd.f32 %v5202_v59, %v4017_v11  ;;  %v3977_v3 = vadd.f32 %v5206_v57, %v3976_v38 }
 0xe25   :  { %v4970_v17 = vpop.f32.mrf.mxu1  ;;  %v4978_v19 = vpop.f32.mrf.mxu0 }
 0xe26   :  { %v4106_v36 = vadd.f32 %v4018_v15, %v3895_v16 }
 0xe27   :  { %v3979_v21 = vpop.f32.mrf.mxu1  ;;  %v4020_v22 = vpop.f32.mrf.mxu0 }
 0xe28   :  { %v4348_v18 = vmul.f32 -1.442695, %v4106_v36  ;;  %v4021_v26 = vadd.f32 %v5202_v59, %v4020_v22  ;;  %v3980_v51 = vadd.f32 %v5206_v57, %v3979_v21 }
 0xe29   :  { %v4971_v29 = vpop.f32.mrf.mxu1  ;;  %v4979_v0 = vpop.f32.mrf.mxu0 }
 0xe2a   :  { %5116 = vpow2.f32 %v4348_v18  ;;  %v4107_v46 = vadd.f32 %v4021_v26, %v3898_v20 }
 0xe2b   :  { %v4058_v58 = vpop.f32.mrf.mxu1  ;;  %v4099_v39 = vpop.f32.mrf.mxu0 }
 0xe2c   :  { %v4349_v32 = vmul.f32 -1.442695, %v4107_v46  ;;  %v4059_v4 = vadd.f32 %v5204_v40, %v4058_v58  ;;  %v4100_v63 = vadd.f32 %v5205_v30, %v4099_v39 }
 0xe2d   :  { %v4986_v48 = vpop.f32.mrf.mxu1  ;;  %v4994_v10 = vpop.f32.mrf.mxu0 }
 0xe2e   :  { %5118 = vpow2.f32 %v4349_v32  ;;  %v4120_v44 = vadd.f32 %v4059_v4, %v3936_v23 }
 0xe2f   :  { %v4061_v27 = vpop.f32.mrf.mxu1  ;;  %v4102_v13 = vpop.f32.mrf.mxu0 }
 0xe30   :  { %v4350_v37 = vmul.f32 -1.442695, %v4120_v44  ;;  %v4062_v54 = vadd.f32 %v5204_v40, %v4061_v27  ;;  %v4103_v34 = vadd.f32 %v5205_v30, %v4102_v13 }
 0xe31   :  { %v4987_v5 = vpop.f32.mrf.mxu1  ;;  %v4995_v62 = vpop.f32.mrf.mxu0 }
 0xe32   :  { %v4121_v61 = vadd.f32 %v4062_v54, %v3939_v7  ;;  %5120 = vpow2.f32 %v4350_v37 }
 0xe34   :  { %v4351_v6 = vmul.f32 -1.442695, %v4121_v61 }
 0xe36   :  { %5122 = vpow2.f32 %v4351_v6 }
 0xe37   :  { %v5117_v24 = vpop.eup %5116 }
 0xe38   :  { %v4114_v55 = vadd.f32 1.0, %v5117_v24 }
 0xe3a   :  { %5124 = vrcp.f32 %v4114_v55 }
 0xe3b   :  { %v5119_v12 = vpop.eup %5118 }
 0xe3c   :  { %v4115_v2 = vadd.f32 1.0, %v5119_v12 }
 0xe3e   :  { %5126 = vrcp.f32 %v4115_v2 }
 0xe3f   :  { %v5121_v49 = vpop.eup %5120 }
 0xe40   :  { %v4128_v43 = vadd.f32 1.0, %v5121_v49 }
 0xe42   :  { %5128 = vrcp.f32 %v4128_v43 }
 0xe43   :  { %v5123_v47 = vpop.eup %5122 }
 0xe44   :  { %v4129_v41 = vadd.f32 1.0, %v5123_v47 }
 0xe46   :  { %5130 = vrcp.f32 %v4129_v41 }
 0xe47   :  { %v5125_v25 = vpop.eup %5124 }
 0xe48   :  { %v4134_v9 = vmul.f32 %v5125_v25, %v4100_v63 }
 0xe4a   :  { %v4136_v52 = vadd.f32 %v4134_v9, %v3977_v3 }
 0xe4b   :  { %v5127_v8 = vpop.eup %5126 }
 0xe4c   :  { %5132 = vtanh.f32 %v4136_v52  ;;  %v4135_v53 = vmul.f32 %v5127_v8, %v4103_v34 }
 0xe4e   :  { %v4137_v35 = vadd.f32 %v4135_v53, %v3980_v51 }
 0xe4f   :  { %v5129_v31 = vpop.eup %5128 }
 0xe50   :  { %5134 = vtanh.f32 %v4137_v35  ;;  %v4140_v33 = vsub.f32 1.0, %v5129_v31  ;;  %v4144_v28 = vmul.f32 %v5129_v31, %v6769_v14 }
 0xe53   :  { %v5131_v1 = vpop.eup %5130 }
 0xe54   :  { %v4141_v11 = vsub.f32 1.0, %v5131_v1  ;;  %v4145_v59 = vmul.f32 %v5131_v1, %v6771_v56 }
 0xe59   :  { %v5133_v42 = vpop.eup %5132 }
 0xe5a   :  { %v4142_v60 = vmul.f32 %v5133_v42, %v4140_v33 }
 0xe5c   :  { %v4146_v38 = vadd.f32 %v4144_v28, %v4142_v60 }
 0xe5d   :  { %v5135_v45 = vpop.eup %5134 }
 0xe5e   :  { %v4143_v16 = vmul.f32 %v5135_v45, %v4141_v11  ;;  %4148 = vst.msk [vmem:[#allocation5] sm:$0xff] %vm715_vm11, %v4146_v38 }
 0xe60   :  { %v4147_v15 = vadd.f32 %v4145_v59, %v4143_v16 }
 0xe62   :  { %4149 = vst.msk [vmem:[#allocation5 + $0x8] sm:$0xff] %vm715_vm11, %v4147_v15 }
 0xe63   :  { %5238 = shalt.err (!%p5235_p9)
}
 0xe64   :  { %s5259_s12 = smov 128   ;;  %s5260_s8 = smov 8  }
 0xe65   :  { %4161 = dma.vmem_to_hbm [thread:$0]  %s4156_s17, 256, %s7041_s18, [#allocation4], %s5259_s12, %s5259_s12, %s5260_s8  }
 0xe66   :  { %5249 = dma.done.wait [#allocation4], 256  }
 0xe67   :  { %5250 = vsyncadd [#allocation4], 4294967040 }
 0xe68   :  { %4165 = vsyncpa [#allocation3], 1 }
 0xe69   :  { %4166 = vsyncpa [#allocation4], 1 }

</bundles_post_ra>
